<compile_context>
chip_gen: v5e
topology: v5e:2x2
jax: 0.10.0
libtpu: 0.0.40
codegen_flags: <defaults>
</compile_context>

<pallas_src>
import jax
import jax.numpy as jnp
from jax.experimental import pallas as pl
from jax.experimental.pallas import tpu as pltpu


def _decoder_block_kernel(
    z_ref,        # [N, H]            f32   resident (residual input)
    zcat_ref,     # [TILE_M, 2H+E]    bf16  edge tile = [z_src, z_dst, ea]
    dst_ref,      # [TILE_M, 1]       i32   edge tile (-1 marks padding edges)
    w_ffw_ref,    # [2H+E, OUT_PAD]   bf16  resident (zero-padded columns)
    b_ffw_ref,    # [1, OUT_PAD]      f32   resident
    w_cg_ref,     # [2H+E, 2H]        bf16  resident (fused, row-permuted lin_f|lin_s)
    b_cg_ref,     # [1, 2H]           f32   resident ([b_f, b_s])
    z_node_ref,   # [N, H]            f32   resident accumulator output
    z_edge_ref,   # [TILE_M, OUT_PAD] f32   edge tile output (lane-dense)
):
    step = pl.program_id(0)

    z_cat = zcat_ref[...]                                            # [T, D] bf16

    # ---- ffw_layer: Linear(2H+E -> 2H+E) + ReLU, output padded to 128 lanes ----
    y = jnp.dot(z_cat, w_ffw_ref[...],
                preferred_element_type=jnp.float32) + b_ffw_ref[...]
    z_edge_ref[...] = jnp.maximum(y, 0.0)

    # ---- CGConv messages: single fused gate/core matmul ----
    cg = jnp.dot(z_cat, w_cg_ref[...],
                 preferred_element_type=jnp.float32) + b_cg_ref[...]  # [T, 2H]
    hidden = cg.shape[-1] // 2
    gate = jax.nn.sigmoid(cg[:, :hidden])
    core = jax.nn.softplus(cg[:, hidden:])
    msg = (gate * core).astype(jnp.bfloat16)                          # [T, H]

    # ---- scatter-add onto destination nodes: per-tile bf16 one-hot on the MXU ----
    n_nodes = z_node_ref.shape[0]
    tile_m = msg.shape[0]
    node_iota = jax.lax.broadcasted_iota(jnp.int32, (tile_m, n_nodes), 1)
    dst_oh = (dst_ref[...] == node_iota).astype(jnp.bfloat16)         # [T, N]
    agg = jax.lax.dot_general(
        dst_oh, msg, (((0,), (0,)), ((), ())),
        preferred_element_type=jnp.float32)                           # [N, H]

    @pl.when(step == 0)
    def _():
        z_node_ref[...] = z_ref[...]          # residual init
    z_node_ref[...] += agg


def decoder_block_forward(z, edge_attr, edge_index, params, *, tile_m=256):
    n_nodes, hidden = z.shape
    n_edges = edge_index.shape[1]
    e_feat = edge_attr.shape[1]
    d_cat = 2 * hidden + e_feat
    out_pad = pl.cdiv(d_cat, 128) * 128            # lane-dense z_edge width

    src = edge_index[0].astype(jnp.int32)
    dst = edge_index[1].astype(jnp.int32)

    # Index-based gather (no one-hots) + single concat, once at trace level.
    z_f32 = z.astype(jnp.float32)
    z_src = jnp.take(z_f32, src, axis=0)
    z_dst = jnp.take(z_f32, dst, axis=0)
    z_cat = jnp.concatenate(
        [z_src, z_dst, edge_attr.astype(jnp.float32)], axis=-1
    ).astype(jnp.bfloat16)                                            # [M, D]

    # Pad the edge dim to a tile multiple; padded edges get dst=-1 so they
    # never match the scatter one-hot (no contribution), and their z_edge rows
    # are sliced off below.
    num_tiles = pl.cdiv(n_edges, tile_m)
    m_pad = num_tiles * tile_m
    pad = m_pad - n_edges
    dst_col = dst.reshape(n_edges, 1)
    if pad:
        z_cat = jnp.pad(z_cat, ((0, pad), (0, 0)))
        dst_col = jnp.pad(dst_col, ((0, pad), (0, 0)), constant_values=-1)

    # ffw weight/bias zero-padded to a multiple-of-128 output width (bf16 weight).
    w_ffw = jnp.zeros((d_cat, out_pad), jnp.float32)
    w_ffw = w_ffw.at[:, :d_cat].set(params["w_ffw"]).astype(jnp.bfloat16)
    b_ffw = jnp.zeros((1, out_pad), jnp.float32).at[:, :d_cat].set(params["b_ffw"])

    # Fused CGConv weight: one [D, 2H] matmul replaces lin_f + lin_s; rows are
    # permuted so it consumes z_cat's [z_src, z_dst, ea] ordering directly
    # (PyG message input order is [x_i, x_j] = [z_dst, z_src]; ea rows are 0).
    w_f, w_s = params["w_f"], params["w_s"]                 # [2H, H], [in, out]
    w_cg = jnp.zeros((d_cat, 2 * hidden), jnp.float32)
    w_cg = w_cg.at[:hidden, :hidden].set(w_f[hidden:])              # z_src -> gate
    w_cg = w_cg.at[hidden:2 * hidden, :hidden].set(w_f[:hidden])    # z_dst -> gate
    w_cg = w_cg.at[:hidden, hidden:].set(w_s[hidden:])              # z_src -> core
    w_cg = w_cg.at[hidden:2 * hidden, hidden:].set(w_s[:hidden])    # z_dst -> core
    w_cg = w_cg.astype(jnp.bfloat16)
    b_cg = jnp.concatenate([params["b_f"], params["b_s"]], axis=-1)  # [1, 2H]

    out_shapes = (
        jax.ShapeDtypeStruct((n_nodes, hidden), jnp.float32),
        jax.ShapeDtypeStruct((m_pad, out_pad), jnp.float32),
    )

    z_node, z_edge_padded = pl.pallas_call(
        _decoder_block_kernel,
        out_shape=out_shapes,
        grid=(num_tiles,),
        in_specs=[
            pl.BlockSpec((n_nodes, hidden), lambda i: (0, 0)),     # z (resident)
            pl.BlockSpec((tile_m, d_cat), lambda i: (i, 0)),       # z_cat tile
            pl.BlockSpec((tile_m, 1), lambda i: (i, 0)),           # dst tile
            pl.BlockSpec((d_cat, out_pad), lambda i: (0, 0)),      # w_ffw
            pl.BlockSpec((1, out_pad), lambda i: (0, 0)),          # b_ffw
            pl.BlockSpec((d_cat, 2 * hidden), lambda i: (0, 0)),   # w_cg
            pl.BlockSpec((1, 2 * hidden), lambda i: (0, 0)),       # b_cg
        ],
        out_specs=(
            pl.BlockSpec((n_nodes, hidden), lambda i: (0, 0)),     # z_node (acc)
            pl.BlockSpec((tile_m, out_pad), lambda i: (i, 0)),     # z_edge tile
        ),
        compiler_params=pltpu.CompilerParams(
            dimension_semantics=("arbitrary",),   # resident z_node accumulator
            vmem_limit_bytes=32 * 1024 * 1024,
        ),
    )(z_f32, z_cat, dst_col, w_ffw, b_ffw, w_cg, b_cg)

    return z_node, z_edge_padded[:n_edges, :d_cat]


def init_params(key, hidden, e_feat):
    """PyTorch-nn.Linear-style deterministic init. Weights stored as [in, out]."""
    ffw_dim = 2 * hidden + e_feat
    cg_in = 2 * hidden   # CGConv called without edge_attr -> 2H input features
    ks = jax.random.split(key, 6)

    def lin(kw, kb, fan_in, fan_out):
        bound = 1.0 / float(fan_in) ** 0.5
        w = jax.random.uniform(kw, (fan_in, fan_out), jnp.float32, -bound, bound)
        b = jax.random.uniform(kb, (1, fan_out), jnp.float32, -bound, bound)
        return w, b

    w_ffw, b_ffw = lin(ks[0], ks[1], ffw_dim, ffw_dim)
    w_f, b_f = lin(ks[2], ks[3], cg_in, hidden)
    w_s, b_s = lin(ks[4], ks[5], cg_in, hidden)
    return dict(w_ffw=w_ffw, b_ffw=b_ffw, w_f=w_f, b_f=b_f, w_s=w_s, b_s=b_s)


def reference_forward(z, edge_attr, edge_index, params):
    """Pure-JAX reference mirroring the PyTorch forward semantics."""
    src, dst = edge_index[0], edge_index[1]
    z_src, z_dst = z[src], z[dst]
    z_cat = jnp.concatenate([z_src, z_dst, edge_attr], axis=-1)
    z_edge = jnp.maximum(z_cat @ params["w_ffw"] + params["b_ffw"], 0.0)

    m_cat = jnp.concatenate([z_dst, z_src], axis=-1)
    msg = (jax.nn.sigmoid(m_cat @ params["w_f"] + params["b_f"])
           * jax.nn.softplus(m_cat @ params["w_s"] + params["b_s"]))
    agg = jnp.zeros_like(z).at[dst].add(msg)
    return z + agg, z_edge


if __name__ == "__main__":
    # nodes, hidden_channels, num_edge_features, edges (M not a tile multiple
    # on purpose, to exercise the padding path).
    N, H, E, M = 64, 32, 8, 500

    key = jax.random.PRNGKey(0)
    k_z, k_ea, k_src, k_dst, k_p = jax.random.split(key, 5)
    z = jax.random.normal(k_z, (N, H), jnp.float32)
    edge_attr = jax.random.normal(k_ea, (M, E), jnp.float32)
    src_idx = jax.random.randint(k_src, (M,), 0, N, jnp.int32)
    dst_idx = jax.random.randint(k_dst, (M,), 0, N, jnp.int32)
    edge_index = jnp.stack([src_idx, dst_idx], axis=0)              # [2, M]

    params = init_params(k_p, H, E)

    z_node, z_edge = decoder_block_forward(z, edge_attr, edge_index, params,
                                           tile_m=256)
    jax.block_until_ready((z_node, z_edge))

    z_node_ref, z_edge_ref = reference_forward(z, edge_attr, edge_index, params)
    err_node = float(jnp.max(jnp.abs(z_node - z_node_ref)))
    err_edge = float(jnp.max(jnp.abs(z_edge - z_edge_ref)))
    # bf16 matmul operands (weights, z_cat, scatter one-hot) with f32 accumulation.
    assert err_node < 1e-1 and err_edge < 1e-1, (err_node, err_edge)

    print("KERNEL_OK")
</pallas_src>

<mosaic_0001>
module attributes {stable_mosaic.version = 11 : i64} {
  func.func @_decoder_block_kernel(%arg0: i32, %arg1: memref<64x32xf32, #tpu.memory_space<vmem>>, %arg2: memref<256x72xbf16, #tpu.memory_space<vmem>>, %arg3: memref<256x1xi32, #tpu.memory_space<vmem>>, %arg4: memref<72x128xbf16, #tpu.memory_space<vmem>>, %arg5: memref<1x128xf32, #tpu.memory_space<vmem>>, %arg6: memref<72x64xbf16, #tpu.memory_space<vmem>>, %arg7: memref<1x64xf32, #tpu.memory_space<vmem>>, %arg8: memref<64x32xf32, #tpu.memory_space<vmem>>, %arg9: memref<256x128xf32, #tpu.memory_space<vmem>>) attributes {dimension_semantics = [#tpu.dimension_semantics<arbitrary>], iteration_bounds = array<i64: 2>, scalar_prefetch = 0 : i64, scratch_operands = 0 : i64, tpu.core_type = #tpu.core_type<tc>, window_params = [{pipeline_mode = #tpu.pipeline_mode<synchronous>, transform_indices = @transform_0, window_bounds = array<i64: 64, 32>}, {transform_indices = @transform_1, window_bounds = array<i64: 256, 72>}, {transform_indices = @transform_2, window_bounds = array<i64: 256, 1>}, {pipeline_mode = #tpu.pipeline_mode<synchronous>, transform_indices = @transform_3, window_bounds = array<i64: 72, 128>}, {pipeline_mode = #tpu.pipeline_mode<synchronous>, transform_indices = @transform_4, window_bounds = array<i64: 1, 128>}, {pipeline_mode = #tpu.pipeline_mode<synchronous>, transform_indices = @transform_5, window_bounds = array<i64: 72, 64>}, {pipeline_mode = #tpu.pipeline_mode<synchronous>, transform_indices = @transform_6, window_bounds = array<i64: 1, 64>}, {pipeline_mode = #tpu.pipeline_mode<synchronous>, transform_indices = @transform_7, window_bounds = array<i64: 64, 32>}, {transform_indices = @transform_8, window_bounds = array<i64: 256, 128>}]} {
    %c0 = arith.constant 0 : index
    %c0_0 = arith.constant 0 : index
    %0 = vector.load %arg2[%c0, %c0_0] : memref<256x72xbf16, #tpu.memory_space<vmem>>, vector<256x72xbf16>
    %c0_1 = arith.constant 0 : index
    %c0_2 = arith.constant 0 : index
    %1 = vector.load %arg4[%c0_1, %c0_2] : memref<72x128xbf16, #tpu.memory_space<vmem>>, vector<72x128xbf16>
    %cst = arith.constant dense<0.000000e+00> : vector<256x128xf32>
    %2 = tpu.matmul %0, %1, %cst {dimension_numbers = #tpu.dot_dimension_numbers<[1], [0], [0], [1], [0, 0, 1, 1], [], []>} : vector<256x72xbf16>, vector<72x128xbf16>, vector<256x128xf32> -> vector<256x128xf32>
    %c0_3 = arith.constant 0 : index
    %c0_4 = arith.constant 0 : index
    %3 = vector.load %arg5[%c0_3, %c0_4] : memref<1x128xf32, #tpu.memory_space<vmem>>, vector<1x128xf32>
    %4 = vector.broadcast %3 : vector<1x128xf32> to vector<256x128xf32>
    %5 = arith.addf %2, %4 : vector<256x128xf32>
    %cst_5 = arith.constant 0.000000e+00 : f32
    %6 = vector.broadcast %cst_5 : f32 to vector<256x128xf32>
    %7 = arith.maximumf %5, %6 : vector<256x128xf32>
    %c0_6 = arith.constant 0 : index
    %c0_7 = arith.constant 0 : index
    %8 = vector.load %arg9[%c0_6, %c0_7] : memref<256x128xf32, #tpu.memory_space<vmem>>, vector<256x128xf32>
    tpu.vector_store %arg9[%c0_6, %c0_7], %7 {strides = array<i32>} : memref<256x128xf32, #tpu.memory_space<vmem>>, vector<256x128xf32>,
    %c0_8 = arith.constant 0 : index
    %c0_9 = arith.constant 0 : index
    %9 = vector.load %arg6[%c0_8, %c0_9] : memref<72x64xbf16, #tpu.memory_space<vmem>>, vector<72x64xbf16>
    %cst_10 = arith.constant dense<0.000000e+00> : vector<256x64xf32>
    %10 = tpu.matmul %0, %9, %cst_10 {dimension_numbers = #tpu.dot_dimension_numbers<[1], [0], [0], [1], [0, 0, 1, 1], [], []>} : vector<256x72xbf16>, vector<72x64xbf16>, vector<256x64xf32> -> vector<256x64xf32>
    %c0_11 = arith.constant 0 : index
    %c0_12 = arith.constant 0 : index
    %11 = vector.load %arg7[%c0_11, %c0_12] : memref<1x64xf32, #tpu.memory_space<vmem>>, vector<1x64xf32>
    %12 = vector.broadcast %11 : vector<1x64xf32> to vector<256x64xf32>
    %13 = arith.addf %10, %12 : vector<256x64xf32>
    %14 = vector.extract_strided_slice %13 {offsets = [0, 0], sizes = [256, 32], strides = [1, 1]} : vector<256x64xf32> to vector<256x32xf32>
    %15 = arith.negf %14 : vector<256x32xf32>
    %16 = math.exp %15 : vector<256x32xf32>
    %cst_13 = arith.constant 1.000000e+00 : f32
    %17 = vector.broadcast %cst_13 : f32 to vector<256x32xf32>
    %18 = arith.addf %17, %16 : vector<256x32xf32>
    %19 = arith.divf %17, %18 : vector<256x32xf32>
    %20 = vector.extract_strided_slice %13 {offsets = [0, 32], sizes = [256, 32], strides = [1, 1]} : vector<256x64xf32> to vector<256x32xf32>
    %cst_14 = arith.constant 0.000000e+00 : f32
    %21 = vector.broadcast %cst_14 : f32 to vector<256x32xf32>
    %22 = arith.maximumf %20, %21 : vector<256x32xf32>
    %23 = vector.broadcast %cst_14 : f32 to vector<256x32xf32>
    %24 = arith.subf %20, %23 : vector<256x32xf32>
    %25 = arith.cmpf one, %24, %24 : vector<256x32xf32>
    %26 = vector.broadcast %cst_14 : f32 to vector<256x32xf32>
    %27 = arith.addf %20, %26 : vector<256x32xf32>
    %28 = math.absf %24 : vector<256x32xf32>
    %cst_15 = arith.constant 0.000000e+00 : f32
    %29 = vector.broadcast %cst_15 : f32 to vector<256x32xf32>
    %30 = arith.subf %29, %28 : vector<256x32xf32>
    %31 = math.exp %30 : vector<256x32xf32>
    %32 = math.log1p %31 : vector<256x32xf32>
    %33 = arith.addf %22, %32 : vector<256x32xf32>
    %34 = arith.select %25, %27, %33 : vector<256x32xi1>, vector<256x32xf32>
    %35 = arith.mulf %19, %34 : vector<256x32xf32>
    %36 = arith.truncf %35 : vector<256x32xf32> to vector<256x32xbf16>
    %37 = tpu.iota {dimensions = array<i32: 1>} : vector<256x64xi32>
    %c0_16 = arith.constant 0 : index
    %c0_17 = arith.constant 0 : index
    %38 = vector.load %arg3[%c0_16, %c0_17] : memref<256x1xi32, #tpu.memory_space<vmem>>, vector<256x1xi32>
    %39 = vector.broadcast %38 : vector<256x1xi32> to vector<256x64xi32>
    %40 = arith.cmpi eq, %39, %37 : vector<256x64xi32>
    %41 = arith.extui %40 : vector<256x64xi1> to vector<256x64xi32>
    %42 = arith.sitofp %41 : vector<256x64xi32> to vector<256x64xf32>
    %43 = arith.truncf %42 : vector<256x64xf32> to vector<256x64xbf16>
    %cst_18 = arith.constant dense<0.000000e+00> : vector<64x32xf32>
    %44 = tpu.matmul %43, %36, %cst_18 {dimension_numbers = #tpu.dot_dimension_numbers<[0], [0], [1], [1], [0, 1, 1, 1], [], []>} : vector<256x64xbf16>, vector<256x32xbf16>, vector<64x32xf32> -> vector<64x32xf32>
    %c0_i32 = arith.constant 0 : i32
    %45 = arith.cmpi eq, %arg0, %c0_i32 : i32
    %46 = arith.extui %45 : i1 to i32
    %c0_i32_19 = arith.constant 0 : i32
    %47 = arith.cmpi ne, %46, %c0_i32_19 : i32
    scf.if %47 {
      %c0_24 = arith.constant 0 : index
      %c0_25 = arith.constant 0 : index
      %51 = vector.load %arg1[%c0_24, %c0_25] : memref<64x32xf32, #tpu.memory_space<vmem>>, vector<64x32xf32>
      %c0_26 = arith.constant 0 : index
      %c0_27 = arith.constant 0 : index
      %52 = vector.load %arg8[%c0_26, %c0_27] : memref<64x32xf32, #tpu.memory_space<vmem>>, vector<64x32xf32>
      tpu.vector_store %arg8[%c0_26, %c0_27], %51 {strides = array<i32>} : memref<64x32xf32, #tpu.memory_space<vmem>>, vector<64x32xf32>,
    } else {
    }
    %c0_20 = arith.constant 0 : index
    %c0_21 = arith.constant 0 : index
    %48 = vector.load %arg8[%c0_20, %c0_21] : memref<64x32xf32, #tpu.memory_space<vmem>>, vector<64x32xf32>
    %49 = arith.addf %48, %44 : vector<64x32xf32>
    %c0_22 = arith.constant 0 : index
    %c0_23 = arith.constant 0 : index
    %50 = vector.load %arg8[%c0_22, %c0_23] : memref<64x32xf32, #tpu.memory_space<vmem>>, vector<64x32xf32>
    tpu.vector_store %arg8[%c0_22, %c0_23], %49 {strides = array<i32>} : memref<64x32xf32, #tpu.memory_space<vmem>>, vector<64x32xf32>,
    return
  }
  func.func @transform_0(%arg0: i32) -> (i32, i32) {
    %c0_i32 = arith.constant 0 : i32
    %c0_i32_0 = arith.constant 0 : i32
    %c0_i32_1 = arith.constant 0 : i32
    return %c0_i32, %c0_i32_0 : i32, i32
  }
  func.func @transform_1(%arg0: i32) -> (i32, i32) {
    %c0_i32 = arith.constant 0 : i32
    %c0_i32_0 = arith.constant 0 : i32
    return %arg0, %c0_i32 : i32, i32
  }
  func.func @transform_2(%arg0: i32) -> (i32, i32) {
    %c0_i32 = arith.constant 0 : i32
    %c0_i32_0 = arith.constant 0 : i32
    return %arg0, %c0_i32 : i32, i32
  }
  func.func @transform_3(%arg0: i32) -> (i32, i32) {
    %c0_i32 = arith.constant 0 : i32
    %c0_i32_0 = arith.constant 0 : i32
    %c0_i32_1 = arith.constant 0 : i32
    return %c0_i32, %c0_i32_0 : i32, i32
  }
  func.func @transform_4(%arg0: i32) -> (i32, i32) {
    %c0_i32 = arith.constant 0 : i32
    %c0_i32_0 = arith.constant 0 : i32
    %c0_i32_1 = arith.constant 0 : i32
    return %c0_i32, %c0_i32_0 : i32, i32
  }
  func.func @transform_5(%arg0: i32) -> (i32, i32) {
    %c0_i32 = arith.constant 0 : i32
    %c0_i32_0 = arith.constant 0 : i32
    %c0_i32_1 = arith.constant 0 : i32
    return %c0_i32, %c0_i32_0 : i32, i32
  }
  func.func @transform_6(%arg0: i32) -> (i32, i32) {
    %c0_i32 = arith.constant 0 : i32
    %c0_i32_0 = arith.constant 0 : i32
    %c0_i32_1 = arith.constant 0 : i32
    return %c0_i32, %c0_i32_0 : i32, i32
  }
  func.func @transform_7(%arg0: i32) -> (i32, i32) {
    %c0_i32 = arith.constant 0 : i32
    %c0_i32_0 = arith.constant 0 : i32
    %c0_i32_1 = arith.constant 0 : i32
    return %c0_i32, %c0_i32_0 : i32, i32
  }
  func.func @transform_8(%arg0: i32) -> (i32, i32) {
    %c0_i32 = arith.constant 0 : i32
    %c0_i32_0 = arith.constant 0 : i32
    return %arg0, %c0_i32 : i32, i32
  }
}

</mosaic_0001>

<bundles_post_ra>
// kernel: tpu_custom_call.1
= control target key start
LH: loop header
LB: loop body
LE: loop exit
PB: predicated region body
PF: predicated region fallthrough
CT: control target
= control target key end

     0   :  { %14 = vsyncpa [#allocation3], 0  ;;  %s5622_s0 = inlined_call_operand.vmem [shape: f32[64,32], index: 0, kind: input, shape index: {}]   ;;  %s5623_s1 = inlined_call_operand.vmem [shape: bf16[512,72], index: 1, kind: input, shape index: {}]   ;;  %s5624_s2 = inlined_call_operand.vmem [shape: s32[512,1], index: 2, kind: input, shape index: {}]   ;;  %s5625_s3 = inlined_call_operand.vmem [shape: bf16[72,128], index: 3, kind: input, shape index: {}]   ;;  %s5626_s4 = inlined_call_operand.vmem [shape: f32[1,128], index: 4, kind: input, shape index: {}]   ;;  %s5627_s5 = inlined_call_operand.vmem [shape: bf16[72,64], index: 5, kind: input, shape index: {}]   ;;  %s5628_s6 = inlined_call_operand.vmem [shape: f32[1,64], index: 6, kind: input, shape index: {}]   ;;  %s5629_s7 = inlined_call_operand.vmem [shape: f32[64,32], index: 7, kind: output, shape index: {0}]   ;;  %s5630_s8 = inlined_call_operand.hbm [shape: f32[512,128], index: 8, kind: output, shape index: {1}]  }
   0x1   :  { %16 = vsyncpa [#allocation3 + $0x1], 0  ;;  %s3404_s27 = smov 0   ;;  %s3406_s28 = smov 0  }
   0x2   :  { %s3408_s29 = smov 0   ;;  %s3410_s30 = smov 0  }
   0x3 LB: > { %s3425_s9 = sadd.s32 4294967295, %s3350_s30   ;;  %s2652_s10 = sadd.s32 4294967294, %s3350_s30   ;;  %s3350_s30 = sphi %s3410_s30, %s5896_s30   ;;  %s3346_s29 = sphi %s3408_s29, %s5895_s29   ;;  %s3342_s28 = sphi %s3406_s28, %s5894_s28   ;;  %s3338_s27 = sphi %s3404_s27, %s5893_s27  }
   0x4   : > { %s3429_s11 = sadd.s32 1, %s3350_s30   ;;  %s207_s12 = sadd.s32 1, %s3346_s29 }
   0x5   : > { %s204_s13 = ssub.s32 %s3350_s30, %s3429_s11  ;;  %p217_p0 = scmp.ne.s32.totalorder %s3346_s29, %s3342_s28 }
   0x6   : > { %p205_p1 = scmp.eq.s32.totalorder %s204_s13, 0  ;;  %p218_p2 = scmp.eq.s32.totalorder %s3425_s9, 1 }
   0x7   : > { %p223_p3 = scmp.ne.s32.totalorder %s3342_s28, %s3338_s27  ;;  %p224_p4 = scmp.eq.s32.totalorder %s2652_s10, 1 }
   0x8   : > { %s3440_s14 = scalar_select %p205_p1, %s3346_s29, %s207_s12  }
   0x9   : > { %p3442_p5 = por %p218_p2, %p217_p0  ;;  %p3446_p6 = por %p224_p4, %p223_p3 }
   0xa   : > { %p2655_p7 = scmp.ge.s32.totalorder %s3350_s30, 1  ;;  %p275_p8 = scmp.lt.s32.totalorder %s3350_s30, 3 }
   0xc   : > { %p276_p9 = pnand %p2655_p7, %p275_p8 }
   0xe   : > { %279 = sbr.rel (%p276_p9) target bundleno = 754 (0x2f2), region = 48 }
  0x13   : > { %v694_v0 = vld [vmem:[%s5627_s5 + $0x20] sm:$0xf]  ;;  %vm5676_vm0 = vcmask 1043456   ;;  %s2657_s19 = sshll.u32 %s3425_s9, 5  ;;  %v2882_v4 = vld [vmem:[%s5627_s5 + $0x18] sm:$0xff]  ;;  %v2881_v5 = vld [vmem:[%s5627_s5 + $0x10] sm:$0xff] }
  0x14   : > { %v716_v1 = vunpack.c.l.b16 %v694_v0  ;;  %p315_p10 = scmp.lt.s32.totalorder %s2657_s19, 63  ;;  %v2880_v6 = vld [vmem:[%s5627_s5 + $0x8] sm:$0xff]  ;;  %v2879_v7 = vld [vmem:[%s5627_s5] sm:$0xff]  ;;  %vm5675_vm1 = vcmask 588800   ;;  %v3352_v14 = vmov 0   ;;  %s3353_s25 = smov 96  }
  0x15   : > { %3011 = vset.pattern.permute.xlu1 %v3352_v14  ;;  %3010 = vset.pattern.permute.xlu0 %v3352_v14  ;;  %v3544_v59 = vld [vmem:[%s5628_s6] ss:$0 sm:$0xff]  ;;  %p2853_p11 = scmp.ne.s32.totalorder %s3425_s9, 0 }
  0x16   : > { %v721_v2 = vpack.c.b16 %v716_v1, %v716_v1  ;;  %s5898_s19 = smov (!%p315_p10, %s2657_s19), 63  ;;  %3012 = vset.pattern.permute.xlu2 %v3352_v14 }
  0x17   : > { %s2658_s26 = sshll.u32 %s5898_s19, 2  ;;  %s2660_s20 = sshll.u32 %s5898_s19, 3 }
  0x18   : > { %v727_v3 = vsel %vm5676_vm0, %v721_v2, 0  ;;  %s3472_s18 = scalar_lea.vmem %s5623_s1, %s2658_s26  ;;  %s3483_s23 = scalar_lea.vmem %s5624_s2, %s2660_s20 }
  0x19   : > { %732 = vmatpush.bf16.msra.mxu1 %v727_v3  ;;  %2889 = vmatpush.bf16.msra.mxu3 %v727_v3  ;;  %v2859_v8 = vld [vmem:[%s3472_s18] sm:$0xff]  ;;  %v2869_v9 = vld [vmem:[%s3472_s18 + $0x50] sm:$0xff]  ;;  %v2860_v10 = vld [vmem:[%s3472_s18 + $0x8] sm:$0xff]  ;;  %s5683_s26 = sand.u32 1, %s3342_s28  }
  0x1a   : > { %v2870_v11 = vld [vmem:[%s3472_s18 + $0x58] sm:$0xff]  ;;  %v2210_v12 = vld [vmem:[%s3483_s23 + $0xf0] sm:$0xff]  ;;  %v2871_v18 = vld [vmem:[%s3472_s18 + $0x60] sm:$0xff]  ;;  %s2656_s13 = sshll.u32 %s5683_s26, 8 }
  0x1b   : > { %v2194_v13 = vld [vmem:[%s3483_s23 + $0x70] sm:$0xff]  ;;  %2303 = vperm.xlu1 %3011, %v2210_v12   ;;  %v2211_v15 = vld [vmem:[%s3483_s23 + $0xf8] sm:$0xff]  ;;  %v2209_v19 = vld [vmem:[%s3483_s23 + $0xe8] sm:$0xff]  ;;  %s5396_s17 = scalar_lea.vmem [#allocation2], %s2656_s13 }
  0x1c   : > { %2255 = vperm.xlu0 %3010, %v2194_v13   ;;  %v2195_v16 = vld [vmem:[%s3483_s23 + $0x78] sm:$0xff]  ;;  %v2861_v17 = vld [vmem:[%s3472_s18 + $0x10] sm:$0xff]  ;;  %v2208_v20 = vld [vmem:[%s3483_s23 + $0xe0] sm:$0xff] }
  0x1d   : > { %733 = vmatpush.bf16.msra.mxu1 %v2882_v4  ;;  %2890 = vmatpush.bf16.msra.mxu3 %v2882_v4  ;;  %v2206_v21 = vld [vmem:[%s3483_s23 + $0xd0] sm:$0xff]  ;;  %v2191_v22 = vld [vmem:[%s3483_s23 + $0x58] sm:$0xff]  ;;  %v2872_v24 = vld [vmem:[%s3472_s18 + $0x68] sm:$0xff] }
  0x1e   : > { %v2862_v23 = vld [vmem:[%s3472_s18 + $0x18] sm:$0xff]  ;;  %v2192_v25 = vld [vmem:[%s3483_s23 + $0x60] sm:$0xff]  ;;  %v2189_v26 = vld [vmem:[%s3483_s23 + $0x48] sm:$0xff] }
  0x1f   : > { %v2188_v27 = vld [vmem:[%s3483_s23 + $0x40] sm:$0xff]  ;;  %2249 = vperm.xlu2 %3012, %v2192_v25   ;;  %v2193_v28 = vld [vmem:[%s3483_s23 + $0x68] sm:$0xff]  ;;  %v2186_v30 = vld [vmem:[%s3483_s23 + $0x30] sm:$0xff] }
  0x20   : > { %v2205_v29 = vld [vmem:[%s3483_s23 + $0xc8] sm:$0xff]  ;;  %v2863_v31 = vld [vmem:[%s3472_s18 + $0x20] sm:$0xff]  ;;  %v2873_v32 = vld [vmem:[%s3472_s18 + $0x70] sm:$0xff] }
  0x21   : > { %734 = vmatpush.bf16.msra.mxu1 %v2881_v5  ;;  %2891 = vmatpush.bf16.msra.mxu3 %v2881_v5  ;;  %v2190_v33 = vld [vmem:[%s3483_s23 + $0x50] sm:$0xff]  ;;  %v2203_v35 = vld [vmem:[%s3483_s23 + $0xb8] sm:$0xff]  ;;  %v2200_v37 = vld [vmem:[%s3483_s23 + $0xa0] sm:$0xff] }
  0x22   : > { %v2202_v34 = vld [vmem:[%s3483_s23 + $0xb0] sm:$0xff]  ;;  %v2207_v36 = vld [vmem:[%s3483_s23 + $0xd8] sm:$0xff]  ;;  %v2185_v38 = vld [vmem:[%s3483_s23 + $0x28] sm:$0xff] }
  0x23   : > { %2306 = vperm.xlu1 %3011, %v2211_v15   ;;  %v2864_v39 = vld [vmem:[%s3472_s18 + $0x28] sm:$0xff]  ;;  %v2874_v40 = vld [vmem:[%s3472_s18 + $0x78] sm:$0xff]  ;;  %v2204_v41 = vld [vmem:[%s3483_s23 + $0xc0] sm:$0xff] }
  0x24   : > { %2258 = vperm.xlu0 %3010, %v2195_v16   ;;  %v2183_v42 = vld [vmem:[%s3483_s23 + $0x18] sm:$0xff]  ;;  %v2182_v43 = vld [vmem:[%s3483_s23 + $0x10] sm:$0xff]  ;;  %v2180_v46 = vld [vmem:[%s3483_s23] sm:$0xff] }
  0x25   : > { %735 = vmatpush.bf16.msra.mxu1 %v2880_v6  ;;  %2892 = vmatpush.bf16.msra.mxu3 %v2880_v6  ;;  %v2187_v44 = vld [vmem:[%s3483_s23 + $0x38] sm:$0xff]  ;;  %v2865_v47 = vld [vmem:[%s3472_s18 + $0x30] sm:$0xff]  ;;  %v2196_v48 = vld [vmem:[%s3483_s23 + $0x80] sm:$0xff] }
  0x26   : > { %v2199_v45 = vld [vmem:[%s3483_s23 + $0x98] sm:$0xff]  ;;  %v2197_v49 = vld [vmem:[%s3483_s23 + $0x88] sm:$0xff]  ;;  %v2184_v51 = vld [vmem:[%s3483_s23 + $0x20] sm:$0xff] }
  0x27   : > { %2252 = vperm.xlu2 %3012, %v2193_v28   ;;  %v2866_v50 = vld [vmem:[%s3472_s18 + $0x38] sm:$0xff]  ;;  %v2201_v52 = vld [vmem:[%s3483_s23 + $0xa8] sm:$0xff]  ;;  %v2867_v53 = vld [vmem:[%s3472_s18 + $0x40] sm:$0xff] }
  0x28   : > { %v2198_v55 = vld [vmem:[%s3483_s23 + $0x90] sm:$0xff]  ;;  %v2181_v58 = vld [vmem:[%s3483_s23 + $0x8] sm:$0xff] }
  0x29   : > { %736 = vmatpush.bf16.msra.mxu1 %v2879_v7  ;;  %2893 = vmatpush.bf16.msra.mxu3 %v2879_v7  ;;  %v2868_v61 = vld [vmem:[%s3472_s18 + $0x48] sm:$0xff] }
  0x2b   : > { %2300 = vperm.xlu1 %3011, %v2209_v19  }
  0x2c   : > { %2773 = vmatmul.msk.bf16.vlgmr.msra.gmra.mxu1 %vm5675_vm1, %v2859_v8  ;;  %2783 = vmatmul.msk.bf16.vlgmr.msra.gmra.mxu3 %vm5675_vm1, %v2869_v9 }
  0x2d   : > { %2297 = vperm.xlu0 %3010, %v2208_v20  }
  0x2f   : > { %2243 = vperm.xlu2 %3012, %v2190_v33  }
  0x33   : > { %2291 = vperm.xlu1 %3011, %v2206_v21  }
  0x35   : > { %2246 = vperm.xlu0 %3010, %v2191_v22  }
  0x37   : > { %2294 = vperm.xlu2 %3012, %v2207_v36  }
  0x3b   : > { %2240 = vperm.xlu1 %3011, %v2189_v26  }
  0x3c   : > { %2774 = vmatmul.msk.bf16.gmra.mxu1 %vm5675_vm1, %v2860_v10  ;;  %2784 = vmatmul.msk.bf16.gmra.mxu3 %vm5675_vm1, %v2870_v11 }
  0x3d   : > { %2237 = vperm.xlu0 %3010, %v2188_v27  }
  0x3f   : > { %2285 = vperm.xlu2 %3012, %v2204_v41  }
  0x43   : > { %2231 = vperm.xlu1 %3011, %v2186_v30  }
  0x45   : > { %2288 = vperm.xlu0 %3010, %v2205_v29  }
  0x47   : > { %2234 = vperm.xlu2 %3012, %v2187_v44  }
  0x4b   : > { %2282 = vperm.xlu1 %3011, %v2203_v35  }
  0x4c   : > { %2775 = vmatmul.msk.bf16.gmra.mxu1 %vm5675_vm1, %v2861_v17  ;;  %2785 = vmatmul.msk.bf16.gmra.mxu3 %vm5675_vm1, %v2871_v18 }
  0x4d   : > { %2279 = vperm.xlu0 %3010, %v2202_v34  }
  0x4f   : > { %2225 = vperm.xlu2 %3012, %v2184_v51  }
  0x53   : > { %2273 = vperm.xlu1 %3011, %v2200_v37  }
  0x55   : > { %2228 = vperm.xlu0 %3010, %v2185_v38  }
  0x57   : > { %2276 = vperm.xlu2 %3012, %v2201_v52  }
  0x5b   : > { %2222 = vperm.xlu1 %3011, %v2183_v42  }
  0x5c   : > { %2776 = vmatmul.msk.bf16.gmra.mxu1 %vm5675_vm1, %v2862_v23  ;;  %2786 = vmatmul.msk.bf16.gmra.mxu3 %vm5675_vm1, %v2872_v24 }
  0x5d   : > { %2219 = vperm.xlu0 %3010, %v2182_v43  }
  0x5f   : > { %2267 = vperm.xlu2 %3012, %v2198_v55  }
  0x63   : > { %2213 = vperm.xlu1 %3011, %v2180_v46  }
  0x65   : > { %2270 = vperm.xlu0 %3010, %v2199_v45  }
  0x67   : > { %2216 = vperm.xlu2 %3012, %v2181_v58  }
  0x6b   : > { %2264 = vperm.xlu1 %3011, %v2197_v49  }
  0x6c   : > { %2777 = vmatmul.msk.bf16.gmra.mxu1 %vm5675_vm1, %v2863_v31  ;;  %2787 = vmatmul.msk.bf16.gmra.mxu3 %vm5675_vm1, %v2873_v32 }
  0x6d   : > { %2261 = vperm.xlu0 %3010, %v2196_v48  }
  0x7c   : > { %2778 = vmatmul.msk.bf16.gmra.mxu1 %vm5675_vm1, %v2864_v39  ;;  %2788 = vmatmul.msk.bf16.gmra.mxu3 %vm5675_vm1, %v2874_v40 }
  0x8c   : > { %2779 = vmatmul.msk.bf16.gmra.mxu1 %vm5675_vm1, %v2865_v47 }
  0x8d   : > { %v3582_v28 = vpop.permute.xlu1 %2303 }
  0x8e   : > { %v3576_v24 = vpop.permute.xlu0 %2255 }
  0x9c   : > { %2780 = vmatmul.msk.bf16.gmra.mxu1 %vm5675_vm1, %v2866_v50  ;;  %v3598_v50 = vpop.permute.xlu2 %2249 }
  0xa9   : > { %v738_v54 = vpop.f32.mrf.mxu1 }
  0xaa   : > { %v3548_v63 = vadd.f32 %v3544_v59, %v738_v54 }
  0xac   : > { %2781 = vmatmul.msk.bf16.gmra.mxu1 %vm5675_vm1, %v2867_v53  ;;  %5686 = vst [vmem:[#allocation5_spill] sm:$0xff] %v3548_v63  ;;  %v1522_v2 = vand.u32 2147483647, %v3548_v63  ;;  %v3603_v53 = vpop.permute.xlu0 %2258 }
  0xae   : > { %v1554_v9 = vsub.f32 0.0, %v1522_v2 }
  0xaf   : > { %v788_v56 = vpop.f32.mrf.mxu3 }
  0xb0   : > { %v3552_v0 = vadd.f32 %v3544_v59, %v788_v56  ;;  %v1586_v16 = vmul.f32 1.442695, %v1554_v9 }
  0xb1   : > { %v740_v57 = vpop.f32.mrf.mxu1 }
  0xb2   : > { %5687 = vst [vmem:[#allocation6_spill] sm:$0xff] %v3552_v0  ;;  %v3555_v1 = vadd.f32 %v3544_v59, %v740_v57  ;;  %v1542_v5 = vand.u32 2147483647, %v3552_v0  ;;  %v2809_v18 = vmul.f32 -1.442695, %v3552_v0  ;;  %v3607_v57 = vpop.permute.xlu1 %2306 }
  0xb4   : > { %5688 = vst [vmem:[#allocation7_spill] sm:$0xff] %v3555_v1  ;;  %v1523_v7 = vand.u32 2147483647, %v3555_v1  ;;  %v1574_v12 = vsub.f32 0.0, %v1542_v5 }
  0xb6   : > { %v1555_v14 = vsub.f32 0.0, %v1523_v7  ;;  %v1626_v21 = vmul.f32 1.442695, %v1574_v12 }
  0xb7   : > { %v790_v60 = vpop.f32.mrf.mxu3 }
  0xb8   : > { %v3565_v10 = vadd.f32 %v3544_v59, %v790_v60  ;;  %v1588_v25 = vmul.f32 1.442695, %v1555_v14 }
  0xb9   : > { %v743_v62 = vpop.f32.mrf.mxu1 }
  0xba   : > { %v3568_v13 = vadd.f32 %v3544_v59, %v743_v62  ;;  %v1543_v19 = vand.u32 2147483647, %v3565_v10  ;;  %v2810_v36 = vmul.f32 -1.442695, %v3565_v10 }
  0xbc   : > { %2782 = vmatmul.msk.bf16.gmra.mxu1 %vm5675_vm1, %v2868_v61  ;;  %5689 = vst [vmem:[#allocation8_spill] sm:$0xff] %v3568_v13  ;;  %v1524_v22 = vand.u32 2147483647, %v3568_v13  ;;  %v1575_v29 = vsub.f32 0.0, %v1543_v19 }
  0xbe   : > { %v1556_v32 = vsub.f32 0.0, %v1524_v22  ;;  %v1628_v41 = vmul.f32 1.442695, %v1575_v29 }
  0xbf   : > { %v793_v3 = vpop.f32.mrf.mxu3 }
  0xc0   : > { %v3559_v4 = vadd.f32 %v3544_v59, %v793_v3  ;;  %v1590_v45 = vmul.f32 1.442695, %v1556_v32 }
  0xc1   : > { %v745_v6 = vpop.f32.mrf.mxu1 }
  0xc2   : > { %v1544_v8 = vand.u32 2147483647, %v3559_v4  ;;  %v3587_v37 = vadd.f32 %v3544_v59, %v745_v6  ;;  %v2811_v48 = vmul.f32 -1.442695, %v3559_v4  ;;  %vm1480_vm3 = vcmp.ne.f32.partialorder %v3559_v4, %v3559_v4 }
  0xc4   : > { %v1576_v11 = vsub.f32 0.0, %v1544_v8  ;;  %5690 = vst [vmem:[#allocation9_spill] sm:$0xff] %v3587_v37  ;;  %v1525_v52 = vand.u32 2147483647, %v3587_v37 }
  0xc6   : > { %v1630_v15 = vmul.f32 1.442695, %v1576_v11  ;;  %v1557_v2 = vsub.f32 0.0, %v1525_v52 }
  0xc7   : > { %v795_v17 = vpop.f32.mrf.mxu3 }
  0xc8   : > { %3015 = vpow2.f32 %v1630_v15  ;;  %v3573_v20 = vadd.f32 %v3544_v59, %v795_v17  ;;  %v1592_v32 = vmul.f32 1.442695, %v1557_v2 }
  0xc9   : > { %v748_v23 = vpop.f32.mrf.mxu1  ;;  %3017 = vpow2.f32 %v1586_v16 }
  0xca   : > { %v1545_v26 = vand.u32 2147483647, %v3573_v20  ;;  %v3580_v27 = vadd.f32 %v3544_v59, %v748_v23  ;;  %3019 = vpow2.f32 %v2809_v18  ;;  %v2812_v61 = vmul.f32 -1.442695, %v3573_v20 }
  0xcb   : > { %3021 = vpow2.f32 %v1626_v21  ;;  %v1448_v18 = vmax.f32 %v3559_v4, 0.0  ;;  %vm1481_vm5 = vcmp.ne.f32.partialorder %v3573_v20, %v3573_v20 }
  0xcc   : > { %v1577_v30 = vsub.f32 0.0, %v1545_v26  ;;  %v1526_v31 = vand.u32 2147483647, %v3580_v27  ;;  %3023 = vpow2.f32 %v1588_v25  ;;  %v2793_v16 = vmul.f32 -1.442695, %v3580_v27 }
  0xcd   : > { %v1430_v14 = vmax.f32 %v3580_v27, 0.0  ;;  %vm1462_vm7 = vcmp.ne.f32.partialorder %v3580_v27, %v3580_v27 }
  0xce   : > { %v3016_v33 = vpop.eup %3015  ;;  %v1632_v34 = vmul.f32 1.442695, %v1577_v30  ;;  %v1558_v35 = vsub.f32 0.0, %v1526_v31 }
  0xcf   : > { %v798_v38 = vpop.f32.mrf.mxu3  ;;  %v1848_v39 = vadd.f32 1.0, %v3016_v33  ;;  %v1851_v40 = vmul.f32 -0.5, %v3016_v33  ;;  %v3592_v44 = vpop.eup %3017  ;;  %v1854_v58 = vand.u32 2147483647, %v3016_v33 }
  0xd0   : > { %3025 = vpow2.f32 %v1632_v34  ;;  %v1594_v42 = vmul.f32 1.442695, %v1558_v35  ;;  %v3590_v43 = vadd.f32 %v3544_v59, %v798_v38  ;;  %5691 = vst [vmem:[#allocation10_spill] sm:$0xff] %v3592_v44  ;;  %v3594_v47 = vpop.eup %3019  ;;  %v3636_v34 = vpop.permute.xlu2 %2252 }
  0xd1   : > { %v750_v46 = vpop.f32.mrf.mxu1  ;;  %3027 = vlog2.f32 %v1848_v39  ;;  %5692 = vst [vmem:[#allocation11_spill] sm:$0xff] %v3594_v47  ;;  %v3600_v51 = vpop.eup %3021  ;;  %v1852_v54 = vadd.f32 1.0, %v1851_v40  ;;  %vm3615_vm2 = vcmp.lt.f32.partialorder %v1854_v58, 0.0004427343 }
  0xd2   : > { %3029 = vpow2.f32 %v1594_v42  ;;  %v1546_v49 = vand.u32 2147483647, %v3590_v43  ;;  %v3605_v55 = vpop.eup %3023  ;;  %v2813_v35 = vmul.f32 -1.442695, %v3590_v43  ;;  %v3639_v38 = vpop.permute.xlu0 %2297  ;;  %v3643_v40 = vadd.f32 %v3544_v59, %v750_v46 }
  0xd3   : > { %3031 = vpow2.f32 %v2810_v36  ;;  %5693 = vst [vmem:[#allocation12_spill] sm:$0xff] %v3605_v55  ;;  %v1853_v5 = vmul.f32 %v3016_v33, %v1852_v54  ;;  %vm1482_vm9 = vcmp.ne.f32.partialorder %v3590_v43, %v3590_v43 }
  0xd4   : > { %3033 = vpow2.f32 %v1628_v41  ;;  %v1578_v56 = vsub.f32 0.0, %v1546_v49  ;;  %5698 = vst [vmem:[#allocation15_spill] sm:$0xff] %v3643_v40 }
  0xd5   : > { %3035 = vpow2.f32 %v1590_v45  ;;  %v3647_v45 = vpop.permute.xlu1 %2300 }
  0xd6   : > { %v3026_v60 = vpop.eup %3025  ;;  %3037 = vpow2.f32 %v2811_v48  ;;  %v1634_v9 = vmul.f32 1.442695, %v1578_v56 }
  0xd7   : > { %v3028_v62 = vpop.eup %3027  ;;  %v800_v3 = vpop.f32.mrf.mxu3  ;;  %v1857_v6 = vadd.f32 1.0, %v3026_v60  ;;  %v1860_v7 = vmul.f32 -0.5, %v3026_v60  ;;  %v1863_v25 = vand.u32 2147483647, %v3026_v60 }
  0xd8   : > { %v3610_v8 = vpop.eup %3029  ;;  %v3613_v11 = vadd.f32 %v3544_v59, %v800_v3  ;;  %v1850_v12 = vmul.f32 0.6931472, %v3028_v62 }
  0xd9   : > { %v3619_v15 = vpop.eup %3031  ;;  %v753_v17 = vpop.f32.mrf.mxu1  ;;  %3039 = vlog2.f32 %v1857_v6  ;;  %v1686_v19 = vadd.f32 1.0, %v3610_v8  ;;  %v1861_v30 = vadd.f32 1.0, %v1860_v7  ;;  %v1689_v39 = vmul.f32 -0.5, %v3610_v8 }
  0xda   : > { %5696 = vst [vmem:[#allocation13_spill] sm:$0xff] %v3619_v15  ;;  %v3624_v21 = vpop.eup %3033  ;;  %3041 = vpow2.f32 %v2812_v61  ;;  %v1547_v22 = vand.u32 2147483647, %v3613_v11  ;;  %v3628_v23 = vadd.f32 %v3544_v59, %v753_v17  ;;  %v1856_v29 = vsel %vm3615_vm2, %v1853_v5, %v1850_v12 }
  0xdb   : > { %v3630_v26 = vpop.eup %3035  ;;  %3043 = vlog2.f32 %v1686_v19  ;;  %v1960_v36 = vadd.f32 %v1856_v29, %v1448_v18  ;;  %v2814_v41 = vmul.f32 -1.442695, %v3613_v11  ;;  %vm3649_vm4 = vcmp.lt.f32.partialorder %v1863_v25, 0.0004427343 }
  0xdc   : > { %5697 = vst [vmem:[#allocation14_spill] sm:$0xff] %v3630_v26  ;;  %v3038_v31 = vpop.eup %3037  ;;  %3045 = vpow2.f32 %v1634_v9  ;;  %v1579_v33 = vsub.f32 0.0, %v1547_v22  ;;  %v1528_v42 = vand.u32 2147483647, %v3628_v23  ;;  %v2795_v52 = vmul.f32 -1.442695, %v3628_v23 }
  0xdd   : > { %3047 = vpow2.f32 %v2793_v16  ;;  %v1992_v54 = vsel %vm1480_vm3, %v3559_v4, %v1960_v36  ;;  %v1862_v58 = vmul.f32 %v3026_v60, %v1861_v30  ;;  %v1690_v61 = vadd.f32 1.0, %v1689_v39  ;;  %v3681_v39 = vpop.permute.xlu2 %2243 }
  0xde   : > { %3049 = vpow2.f32 %v1592_v32  ;;  %v1636_v62 = vmul.f32 1.442695, %v1579_v33  ;;  %2078 = vrot.lane.b32.xlu2 %v1992_v54, %s3353_s25  ;;  %v1692_v3 = vand.u32 2147483647, %v3610_v8  ;;  %v3657_v6 = vadd.f32 1.0, %v3038_v31 }
  0xdf   : > { %v3040_v49 = vpop.eup %3039  ;;  %v803_v56 = vpop.f32.mrf.mxu3  ;;  %3051 = vpow2.f32 %v2813_v35  ;;  %v1449_v9 = vmax.f32 %v3573_v20, 0.0  ;;  %v1527_v60 = vand.u32 2147483647, %v3643_v40  ;;  %v1560_v12 = vsub.f32 0.0, %v1528_v42 }
  0xe0   : > { %v3042_v46 = vpop.eup %3041  ;;  %v1859_v2 = vmul.f32 0.6931472, %v3040_v49  ;;  %3053 = vpow2.f32 %v2814_v41  ;;  %v1691_v19 = vmul.f32 %v3610_v8, %v1690_v61  ;;  %v3672_v25 = vadd.f32 %v3544_v59, %v803_v56 }
  0xe1   : > { %v3044_v5 = vpop.eup %3043  ;;  %v755_v7 = vpop.f32.mrf.mxu1  ;;  %3055 = vpow2.f32 %v2795_v52  ;;  %v3669_v22 = vadd.f32 1.0, %v3042_v46  ;;  %vm1693_vm6 = vcmp.lt.f32.partialorder %v1692_v3, 0.0004427343  ;;  %v1559_v35 = vsub.f32 0.0, %v1527_v60 }
  0xe2   : > { %v3662_v4 = vpop.eup %3045  ;;  %v1865_v17 = vsel %vm3649_vm4, %v1862_v58, %v1859_v2  ;;  %v1688_v18 = vmul.f32 0.6931472, %v3044_v5  ;;  %3057 = vpow2.f32 %v1636_v62  ;;  %v3675_v29 = vadd.f32 %v3544_v59, %v755_v7  ;;  %v3690_v52 = vpop.permute.xlu0 %2246 }
  0xe3   : > { %v3048_v16 = vpop.eup %3047  ;;  %5701 = vst [vmem:[#allocation16_spill] sm:$0xff] %v3669_v22  ;;  %v1961_v30 = vadd.f32 %v1865_v17, %v1449_v9  ;;  %v1866_v32 = vadd.f32 1.0, %v3662_v4  ;;  %3059 = vrcp.f32 %v3657_v6  ;;  %v1598_v8 = vmul.f32 1.442695, %v1560_v12 }
  0xe4   : > { %v1694_v31 = vsel %vm1693_vm6, %v1691_v19, %v1688_v18  ;;  %v3678_v33 = vpop.eup %3049  ;;  %v2815_v42 = vmul.f32 -1.442695, %v3672_v25  ;;  %v1869_v54 = vmul.f32 -0.5, %v3662_v4  ;;  %3061 = vrcp.f32 %v3669_v22 }
  0xe5   : > { %5702 = vst [vmem:[#allocation17_spill] sm:$0xff] %v3678_v33  ;;  %v1942_v36 = vadd.f32 %v1694_v31, %v1430_v14  ;;  %v3052_v41 = vpop.eup %3051  ;;  %v1993_v48 = vsel %vm1481_vm5, %v3573_v20, %v1961_v30  ;;  %v3694_v58 = vadd.f32 1.0, %v3048_v16  ;;  %v1548_v61 = vand.u32 2147483647, %v3672_v25  ;;  %v3699_v20 = vpop.permute.xlu1 %2291 }
  0xe6   : > { %v3054_v56 = vpop.eup %3053  ;;  %2080 = vrot.lane.b32.xlu0 %v1993_v48, %s3353_s25  ;;  %v2796_v2 = vmul.f32 -1.442695, %v3675_v29  ;;  %v1529_v3 = vand.u32 2147483647, %v3675_v29  ;;  %3063 = vlog2.f32 %v1866_v32  ;;  %v1596_v9 = vmul.f32 1.442695, %v1559_v35 }
  0xe7   : > { %v805_v49 = vpop.f32.mrf.mxu3  ;;  %5703 = vst [vmem:[#allocation18_spill] sm:$0xff] %v3694_v58  ;;  %v1974_v46 = vsel %vm1462_vm7, %v3580_v27, %v1942_v36  ;;  %v3056_v62 = vpop.eup %3055  ;;  %3065 = vpow2.f32 %v1598_v8  ;;  %v1870_v60 = vadd.f32 1.0, %v1869_v54  ;;  %v3706_v12 = vadd.f32 1.0, %v3052_v41 }
  0xe8   : > { %2042 = vrot.lane.b32.xlu1 %v1974_v46, %s3353_s25  ;;  %v3704_v7 = vpop.eup %3057  ;;  %3067 = vpow2.f32 %v2815_v42  ;;  %v1872_v27 = vand.u32 2147483647, %v3662_v4  ;;  %v3712_v16 = vadd.f32 1.0, %v3054_v56  ;;  %v1580_v17 = vsub.f32 0.0, %v1548_v61  ;;  %v3736_v61 = vpop.permute.xlu2 %2294 }
  0xe9   : > { %v758_v5 = vpop.f32.mrf.mxu1  ;;  %5704 = vst [vmem:[#allocation19_spill] sm:$0xff] %v3706_v12  ;;  %v3709_v14 = vpop.eup %3059  ;;  %3069 = vrcp.f32 %v3694_v58  ;;  %v1561_v18 = vsub.f32 0.0, %v1529_v3  ;;  %v3715_v19 = vadd.f32 %v3544_v59, %v805_v49  ;;  %v1450_v30 = vmax.f32 %v3590_v43, 0.0 }
  0xea   : > { %5705 = vst [vmem:[#allocation20_spill] sm:$0xff] %v3712_v16  ;;  %3071 = vpow2.f32 %v2796_v2  ;;  %v3718_v31 = vpop.eup %3061  ;;  %v3720_v32 = vadd.f32 1.0, %v3056_v62  ;;  %v1871_v35 = vmul.f32 %v3662_v4, %v1870_v60  ;;  %v1875_v8 = vadd.f32 1.0, %v3704_v7 }
  0xeb   : > { %5706 = vst [vmem:[#allocation21_spill] sm:$0xff] %v3718_v31  ;;  %3073 = vpow2.f32 %v1596_v9  ;;  %v3726_v41 = vadd.f32 %v3544_v59, %v758_v5  ;;  %vm3728_vm8 = vcmp.lt.f32.partialorder %v1872_v27, 0.0004427343  ;;  %v1878_v49 = vmul.f32 -0.5, %v3704_v7  ;;  %v3739_v9 = vpop.permute.xlu0 %2237 }
  0xec   : > { %5707 = vst [vmem:[#allocation22_spill] sm:$0xff] %v3720_v32  ;;  %v3064_v36 = vpop.eup %3063  ;;  %3075 = vrcp.f32 %v3706_v12  ;;  %v1638_v4 = vmul.f32 1.442695, %v1580_v17  ;;  %v2178_v62 = vlaneseq  ;;  %v1600_v2 = vmul.f32 1.442695, %v1561_v18 }
  0xed   : > { %v3733_v54 = vpop.eup %3065  ;;  %3077 = vrcp.f32 %v3712_v16  ;;  %v1868_v56 = vmul.f32 0.6931472, %v3064_v36  ;;  %v1549_v3 = vand.u32 2147483647, %v3715_v19  ;;  %v3748_v17 = vpop.permute.xlu1 %2240  ;;  %v1879_v36 = vadd.f32 1.0, %v1878_v49 }
  0xee   : > { %v3068_v46 = vpop.eup %3067  ;;  %3079 = vlog2.f32 %v1875_v8  ;;  %v2816_v15 = vmul.f32 -1.442695, %v3715_v19  ;;  %v1530_v47 = vand.u32 2147483647, %v3726_v41  ;;  %v1881_v8 = vand.u32 2147483647, %v3704_v7 }
  0xef   : > { %v808_v42 = vpop.f32.mrf.mxu3  ;;  %v3741_v60 = vpop.eup %3069  ;;  %3081 = vrcp.f32 %v3720_v32  ;;  %v1874_v27 = vsel %vm3728_vm8, %v1871_v35, %v1868_v56  ;;  %v3755_v32 = vadd.f32 1.0, %v3068_v46  ;;  %v1704_v55 = vadd.f32 1.0, %v3733_v54 }
  0xf0   : > { %5710 = vst [vmem:[#allocation23_spill] sm:$0xff] %v3741_v60  ;;  %v3072_v18 = vpop.eup %3071  ;;  %v1962_v12 = vadd.f32 %v1874_v27, %v1450_v30  ;;  %3083 = vpow2.f32 %v1638_v4  ;;  %v1707_v35 = vmul.f32 -0.5, %v3733_v54  ;;  %v1581_v49 = vsub.f32 0.0, %v1549_v3  ;;  %v3803_v60 = vpop.permute.xlu2 %2285 }
  0xf1   : > { %v760_v5 = vpop.f32.mrf.mxu1  ;;  %v3753_v1 = vpop.eup %3073  ;;  %5711 = vst [vmem:[#allocation24_spill] sm:$0xff] %v3755_v32  ;;  %3085 = vpow2.f32 %v1600_v2  ;;  %v2797_v56 = vmul.f32 -1.442695, %v3726_v41  ;;  %v3768_v46 = vadd.f32 1.0, %v3072_v18  ;;  %v3771_v4 = vadd.f32 %v3544_v59, %v808_v42 }
  0xf2   : > { %v3759_v48 = vpop.eup %3075  ;;  %v1994_v30 = vsel %vm1482_vm9, %v3590_v43, %v1962_v12  ;;  %3087 = vlog2.f32 %v1704_v55  ;;  %v1562_v3 = vsub.f32 0.0, %v1530_v47  ;;  %v3776_v63 = vadd.f32 %v3544_v59, %v760_v5 }
  0xf3   : > { %5712 = vst [vmem:[#allocation25_spill] sm:$0xff] %v3759_v48  ;;  %v3766_v27 = vpop.eup %3077  ;;  %2082 = vrot.lane.b32.xlu1 %v1994_v30, %s3353_s25  ;;  %v1880_v48 = vmul.f32 %v3704_v7, %v1879_v36  ;;  %3089 = vpow2.f32 %v2816_v15  ;;  %vm3778_vm10 = vcmp.lt.f32.partialorder %v1881_v8, 0.0004427343  ;;  %v2817_v42 = vmul.f32 -1.442695, %v3771_v4  ;;  %v3805_v58 = vpop.permute.xlu0 %2288 }
  0xf4   : > { %5713 = vst [vmem:[#allocation26_spill] sm:$0xff] %v3766_v27  ;;  %v3080_v2 = vpop.eup %3079  ;;  %3091 = vrcp.f32 %v3755_v32  ;;  %v1708_v7 = vadd.f32 1.0, %v1707_v35  ;;  %v3786_v55 = vand.u32 127, %v2178_v62  ;;  %v1451_v47 = vmax.f32 %v3613_v11, 0.0 }
  0xf5   : > { %5714 = vst [vmem:[#allocation27_spill] sm:$0xff] %v3768_v46  ;;  %v3782_v18 = vpop.eup %3081  ;;  %v1877_v30 = vmul.f32 0.6931472, %v3080_v2  ;;  %3093 = vpow2.f32 %v2797_v56  ;;  %vm1483_vm11 = vcmp.ne.f32.partialorder %v3613_v11, %v3613_v11  ;;  %v1640_v36 = vmul.f32 1.442695, %v1581_v49 }
  0xf6   : > { %5717 = vst [vmem:[#allocation28_spill] sm:$0xff] %v3782_v18  ;;  %v3791_v5 = vpop.eup %3083  ;;  %3095 = vrcp.f32 %v3768_v46  ;;  %v1710_v2 = vand.u32 2147483647, %v3733_v54  ;;  %v1602_v62 = vmul.f32 1.442695, %v1562_v3  ;;  %v1709_v43 = vmul.f32 %v3733_v54, %v1708_v7 }
  0xf7   : > { %v810_v12 = vpop.f32.mrf.mxu3  ;;  %v1883_v8 = vsel %vm3778_vm10, %v1880_v48, %v1877_v30  ;;  %v3797_v35 = vpop.eup %3085  ;;  %v2798_v56 = vmul.f32 -1.442695, %v3776_v63  ;;  %3097 = vpow2.f32 %v2817_v42  ;;  %v1550_v49 = vand.u32 2147483647, %v3771_v4 }
  0xf8   : > { %v1963_v32 = vadd.f32 %v1883_v8, %v1451_v47  ;;  %v3801_v18 = vadd.f32 %v3544_v59, %v810_v12  ;;  %v3088_v46 = vpop.eup %3087  ;;  %v1531_v48 = vand.u32 2147483647, %v3776_v63  ;;  %v3810_v30 = vpop.permute.xlu1 %2231  ;;  %v1884_v42 = vadd.f32 1.0, %v3791_v5 }
  0xf9   : > { %v763_v15 = vpop.f32.mrf.mxu1  ;;  %v3090_v3 = vpop.eup %3089  ;;  %v1706_v47 = vmul.f32 0.6931472, %v3088_v46  ;;  %3099 = vpow2.f32 %v1640_v36  ;;  %v1432_v54 = vmax.f32 %v3628_v23, 0.0  ;;  %vm1711_vm12 = vcmp.lt.f32.partialorder %v1710_v2, 0.0004427343 }
  0xfa   : > { %v1995_v12 = vsel %vm1483_vm11, %v3613_v11, %v1963_v32  ;;  %v3817_v8 = vadd.f32 %v3544_v59, %v763_v15  ;;  %v3820_v44 = vpop.eup %3091  ;;  %v1887_v7 = vmul.f32 -0.5, %v3791_v5  ;;  %3101 = vpow2.f32 %v2798_v56 }
  0xfb   : > { %5718 = vst [vmem:[#allocation29_spill] sm:$0xff] %v3820_v44  ;;  %2084 = vrot.lane.b32.xlu2 %v1995_v12, %s3353_s25  ;;  %v3094_v37 = vpop.eup %3093  ;;  %v2818_v11 = vmul.f32 -1.442695, %v3801_v18  ;;  %v1551_v32 = vand.u32 2147483647, %v3801_v18  ;;  %v1712_v46 = vsel %vm1711_vm12, %v1709_v43, %v1706_v47  ;;  %v3829_v31 = vadd.f32 1.0, %v3090_v3 }
  0xfc   : > { %v3827_v15 = vpop.eup %3095  ;;  %3103 = vpow2.f32 %v1602_v62  ;;  %v1582_v36 = vsub.f32 0.0, %v1550_v49  ;;  %v1944_v44 = vadd.f32 %v1712_v46, %v1432_v54  ;;  %v1563_v12 = vsub.f32 0.0, %v1531_v48  ;;  %v3857_v46 = vpop.permute.xlu2 %2234 }
  0xfd   : > { %5719 = vst [vmem:[#allocation30_spill] sm:$0xff] %v3827_v15  ;;  %vm1464_vm13 = vcmp.ne.f32.partialorder %v3628_v23, %v3628_v23  ;;  %v2799_v2 = vmul.f32 -1.442695, %v3817_v8  ;;  %3105 = vlog2.f32 %v1884_v42  ;;  %v3098_v33 = vpop.eup %3097  ;;  %v3834_v13 = vadd.f32 1.0, %v3094_v37 }
  0xfe   : > { %5720 = vst [vmem:[#allocation31_spill] sm:$0xff] %v3829_v31  ;;  %v1976_v43 = vsel %vm1464_vm13, %v3628_v23, %v1944_v44  ;;  %v1532_v3 = vand.u32 2147483647, %v3817_v8  ;;  %v1888_v47 = vadd.f32 1.0, %v1887_v7  ;;  %3107 = vpow2.f32 %v2818_v11 }
  0xff   : > { %v813_v22 = vpop.f32.mrf.mxu3  ;;  %5721 = vst [vmem:[#allocation32_spill] sm:$0xff] %v3834_v13  ;;  %v1583_v62 = vsub.f32 0.0, %v1551_v32  ;;  %2046 = vrot.lane.b32.xlu0 %v1976_v43, %s3353_s25  ;;  %v1890_v49 = vand.u32 2147483647, %v3791_v5  ;;  %v1713_v48 = vadd.f32 1.0, %v3797_v35  ;;  %v3841_v54 = vpop.eup %3099  ;;  %3109 = vrcp.f32 %v3829_v31 }
 0x100   : > { %v1642_v42 = vmul.f32 1.442695, %v1582_v36  ;;  %v3845_v37 = vadd.f32 %v3544_v59, %v813_v22  ;;  %v3102_v44 = vpop.eup %3101  ;;  %vm2322_vm14 = vcmp.eq.s32.totalorder %v3576_v24, %v3786_v55  ;;  %vm2323_vm15 = vcmp.eq.s32.totalorder %v3603_v53, %v3786_v55  ;;  %v3855_v32 = vpop.permute.xlu0 %2279 }
 0x101   : > { %v765_v56 = vpop.f32.mrf.mxu1  ;;  %v1604_v23 = vmul.f32 1.442695, %v1563_v12  ;;  %3111 = vpow2.f32 %v2799_v2  ;;  %v1716_v7 = vmul.f32 -0.5, %v3797_v35  ;;  %vm2338_vm2 = vcmp.eq.s32.totalorder %v3582_v28, %v3786_v55 }
 0x102   : > { %v3853_v11 = vadd.f32 %v3544_v59, %v765_v56  ;;  %v3859_v22 = vpop.eup %3103  ;;  %vm2339_vm3 = vcmp.eq.s32.totalorder %v3607_v57, %v3786_v55  ;;  %v3865_v36 = vadd.f32 1.0, %v3098_v33  ;;  %v1564_v12 = vsub.f32 0.0, %v1532_v3  ;;  %v3868_v56 = vpop.permute.xlu1 %2282 }
 0x103   : > { %v1889_v2 = vmul.f32 %v3791_v5, %v1888_v47  ;;  %3113 = vlog2.f32 %v1713_v48  ;;  %v3106_v43 = vpop.eup %3105  ;;  %v1644_v31 = vmul.f32 1.442695, %v1583_v62  ;;  %v1452_v15 = vmax.f32 %v3672_v25, 0.0 }
 0x104   : > { %5722 = vst [vmem:[#allocation33_spill] sm:$0xff] %v3865_v36  ;;  %3115 = vrcp.f32 %v3834_v13  ;;  %vm3872_vm4 = vcmp.lt.f32.partialorder %v1890_v49, 0.0004427343  ;;  %v3876_v16 = vadd.f32 1.0, %v3102_v44  ;;  %v1552_v33 = vand.u32 2147483647, %v3845_v37  ;;  %v3108_v5 = vpop.eup %3107 }
 0x105   : > { %3117 = vpow2.f32 %v1642_v42  ;;  %v1886_v3 = vmul.f32 0.6931472, %v3106_v43  ;;  %vm2320_vm5 = vcmp.eq.s32.totalorder %v3598_v50, %v3786_v55  ;;  %vm2321_vm6 = vcmp.eq.s32.totalorder %v3636_v34, %v3786_v55  ;;  %v3888_v48 = vpop.eup %3109 }
 0x106   : > { %3119 = vpow2.f32 %v1604_v23  ;;  %vm1484_vm7 = vcmp.ne.f32.partialorder %v3672_v25, %v3672_v25  ;;  %v1717_v47 = vadd.f32 1.0, %v1716_v7  ;;  %v1533_v62 = vand.u32 2147483647, %v3853_v11  ;;  %5725 = vst [vmem:[#allocation34_spill] sm:$0xff] %v3888_v48 }
 0x107   : > { %vm2337_vm8 = vcmp.eq.s32.totalorder %v3647_v45, %v3786_v55  ;;  %vm2336_vm9 = vcmp.eq.s32.totalorder %v3639_v38, %v3786_v55  ;;  %3121 = vrcp.f32 %v3865_v36  ;;  %v1606_v42 = vmul.f32 1.442695, %v1564_v12  ;;  %v3112_v7 = vpop.eup %3111  ;;  %v815_v0 = vpop.f32.mrf.mxu3 }
 0x108   : > { %v1892_v44 = vsel %vm3872_vm4, %v1889_v2, %v1886_v3  ;;  %v1719_v23 = vand.u32 2147483647, %v3797_v35  ;;  %3123 = vpow2.f32 %v1644_v31  ;;  %v2819_v43 = vmul.f32 -1.442695, %v3845_v37 }
 0x109   : > { %v3886_v49 = vpop.f32.mrf.mxu1  ;;  %v1964_v13 = vadd.f32 %v1892_v44, %v1452_v15  ;;  %v1433_v48 = vmax.f32 %v3675_v29, 0.0  ;;  %v3114_v26 = vpop.eup %3113  ;;  %3125 = vrcp.f32 %v3876_v16  ;;  %v3901_v40 = vadd.f32 1.0, %v3108_v5 }
 0x10a   : > { %v1584_v36 = vsub.f32 0.0, %v1552_v33  ;;  %v1722_v12 = vadd.f32 1.0, %v3859_v22  ;;  %v3904_v27 = vpop.eup %3115  ;;  %vm2319_vm10 = vcmp.eq.s32.totalorder %v3690_v52, %v3786_v55  ;;  %vm2318_vm11 = vcmp.eq.s32.totalorder %v3681_v39, %v3786_v55 }
 0x10b   : > { %5726 = vst [vmem:[#allocation35_spill] sm:$0xff] %v3901_v40  ;;  %v1996_v31 = vsel %vm1484_vm7, %v3672_v25, %v1964_v13  ;;  %v1715_v15 = vmul.f32 0.6931472, %v3114_v26  ;;  %v1718_v2 = vmul.f32 %v3797_v35, %v1717_v47  ;;  %v1565_v3 = vsub.f32 0.0, %v1533_v62  ;;  %v3915_v33 = vpop.eup %3117  ;;  %v3932_v47 = vpop.permute.xlu0 %2228 }
 0x10c   : > { %vm2334_vm12 = vcmp.eq.s32.totalorder %v3699_v20, %v3786_v55  ;;  %vm2335_vm13 = vcmp.eq.s32.totalorder %v3736_v61, %v3786_v55  ;;  %3127 = vpow2.f32 %v1606_v42  ;;  %2086 = vrot.lane.b32.xlu0 %v1996_v31, %s3353_s25  ;;  %vm1465_vm4 = vcmp.ne.f32.partialorder %v3675_v29, %v3675_v29  ;;  %v3927_v26 = vpop.eup %3119  ;;  %v3934_v62 = vpop.permute.xlu2 %2225 }
 0x10d   : > { %vm1720_vm1 = vcmp.lt.f32.partialorder %v1719_v23, 0.0004427343  ;;  %v3925_v13 = vadd.f32 %v3544_v59, %v815_v0  ;;  %v3929_v25 = vadd.f32 1.0, %v3112_v7  ;;  %3129 = vpow2.f32 %v2819_v43  ;;  %v3936_v42 = vpop.eup %3121  ;;  %v3949_v7 = vpop.permute.xlu1 %2273 }
 0x10e   : > { %v1721_v35 = vsel %vm1720_vm1, %v1718_v2, %v1715_v15  ;;  %v1725_v5 = vmul.f32 -0.5, %v3859_v22  ;;  %v1646_v44 = vmul.f32 1.442695, %v1584_v36  ;;  %3131 = vlog2.f32 %v1722_v12  ;;  %vm3945_vm1 = vmpackc.low %vm2323_vm15, %vm2322_vm14  ;;  %v3951_v43 = vpop.eup %3123 }
 0x10f   : > { %5727 = vst [vmem:[#allocation36_spill] sm:$0xff] %v3929_v25  ;;  %v1945_v31 = vadd.f32 %v1721_v35, %v1433_v48  ;;  %v1893_v0 = vadd.f32 1.0, %v3841_v54  ;;  %vm2317_vm7 = vcmp.eq.s32.totalorder %v3748_v17, %v3786_v55  ;;  %vm2316_vm0 = vcmp.eq.s32.totalorder %v3739_v9, %v3786_v55  ;;  %vm3966_vm14 = vmpackc.low %vm2339_vm3, %vm2338_vm2  ;;  %v3970_v12 = vpop.eup %3125 }
 0x110   : > { %3133 = vrcp.f32 %v3901_v40  ;;  %v2800_v24 = vmul.f32 -1.442695, %v3853_v11  ;;  %v1608_v36 = vmul.f32 1.442695, %v1565_v3  ;;  %v1896_v53 = vmul.f32 -0.5, %v3841_v54  ;;  %vm3994_vm2 = vmpackc.low %vm2321_vm6, %vm2320_vm5 }
 0x111   : > { %v1977_v15 = vsel %vm1465_vm4, %v3675_v29, %v1945_v31  ;;  %v1553_v2 = vand.u32 2147483647, %v3925_v13  ;;  %3135 = vlog2.f32 %v1893_v0  ;;  %v3977_v3 = vpop.f32.mrf.mxu1  ;;  %vm2332_vm15 = vcmp.eq.s32.totalorder %v3803_v60, %v3786_v55  ;;  %vm4013_vm5 = vmpackc.low %vm2337_vm8, %vm2336_vm9 }
 0x112   : > { %3137 = vrcp.f32 %v3929_v25  ;;  %2048 = vrot.lane.b32.xlu1 %v1977_v15, %s3353_s25  ;;  %v1726_v28 = vadd.f32 1.0, %v1725_v5  ;;  %v1897_v57 = vadd.f32 1.0, %v1896_v53  ;;  %v5677_v35 = vmov 1.0|1.0   ;;  %v3986_v29 = vpop.eup %3127  ;;  %vm4040_vm8 = vmpackc.low %vm2319_vm10, %vm2318_vm11 }
 0x113   : > { %2935 = vmatpush.lsf.msk.bf16.msk.msrb.mxu2 %vm3945_vm1, %v5677_v35  ;;  %vm2333_vm3 = vcmp.eq.s32.totalorder %v3805_v58, %v3786_v55  ;;  %3139 = vpow2.f32 %v1646_v44  ;;  %v1728_v5 = vand.u32 2147483647, %v3859_v22  ;;  %v1899_v0 = vand.u32 2147483647, %v3841_v54  ;;  %2951 = vmatpush.lsf.msk.bf16.msk.msrb.mxu3 %vm3966_vm14, %v5677_v35  ;;  %v4005_v50 = vpop.eup %3129  ;;  %vm4063_vm10 = vmpackc.low %vm2335_vm13, %vm2334_vm12 }
 0x114   : > { %vm2314_vm6 = vcmp.eq.s32.totalorder %v3810_v30, %v3786_v55  ;;  %3141 = vpow2.f32 %v2800_v24  ;;  %vm2315_vm4 = vcmp.eq.s32.totalorder %v3857_v46, %v3786_v55  ;;  %v1434_v44 = vmax.f32 %v3726_v41, 0.0  ;;  %v3132_v53 = vpop.eup %3131  ;;  %vm4098_vm13 = vmpackc.low %vm2317_vm7, %vm2316_vm0 }
 0x115   : > { %v1902_v23 = vadd.f32 1.0, %v3915_v33  ;;  %3143 = vpow2.f32 %v1608_v36  ;;  %vm2330_vm1 = vcmp.eq.s32.totalorder %v3855_v32, %v3786_v55  ;;  %v2820_v38 = vmul.f32 -1.442695, %v3925_v13  ;;  %vm4116_vm0 = vmpackc.low %vm2333_vm3, %vm2332_vm15 }
 0x116   : > { %v1585_v45 = vsub.f32 0.0, %v1553_v2  ;;  %v1905_v48 = vmul.f32 -0.5, %v3915_v33  ;;  %v4027_v15 = vpop.eup %3133  ;;  %v1724_v24 = vmul.f32 0.6931472, %v3132_v53  ;;  %v1727_v35 = vmul.f32 %v3859_v22, %v1726_v28  ;;  %v4077_v53 = vpop.permute.xlu1 %2222 }
 0x117   : > { %v1898_v25 = vmul.f32 %v3841_v54, %v1897_v57  ;;  %v5736_v40 = vmov 1.0|1.0   ;;  %3145 = vlog2.f32 %v1902_v23  ;;  %v3136_v36 = vpop.eup %3135  ;;  %vm1729_vm9 = vcmp.lt.f32.partialorder %v1728_v5, 0.0004427343  ;;  %v4069_v5 = vpop.permute.xlu2 %2276 }
 0x118   : > { %2937 = vmatpush.lsf.msk.bf16.msk.msrb.mxu2 %vm3994_vm2, %v5736_v40  ;;  %vm4044_vm14 = vcmp.lt.f32.partialorder %v1899_v0, 0.0004427343  ;;  %v4050_v54 = vadd.f32 %v3544_v59, %v3886_v49  ;;  %2953 = vmatpush.lsf.msk.bf16.msk.msrb.mxu3 %vm4013_vm5, %v5736_v40  ;;  %v1906_v39 = vadd.f32 1.0, %v1905_v48  ;;  %v4055_v28 = vpop.eup %3137  ;;  %v1730_v57 = vsel %vm1729_vm9, %v1727_v35, %v1724_v24  ;;  %v4071_v0 = vpop.permute.xlu0 %2219 }
 0x119   : > { %v1895_v59 = vmul.f32 0.6931472, %v3136_v36  ;;  %v1908_v49 = vand.u32 2147483647, %v3915_v33  ;;  %v1731_v31 = vadd.f32 1.0, %v3927_v26  ;;  %v4073_v34 = vpop.eup %3139  ;;  %3147 = vpow2.f32 %v2820_v38  ;;  %v4108_v22 = vpop.f32.mrf.mxu1 }
 0x11a   : > { %v1946_v20 = vadd.f32 %v1730_v57, %v1434_v44  ;;  %v1453_v61 = vmax.f32 %v3715_v19, 0.0  ;;  %v1734_v23 = vmul.f32 -0.5, %v3927_v26  ;;  %v4079_v35 = vpop.eup %3141  ;;  %vm2331_vm11 = vcmp.eq.s32.totalorder %v3868_v56, %v3786_v55 }
 0x11b   : > { %vm1466_vm12 = vcmp.ne.f32.partialorder %v3726_v41, %v3726_v41  ;;  %v1901_v48 = vsel %vm4044_vm14, %v1898_v25, %v1895_v59  ;;  %3149 = vlog2.f32 %v1731_v31  ;;  %v4090_v44 = vpop.eup %3143  ;;  %v1534_v36 = vand.u32 2147483647, %v4050_v54 }
 0x11c   : > { %2939 = vmatpush.lsf.msk.bf16.msk.msrb.mxu2 %vm4040_vm8, %v5736_v40  ;;  %v1978_v24 = vsel %vm1466_vm12, %v3726_v41, %v1946_v20  ;;  %v1965_v25 = vadd.f32 %v1901_v48, %v1453_v61  ;;  %v1907_v2 = vmul.f32 %v3915_v33, %v1906_v39  ;;  %2955 = vmatpush.lsf.msk.bf16.msk.msrb.mxu3 %vm4063_vm10, %v5736_v40  ;;  %v1648_v17 = vmul.f32 1.442695, %v1585_v45  ;;  %vm4149_vm8 = vmpackc.low %vm2315_vm4, %vm2314_vm6  ;;  %v4175_v48 = vld [vmem:[%s5628_s6] ss:$0 sm:$0xff] }
 0x11d   : > { %v3146_v9 = vpop.eup %3145  ;;  %2050 = vrot.lane.b32.xlu2 %v1978_v24, %s3353_s25  ;;  %vm1485_vm7 = vcmp.ne.f32.partialorder %v3715_v19, %v3715_v19  ;;  %v1454_v33 = vmax.f32 %v3771_v4, 0.0  ;;  %vm4124_vm2 = vcmp.lt.f32.partialorder %v1908_v49, 0.0004427343  ;;  %vm2328_vm15 = vcmp.eq.s32.totalorder %v3949_v7, %v3786_v55  ;;  %vm4167_vm6 = vmpackc.low %vm2331_vm11, %vm2330_vm1 }
 0x11e   : > { %v1997_v60 = vsel %vm1485_vm7, %v3715_v19, %v1965_v25  ;;  %v1904_v58 = vmul.f32 0.6931472, %v3146_v9  ;;  %v1735_v52 = vadd.f32 1.0, %v1734_v23  ;;  %v2801_v45 = vmul.f32 -1.442695, %v4050_v54 }
 0x11f   : > { %2088 = vrot.lane.b32.xlu1 %v1997_v60, %s3353_s25  ;;  %vm2313_vm3 = vcmp.eq.s32.totalorder %v3932_v47, %v3786_v55  ;;  %vm2312_vm5 = vcmp.eq.s32.totalorder %v3934_v62, %v3786_v55  ;;  %v1737_v57 = vand.u32 2147483647, %v3927_v26  ;;  %v4141_v19 = vpop.eup %3147  ;;  %v1566_v49 = vsub.f32 0.0, %v1534_v36  ;;  %v4210_v62 = vpop.permute.xlu1 %2213 }
 0x120   : > { %2941 = vmatpush.lsf.msk.bf16.msk.msrb.mxu2 %vm4098_vm13, %v5736_v40  ;;  %vm1486_vm9 = vcmp.ne.f32.partialorder %v3771_v4, %v3771_v4  ;;  %v1910_v31 = vsel %vm4124_vm2, %v1907_v2, %v1904_v58  ;;  %2957 = vmatpush.lsf.msk.bf16.msk.msrb.mxu3 %vm4116_vm0, %v5736_v40  ;;  %v1911_v30 = vadd.f32 1.0, %v3951_v43  ;;  %v1435_v23 = vmax.f32 %v3776_v63, 0.0  ;;  %v2271_v2 = vpop.permute.xlu0 %2270  ;;  %vm4197_vm10 = vmpackc.low %vm2313_vm3, %vm2312_vm5 }
 0x121   : > { %v3150_v20 = vpop.eup %3149  ;;  %v1966_v61 = vadd.f32 %v1910_v31, %v1454_v33  ;;  %v4179_v38 = vadd.f32 %v4175_v48, %v3977_v3  ;;  %v1914_v32 = vmul.f32 -0.5, %v3951_v43  ;;  %v1736_v56 = vmul.f32 %v3927_v26, %v1735_v52  ;;  %v2268_v3 = vpop.permute.xlu2 %2267 }
 0x122   : > { %v1733_v24 = vmul.f32 0.6931472, %v3150_v20  ;;  %vm2329_vm4 = vcmp.eq.s32.totalorder %v4069_v5, %v3786_v55  ;;  %3151 = vlog2.f32 %v1911_v30  ;;  %vm1738_vm1 = vcmp.lt.f32.partialorder %v1737_v57, 0.0004427343  ;;  %v4230_v7 = vpop.f32.mrf.mxu1 }
 0x123   : > { %vm2311_vm14 = vcmp.eq.s32.totalorder %v4077_v53, %v3786_v55  ;;  %v1915_v25 = vadd.f32 1.0, %v1914_v32  ;;  %v1740_v36 = vadd.f32 1.0, %v3986_v29  ;;  %v1998_v9 = vsel %vm1486_vm9, %v3771_v4, %v1966_v61  ;;  %vm4220_vm11 = vmpackc.low %vm2329_vm4, %vm2328_vm15 }
 0x124   : > { %2943 = vmatpush.lsf.msk.bf16.msk.msrb.mxu2 %vm4149_vm8, %v5736_v40  ;;  %v1739_v41 = vsel %vm1738_vm1, %v1736_v56, %v1733_v24  ;;  %v1917_v33 = vand.u32 2147483647, %v3951_v43  ;;  %v1743_v39 = vmul.f32 -0.5, %v3986_v29  ;;  %2959 = vmatpush.lsf.msk.bf16.msk.msrb.mxu3 %vm4167_vm6, %v5736_v40  ;;  %v1535_v60 = vand.u32 2147483647, %v4179_v38 }
 0x125   : > { %2090 = vrot.lane.b32.xlu2 %v1998_v9, %s3353_s25  ;;  %v1947_v47 = vadd.f32 %v1739_v41, %v1435_v23  ;;  %vm2310_vm12 = vcmp.eq.s32.totalorder %v4071_v0, %v3786_v55  ;;  %3153 = vlog2.f32 %v1740_v36  ;;  %v1610_v58 = vmul.f32 1.442695, %v1566_v49 }
 0x126   : > { %vm1467_vm13 = vcmp.ne.f32.partialorder %v3776_v63, %v3776_v63  ;;  %vm2326_vm0 = vcmp.eq.s32.totalorder %v2268_v3, %v3786_v55  ;;  %vm2327_vm7 = vcmp.eq.s32.totalorder %v2271_v2, %v3786_v55  ;;  %3155 = vpow2.f32 %v1648_v17  ;;  %vm4241_vm2 = vmpackc.low %vm2311_vm14, %vm2310_vm12 }
 0x127   : > { %v1979_v5 = vsel %vm1467_vm13, %v3776_v63, %v1947_v47  ;;  %v1916_v52 = vmul.f32 %v3951_v43, %v1915_v25  ;;  %3157 = vpow2.f32 %v2801_v45  ;;  %vm4245_vm15 = vcmp.lt.f32.partialorder %v1917_v33, 0.0004427343  ;;  %vm4257_vm3 = vmpackc.low %vm2327_vm7, %vm2326_vm0  ;;  %v2265_v41 = vpop.permute.xlu1 %2264 }
 0x128   : > { %2945 = vmatpush.lsf.msk.bf16.msk.msrb.mxu2 %vm4197_vm10, %v5736_v40  ;;  %v3152_v0 = vpop.eup %3151  ;;  %2052 = vrot.lane.b32.xlu0 %v1979_v5, %s3353_s25  ;;  %v1744_v63 = vadd.f32 1.0, %v1743_v39  ;;  %v1567_v43 = vsub.f32 0.0, %v1535_v60  ;;  %v1746_v59 = vand.u32 2147483647, %v3986_v29  ;;  %v1749_v49 = vadd.f32 1.0, %v4090_v44  ;;  %v2262_v26 = vpop.permute.xlu0 %2261 }
 0x129   : > { %2961 = vmatpush.lsf.msk.bf16.msk.msrb.mxu3 %vm4220_vm11, %v5736_v40  ;;  %v1913_v45 = vmul.f32 0.6931472, %v3152_v0  ;;  %v4263_v31 = vadd.f32 1.0, %v4005_v50  ;;  %3159 = vpow2.f32 %v1610_v58  ;;  %v1455_v30 = vmax.f32 %v3801_v18, 0.0  ;;  %v2217_v60 = vpop.permute.xlu2 %2216 }
 0x12a   : > { %v1752_v20 = vmul.f32 -0.5, %v4090_v44  ;;  %vm1487_vm5 = vcmp.ne.f32.partialorder %v3801_v18, %v3801_v18  ;;  %v1436_v23 = vmax.f32 %v3817_v8, 0.0  ;;  %3161 = vlog2.f32 %v1749_v49 }
 0x12b   : > { %v3154_v46 = vpop.eup %3153  ;;  %v1919_v61 = vsel %vm4245_vm15, %v1916_v52, %v1913_v45  ;;  %v1745_v24 = vmul.f32 %v3986_v29, %v1744_v63  ;;  %v4278_v56 = vadd.f32 %v4175_v48, %v4108_v22  ;;  %v1612_v36 = vmul.f32 1.442695, %v1567_v43  ;;  %v4304_v52 = vpop.f32.mrf.mxu1 }
 0x12c   : > { %2947 = vmatpush.lsf.msk.bf16.msk.msrb.mxu2 %vm4241_vm2, %v5736_v40  ;;  %v1967_v50 = vadd.f32 %v1919_v61, %v1455_v30  ;;  %v1742_v32 = vmul.f32 0.6931472, %v3154_v46  ;;  %v4283_v25 = vpop.eup %3155  ;;  %vm1747_vm8 = vcmp.lt.f32.partialorder %v1746_v59, 0.0004427343  ;;  %v1920_v3 = vadd.f32 1.0, %v4073_v34 }
 0x12d   : > { %2963 = vmatpush.lsf.msk.bf16.msk.msrb.mxu3 %vm4257_vm3, %v5736_v40  ;;  %v1923_v2 = vmul.f32 -0.5, %v4073_v34  ;;  %v4287_v9 = vpop.eup %3157  ;;  %vm1468_vm9 = vcmp.ne.f32.partialorder %v3817_v8, %v3817_v8  ;;  %vm2308_vm6 = vcmp.eq.s32.totalorder %v4210_v62, %v3786_v55  ;;  %v1753_v22 = vadd.f32 1.0, %v1752_v20 }
 0x12e   : > { %v1748_v29 = vsel %vm1747_vm8, %v1745_v24, %v1742_v32  ;;  %v1999_v33 = vsel %vm1487_vm5, %v3801_v18, %v1967_v50  ;;  %v1755_v47 = vand.u32 2147483647, %v4090_v44  ;;  %3163 = vlog2.f32 %v1920_v3 }
 0x12f   : > { %v1948_v39 = vadd.f32 %v1748_v29, %v1436_v23  ;;  %v4298_v4 = vpop.eup %3159  ;;  %v1536_v58 = vand.u32 2147483647, %v4278_v56  ;;  %v1924_v5 = vadd.f32 1.0, %v1923_v2  ;;  %vm2324_vm4 = vcmp.eq.s32.totalorder %v2262_v26, %v3786_v55 }
 0x130   : > { %2092 = vrot.lane.b32.xlu0 %v1999_v33, %s3353_s25  ;;  %vm2309_vm1 = vcmp.eq.s32.totalorder %v2217_v60, %v3786_v55  ;;  %v3162_v0 = vpop.eup %3161  ;;  %3165 = vpow2.f32 %v1612_v36  ;;  %v1926_v57 = vand.u32 2147483647, %v4073_v34  ;;  %vm2325_vm10 = vcmp.eq.s32.totalorder %v2265_v41, %v3786_v55 }
 0x131   : > { %v1980_v18 = vsel %vm1468_vm9, %v3817_v8, %v1948_v39  ;;  %vm2948_vm14 = vmpackc.low %vm2309_vm1, %vm2308_vm6  ;;  %v2802_v17 = vmul.f32 -1.442695, %v4179_v38  ;;  %v1751_v63 = vmul.f32 0.6931472, %v3162_v0  ;;  %v1754_v43 = vmul.f32 %v4090_v44, %v1753_v22 }
 0x132   : > { %2054 = vrot.lane.b32.xlu1 %v1980_v18, %s3353_s25  ;;  %v4320_v45 = vadd.f32 %v4175_v48, %v4230_v7  ;;  %vm2964_vm11 = vmpackc.low %vm2325_vm10, %vm2324_vm4  ;;  %2949 = vmatpush.lsf.msk.bf16.msk.msrb.mxu2 %vm2948_vm14, %v5736_v40  ;;  %v1437_v8 = vmax.f32 %v3853_v11, 0.0  ;;  %vm1756_vm12 = vcmp.lt.f32.partialorder %v1755_v47, 0.0004427343  ;;  %v1929_v55 = vadd.f32 1.0, %v4283_v25 }
 0x133   : > { %2965 = vmatpush.lsf.msk.bf16.msk.msrb.mxu3 %vm2964_vm11, %v5736_v40  ;;  %v1932_v62 = vmul.f32 -0.5, %v4283_v25  ;;  %v1568_v59 = vsub.f32 0.0, %v1536_v58  ;;  %vm1469_vm13 = vcmp.ne.f32.partialorder %v3853_v11, %v3853_v11  ;;  %v1757_v44 = vsel %vm1756_vm12, %v1754_v43, %v1751_v63  ;;  %v780_v33 = vpop.f32.mrf.mxu1 }
 0x134   : > { %v1925_v7 = vmul.f32 %v4073_v34, %v1924_v5  ;;  %2905 = vllmr.8.mxu2  ;;  %v3164_v53 = vpop.eup %3163  ;;  %v1949_v49 = vadd.f32 %v1757_v44, %v1437_v8  ;;  %v1456_v30 = vmax.f32 %v3845_v37, 0.0  ;;  %vm4331_vm0 = vcmp.lt.f32.partialorder %v1926_v57, 0.0004427343 }
 0x135   : > { %3167 = vlog2.f32 %v1929_v55  ;;  %2925 = vllmr.8.mxu3  ;;  %v1922_v40 = vmul.f32 0.6931472, %v3164_v53  ;;  %v1537_v46 = vand.u32 2147483647, %v4320_v45  ;;  %v1933_v61 = vadd.f32 1.0, %v1932_v62 }
 0x136   : > { %v1758_v23 = vadd.f32 1.0, %v4298_v4  ;;  %v4337_v50 = vpop.eup %3165  ;;  %3169 = vrcp.f32 %v4263_v31  ;;  %v1981_v34 = vsel %vm1469_vm13, %v3853_v11, %v1949_v49  ;;  %v1935_v32 = vand.u32 2147483647, %v4283_v25 }
 0x137   : > { %v1761_v24 = vmul.f32 -0.5, %v4298_v4  ;;  %v1614_v36 = vmul.f32 1.442695, %v1568_v59  ;;  %2056 = vrot.lane.b32.xlu2 %v1981_v34, %s3353_s25  ;;  %vm1488_vm7 = vcmp.ne.f32.partialorder %v3845_v37, %v3845_v37  ;;  %v1928_v3 = vsel %vm4331_vm0, %v1925_v7, %v1922_v40 }
 0x138   : > { %3171 = vlog2.f32 %v1758_v23  ;;  %v4352_v2 = vadd.f32 1.0, %v4079_v35  ;;  %v1968_v26 = vadd.f32 %v1928_v3, %v1456_v30  ;;  %v4355_v11 = vadd.f32 1.0, %v4141_v19 }
 0x139   : > { %3173 = vpow2.f32 %v2802_v17  ;;  %v1569_v29 = vsub.f32 0.0, %v1537_v46  ;;  %v1934_v22 = vmul.f32 %v4283_v25, %v1933_v61  ;;  %v1767_v41 = vadd.f32 1.0, %v4337_v50 }
 0x13a   : > { %v2000_v47 = vsel %vm1488_vm7, %v3845_v37, %v1968_v26  ;;  %v1457_v60 = vmax.f32 %v3925_v13, 0.0  ;;  %vm4361_vm2 = vcmp.lt.f32.partialorder %v1935_v32, 0.0004427343  ;;  %v1762_v35 = vadd.f32 1.0, %v1761_v24 }
 0x13b   : > { %v3168_v39 = vpop.eup %3167  ;;  %3175 = vpow2.f32 %v1614_v36  ;;  %2094 = vrot.lane.b32.xlu1 %v2000_v47, %s3353_s25  ;;  %v1764_v5 = vand.u32 2147483647, %v4298_v4  ;;  %v1770_v25 = vmul.f32 -0.5, %v4337_v50  ;;  %v4372_v37 = vadd.f32 %v4175_v48, %v4304_v52  ;;  %v783_v24 = vpop.f32.mrf.mxu1 }
 0x13c   : > { %v1931_v19 = vmul.f32 0.6931472, %v3168_v39  ;;  %v4368_v0 = vpop.eup %3169  ;;  %3177 = vlog2.f32 %v1767_v41  ;;  %v1616_v57 = vmul.f32 1.442695, %v1569_v29  ;;  %vm1489_vm15 = vcmp.ne.f32.partialorder %v3925_v13, %v3925_v13 }
 0x13d   : > { %3179 = vrcp.f32 %v4352_v2  ;;  %v4380_v43 = vadd.f32 1.0, %v4287_v9  ;;  %v1763_v52 = vmul.f32 %v4298_v4, %v1762_v35  ;;  %v1438_v62 = vmax.f32 %v4050_v54, 0.0 }
 0x13e   : > { %v3172_v18 = vpop.eup %3171  ;;  %v1937_v17 = vsel %vm4361_vm2, %v1934_v22, %v1931_v19  ;;  %3181 = vrcp.f32 %v4355_v11  ;;  %vm1765_vm3 = vcmp.lt.f32.partialorder %v1764_v5, 0.0004427343  ;;  %v1771_v59 = vadd.f32 1.0, %v1770_v25 }
 0x13f   : > { %v3174_v63 = vpop.eup %3173  ;;  %v1969_v8 = vadd.f32 %v1937_v17, %v1457_v60  ;;  %v1760_v55 = vmul.f32 0.6931472, %v3172_v18  ;;  %v1538_v53 = vand.u32 2147483647, %v4372_v37  ;;  %v1773_v49 = vand.u32 2147483647, %v4337_v50 }
 0x140   : > { %v4388_v9 = vadd.f32 1.0, %v3174_v63  ;;  %3183 = vpow2.f32 %v1616_v57  ;;  %v1277_v20 = vmul.f32 %v3709_v14, %v3657_v6  ;;  %vm1470_vm5 = vcmp.ne.f32.partialorder %v4050_v54, %v4050_v54 }
 0x141   : > { %v2001_v44 = vsel %vm1489_vm15, %v3925_v13, %v1969_v8  ;;  %v1766_v7 = vsel %vm1765_vm3, %v1763_v52, %v1760_v55  ;;  %v3176_v30 = vpop.eup %3175  ;;  %3185 = vrcp.f32 %v4380_v43  ;;  %v2803_v13 = vmul.f32 -1.442695, %v4278_v56 }
 0x142   : > { %2096 = vrot.lane.b32.xlu2 %v2001_v44, %s3353_s25  ;;  %v1950_v4 = vadd.f32 %v1766_v7, %v1438_v62  ;;  %v3178_v40 = vpop.eup %3177  ;;  %v1439_v23 = vmax.f32 %v4179_v38, 0.0  ;;  %v1772_v32 = vmul.f32 %v4337_v50, %v1771_v59  ;;  %v1570_v36 = vsub.f32 0.0, %v1538_v53 }
 0x143   : > { %v4397_v46 = vpop.eup %3179  ;;  %v1769_v34 = vmul.f32 0.6931472, %v3178_v40  ;;  %vm1774_vm8 = vcmp.lt.f32.partialorder %v1773_v49, 0.0004427343  ;;  %v4404_v3 = vadd.f32 %v4175_v48, %v780_v33  ;;  %v1776_v26 = vadd.f32 1.0, %v3176_v30  ;;  %v785_v40 = vpop.f32.mrf.mxu1 }
 0x144   : > { %v1982_v61 = vsel %vm1470_vm5, %v4050_v54, %v1950_v4  ;;  %v4406_v29 = vpop.eup %3181  ;;  %3187 = vrcp.f32 %v4388_v9  ;;  %v1278_v54 = vsub.f32 1.0, %v1277_v20  ;;  %v1779_v41 = vmul.f32 -0.5, %v3176_v30 }
 0x145   : > { %2058 = vrot.lane.b32.xlu0 %v1982_v61, %s3353_s25  ;;  %v1775_v22 = vsel %vm1774_vm8, %v1772_v32, %v1769_v34  ;;  %3189 = vlog2.f32 %v1776_v26  ;;  %vm1471_vm9 = vcmp.ne.f32.partialorder %v4179_v38, %v4179_v38  ;;  %v4415_v33 = vmul.f32 1.442695, %v1570_v36 }
 0x146   : > { %v1951_v39 = vadd.f32 %v1775_v22, %v1439_v23  ;;  %v4409_v47 = vpop.eup %3183  ;;  %3191 = vpow2.f32 %v2803_v13  ;;  %v1539_v58 = vand.u32 2147483647, %v4404_v3  ;;  %v1839_v35 = vadd.f32 1.0, %v3624_v21 }
 0x147   : > { %v4413_v50 = vpop.eup %3185  ;;  %v1279_v19 = vmul.f32 %v3709_v14, %v1278_v54  ;;  %vm1281_vm6 = vweird.f32 %v3657_v6  ;;  %v1780_v5 = vadd.f32 1.0, %v1779_v41  ;;  %v1842_v25 = vmul.f32 -0.5, %v3624_v21 }
 0x148   : > { %v1983_v60 = vsel %vm1471_vm9, %v4179_v38, %v1951_v39  ;;  %v1782_v18 = vand.u32 2147483647, %v3176_v30  ;;  %3193 = vlog2.f32 %v1839_v35  ;;  %v1845_v57 = vand.u32 2147483647, %v3624_v21 }
 0x149   : > { %2060 = vrot.lane.b32.xlu1 %v1983_v60, %s3353_s25  ;;  %v1785_v17 = vadd.f32 1.0, %v4409_v47  ;;  %vm1282_vm4 = vweird.f32 %v3709_v14  ;;  %v1843_v63 = vadd.f32 1.0, %v1842_v25  ;;  %v4430_v8 = vadd.f32 %v4175_v48, %v783_v24 }
 0x14a   : > { %v4426_v38 = vpop.eup %3187  ;;  %v1788_v55 = vmul.f32 -0.5, %v4409_v47  ;;  %v4433_v62 = vsub.f32 0.0, %v1539_v58  ;;  %v1285_v59 = vand.u32 2147483647, %v3657_v6  ;;  %v1287_v44 = vand.u32 2147483648, %v3657_v6  ;;  %vm4447_vm1 = vmor %vm1281_vm6, %vm1282_vm4 }
 0x14b   : > { %v3190_v52 = vpop.eup %3189  ;;  %3195 = vlog2.f32 %v1785_v17  ;;  %v4440_v53 = vadd.f32 %v3709_v14, %v1279_v19  ;;  %v1440_v49 = vmax.f32 %v4278_v56, 0.0  ;;  %v1781_v20 = vmul.f32 %v3176_v30, %v1780_v5 }
 0x14c   : > { %v4437_v7 = vpop.eup %3191  ;;  %v1778_v4 = vmul.f32 0.6931472, %v3190_v52  ;;  %vm1783_vm14 = vcmp.lt.f32.partialorder %v1782_v18, 0.0004427343  ;;  %vm4451_vm10 = vcmp.lt.f32.partialorder %v1845_v57, 0.0004427343  ;;  %v1844_v30 = vmul.f32 %v3624_v21, %v1843_v63 }
 0x14d   : > { %v1789_v23 = vadd.f32 1.0, %v1788_v55  ;;  %v1695_v34 = vadd.f32 1.0, %v3753_v1  ;;  %v1540_v24 = vand.u32 2147483647, %v4430_v8  ;;  %v1698_v36 = vmul.f32 -0.5, %v3753_v1 }
 0x14e   : > { %v1784_v32 = vsel %vm1783_vm14, %v1781_v20, %v1778_v4  ;;  %v3194_v6 = vpop.eup %3193  ;;  %v1791_v22 = vand.u32 2147483647, %v4409_v47  ;;  %v4461_v54 = vadd.f32 %v4175_v48, %v785_v40  ;;  %v1284_v41 = vsel %vm4447_vm1, %v3709_v14, %v4440_v53 }
 0x14f   : > { %v1952_v26 = vadd.f32 %v1784_v32, %v1440_v49  ;;  %3197 = vlog2.f32 %v1695_v34  ;;  %vm4467_vm11 = vcmp.eq.f32.partialorder %v1285_v59, 8.507059e+37  ;;  %v1288_v21 = vor.u32 1.1754944e-38, %v1287_v44  ;;  %v5773_v49 = vld [vmem:[#allocation15_spill] sm:$0xff] }
 0x150   : > { %vm1472_vm12 = vcmp.ne.f32.partialorder %v4278_v56, %v4278_v56  ;;  %v1841_v60 = vmul.f32 0.6931472, %v3194_v6  ;;  %v1447_v48 = vmax.f32 %v3565_v10, 0.0  ;;  %v1441_v19 = vmax.f32 %v4320_v45, 0.0 }
 0x151   : > { %v3196_v58 = vpop.eup %3195  ;;  %v1984_v35 = vsel %vm1472_vm12, %v4278_v56, %v1952_v26  ;;  %v1790_v5 = vmul.f32 %v4409_v47, %v1789_v23  ;;  %v1699_v18 = vadd.f32 1.0, %v1698_v36  ;;  %v1541_v57 = vand.u32 2147483647, %v4461_v54 }
 0x152   : > { %2062 = vrot.lane.b32.xlu2 %v1984_v35, %s3353_s25  ;;  %v1847_v14 = vsel %vm4451_vm10, %v1844_v30, %v1841_v60  ;;  %v1787_v25 = vmul.f32 0.6931472, %v3196_v58  ;;  %v1572_v63 = vsub.f32 0.0, %v1540_v24  ;;  %vm1792_vm13 = vcmp.lt.f32.partialorder %v1791_v22, 0.0004427343  ;;  %v5774_v30 = vld [vmem:[#allocation14_spill] sm:$0xff]  ;;  %v2079_v22 = vpop.permute.xlu2 %2078 }
 0x153   : > { %v1959_v17 = vadd.f32 %v1847_v14, %v1447_v48  ;;  %v1701_v56 = vand.u32 2147483647, %v3753_v1  ;;  %vm1479_vm0 = vcmp.ne.f32.partialorder %v3565_v10, %v3565_v10  ;;  %v1830_v47 = vadd.f32 1.0, %v3600_v51  ;;  %v5775_v48 = vld [vmem:[#allocation6_spill] sm:$0xff] }
 0x154   : > { %v1793_v55 = vsel %vm1792_vm13, %v1790_v5, %v1787_v25  ;;  %v1833_v52 = vmul.f32 -0.5, %v3600_v51  ;;  %vm1473_vm7 = vcmp.ne.f32.partialorder %v4320_v45, %v4320_v45  ;;  %v1431_v4 = vmax.f32 %v5773_v49, 0.0  ;;  %v5778_v25 = vld [vmem:[#allocation20_spill] sm:$0xff] }
 0x155   : > { %v3198_v59 = vpop.eup %3197  ;;  %v1991_v44 = vsel %vm1479_vm0, %v3565_v10, %v1959_v17  ;;  %v1953_v53 = vadd.f32 %v1793_v55, %v1441_v19  ;;  %v1700_v40 = vmul.f32 %v3753_v1, %v1699_v18  ;;  %v1573_v13 = vsub.f32 0.0, %v1541_v57  ;;  %v5779_v18 = vld [vmem:[#allocation26_spill] sm:$0xff] }
 0x156   : > { %2076 = vrot.lane.b32.xlu1 %v1991_v44, %s3353_s25  ;;  %v1697_v20 = vmul.f32 0.6931472, %v3198_v59  ;;  %3199 = vlog2.f32 %v1830_v47  ;;  %v1622_v61 = vmul.f32 1.442695, %v1572_v63  ;;  %vm1702_vm2 = vcmp.lt.f32.partialorder %v1701_v56, 0.0004427343 }
 0x157   : > { %v1985_v23 = vsel %vm1473_vm7, %v4320_v45, %v1953_v53  ;;  %v1834_v34 = vadd.f32 1.0, %v1833_v52  ;;  %v1836_v32 = vand.u32 2147483647, %v3600_v51  ;;  %v1668_v24 = vadd.f32 1.0, %v5774_v30  ;;  %v5781_v63 = vld [vmem:[#allocation17_spill] sm:$0xff]  ;;  %v5782_v59 = vld [vmem:[#allocation16_spill] sm:$0xff] }
 0x158   : > { %2064 = vrot.lane.b32.xlu0 %v1985_v23, %s3353_s25  ;;  %v1703_v10 = vsel %vm1702_vm2, %v1700_v40, %v1697_v20  ;;  %v1671_v36 = vmul.f32 -0.5, %v5774_v30  ;;  %3201 = vpow2.f32 %v4415_v33  ;;  %v1620_v1 = vmul.f32 1.442695, %v4433_v62  ;;  %v5783_v44 = vld [vmem:[#allocation21_spill] sm:$0xff] }
 0x159   : > { %v1943_v6 = vadd.f32 %v1703_v10, %v1431_v4  ;;  %v4500_v26 = vmul.f32 -1.442695, %v5773_v49  ;;  %vm1463_vm15 = vcmp.ne.f32.partialorder %v5773_v49, %v5773_v49  ;;  %v1624_v60 = vmul.f32 1.442695, %v1573_v13 }
 0x15a   : > { %3203 = vlog2.f32 %v1668_v24  ;;  %v1289_v58 = vsel %vm4467_vm11, %v1288_v21, %v1284_v41  ;;  %v1446_v19 = vmax.f32 %v5775_v48, 0.0  ;;  %v1835_v33 = vmul.f32 %v3600_v51, %v1834_v34  ;;  %v5780_v51 = vld [vmem:[#allocation8_spill] sm:$0xff] }
 0x15b   : > { %v1975_v35 = vsel %vm1463_vm15, %v5773_v49, %v1943_v6  ;;  %3205 = vpow2.f32 %v1622_v61  ;;  %vm4510_vm3 = vcmp.lt.f32.partialorder %v1836_v32, 0.0004427343  ;;  %v1672_v14 = vadd.f32 1.0, %v1671_v36 }
 0x15c   : > { %v3200_v62 = vpop.eup %3199  ;;  %2044 = vrot.lane.b32.xlu2 %v1975_v35, %s3353_s25  ;;  %v1322_v57 = vmul.f32 %v5779_v18, %v5778_v25  ;;  %3207 = vpow2.f32 %v1620_v1  ;;  %v4516_v41 = vmul.f32 %v2079_v22, %v1289_v58  ;;  %vm1478_vm5 = vcmp.ne.f32.partialorder %v5775_v48, %v5775_v48 }
 0x15d   : > { %v1832_v39 = vmul.f32 0.6931472, %v3200_v62  ;;  %3209 = vpow2.f32 %v1624_v60  ;;  %v1428_v21 = vmax.f32 %v5780_v51, 0.0  ;;  %v1674_v17 = vand.u32 2147483647, %v5774_v30 }
 0x15e   : > { %v1677_v56 = vadd.f32 1.0, %v5781_v63  ;;  %v4523_v55 = vpop.eup %3201  ;;  %vm1460_vm8 = vcmp.ne.f32.partialorder %v5780_v51, %v5780_v51  ;;  %v1680_v52 = vmul.f32 -0.5, %v5781_v63  ;;  %v1292_v53 = vmul.f32 %v5783_v44, %v5782_v59 }
 0x15f   : > { %v1838_v47 = vsel %vm4510_vm3, %v1835_v33, %v1832_v39  ;;  %v1673_v20 = vmul.f32 %v5774_v30, %v1672_v14  ;;  %v1323_v40 = vsub.f32 1.0, %v1322_v57  ;;  %vm1296_vm9 = vweird.f32 %v5782_v59 }
 0x160   : > { %v3204_v49 = vpop.eup %3203  ;;  %v1958_v4 = vadd.f32 %v1838_v47, %v1446_v19  ;;  %3211 = vlog2.f32 %v1677_v56  ;;  %v1293_v61 = vsub.f32 1.0, %v1292_v53  ;;  %vm1297_vm6 = vweird.f32 %v5783_v44  ;;  %v2081_v47 = vpop.permute.xlu0 %2080 }
 0x161   : > { %v1670_v13 = vmul.f32 0.6931472, %v3204_v49  ;;  %v4535_v23 = vpop.eup %3205  ;;  %vm1675_vm4 = vcmp.lt.f32.partialorder %v1674_v17, 0.0004427343  ;;  %v1330_v10 = vand.u32 2147483647, %v5778_v25  ;;  %v1324_v58 = vmul.f32 %v5779_v18, %v1323_v40  ;;  %vm4556_vm1 = vmor %vm1296_vm9, %vm1297_vm6 }
 0x162   : > { %v1990_v34 = vsel %vm1478_vm5, %v5775_v48, %v1958_v4  ;;  %v1300_v32 = vand.u32 2147483647, %v5782_v59  ;;  %v4543_v30 = vpop.eup %3207  ;;  %v1681_v36 = vadd.f32 1.0, %v1680_v52  ;;  %v1294_v1 = vmul.f32 %v5783_v44, %v1293_v61  ;;  %v5788_v17 = vld [vmem:[#allocation9_spill] sm:$0xff]  ;;  %v5789_v4 = vld [vmem:[#allocation10_spill] sm:$0xff] }
 0x163   : > { %2074 = vrot.lane.b32.xlu0 %v1990_v34, %s3353_s25  ;;  %v1676_v24 = vsel %vm1675_vm4, %v1673_v20, %v1670_v13  ;;  %v1302_v6 = vand.u32 2147483648, %v5782_v59  ;;  %v4548_v22 = vpop.eup %3209  ;;  %v1683_v35 = vand.u32 2147483647, %v5781_v63  ;;  %vm1326_vm10 = vweird.f32 %v5778_v25  ;;  %v5792_v48 = vld [vmem:[#allocation5_spill] sm:$0xff] }
 0x164   : > { %v1940_v60 = vadd.f32 %v1676_v24, %v1428_v21  ;;  %vm4560_vm14 = vcmp.eq.f32.partialorder %v1300_v32, 8.507059e+37  ;;  %vm1327_vm11 = vweird.f32 %v5779_v18  ;;  %v1295_v33 = vadd.f32 %v5783_v44, %v1294_v1 }
 0x165   : > { %v1303_v62 = vor.u32 1.1754944e-38, %v1302_v6  ;;  %v1812_v5 = vadd.f32 1.0, %v4535_v23  ;;  %v1815_v14 = vmul.f32 -0.5, %v4535_v23  ;;  %v1332_v21 = vand.u32 2147483648, %v5778_v25  ;;  %vm4622_vm5 = vmor %vm1326_vm10, %vm1327_vm11 }
 0x166   : > { %v3212_v57 = vpop.eup %3211  ;;  %v1972_v39 = vsel %vm1460_vm8, %v5780_v51, %v1940_v60  ;;  %v1429_v56 = vmax.f32 %v5788_v17, 0.0  ;;  %vm1461_vm12 = vcmp.ne.f32.partialorder %v5788_v17, %v5788_v17  ;;  %v1682_v59 = vmul.f32 %v5781_v63, %v1681_v36  ;;  %v5791_v36 = vld [vmem:[#allocation23_spill] sm:$0xff] }
 0x167   : > { %2038 = vrot.lane.b32.xlu2 %v1972_v39, %s3353_s25  ;;  %v1679_v52 = vmul.f32 0.6931472, %v3212_v57  ;;  %v1299_v53 = vsel %vm4556_vm1, %v5783_v44, %v1295_v33  ;;  %3213 = vlog2.f32 %v1812_v5  ;;  %vm1684_vm13 = vcmp.lt.f32.partialorder %v1683_v35, 0.0004427343  ;;  %v5790_v44 = vld [vmem:[#allocation18_spill] sm:$0xff] }
 0x168   : > { %v1304_v49 = vsel %vm4560_vm14, %v1303_v62, %v1299_v53  ;;  %v1650_v20 = vadd.f32 1.0, %v5789_v4  ;;  %v1653_v40 = vmul.f32 -0.5, %v5789_v4  ;;  %v4587_v13 = vadd.f32 %v5779_v18, %v1324_v58 }
 0x169   : > { %v1685_v61 = vsel %vm1684_vm13, %v1682_v59, %v1679_v52  ;;  %v4589_v34 = vmul.f32 %v2081_v47, %v1304_v49  ;;  %v1816_v63 = vadd.f32 1.0, %v1815_v14  ;;  %v1444_v24 = vmax.f32 %v4430_v8, 0.0 }
 0x16a   : > { %v1941_v32 = vadd.f32 %v1685_v61, %v1429_v56  ;;  %3215 = vlog2.f32 %v1650_v20  ;;  %v1007_v1 = vmul.f32 %v5791_v36, %v5790_v44  ;;  %vm1476_vm0 = vcmp.ne.f32.partialorder %v4430_v8, %v4430_v8 }
 0x16b   : > { %v2173_v6 = vpack.c.bf16 %v4589_v34, %v4516_v41  ;;  %v1818_v60 = vand.u32 2147483647, %v4535_v23  ;;  %v1656_v58 = vand.u32 2147483647, %v5789_v4  ;;  %v1426_v19 = vmax.f32 %v5792_v48, 0.0 }
 0x16c   : > { %v1973_v35 = vsel %vm1461_vm12, %v5788_v17, %v1941_v32  ;;  %v1654_v33 = vadd.f32 1.0, %v1653_v40  ;;  %v1008_v62 = vsub.f32 1.0, %v1007_v1  ;;  %v1817_v14 = vmul.f32 %v4535_v23, %v1816_v63 }
 0x16d   : > { %v3214_v5 = vpop.eup %3213  ;;  %2040 = vrot.lane.b32.xlu0 %v1973_v35, %s3353_s25  ;;  %vm1012_vm7 = vweird.f32 %v5791_v36  ;;  %v1017_v57 = vand.u32 2147483648, %v5790_v44  ;;  %v1821_v39 = vadd.f32 1.0, %v4548_v22  ;;  %v1015_v52 = vand.u32 2147483647, %v5790_v44 }
 0x16e   : > { %v1814_v56 = vmul.f32 0.6931472, %v3214_v5  ;;  %v1009_v47 = vmul.f32 %v5791_v36, %v1008_v62  ;;  %v1824_v59 = vmul.f32 -0.5, %v4548_v22  ;;  %vm1819_vm2 = vcmp.lt.f32.partialorder %v1818_v60, 0.0004427343  ;;  %v2043_v60 = vpop.permute.xlu1 %2042 }
 0x16f   : > { %vm4613_vm15 = vcmp.lt.f32.partialorder %v1656_v58, 0.0004427343  ;;  %vm1011_vm3 = vweird.f32 %v5790_v44  ;;  %3217 = vlog2.f32 %v1821_v39  ;;  %v1655_v40 = vmul.f32 %v5789_v4, %v1654_v33  ;;  %v5797_v58 = vld [vmem:[#allocation12_spill] sm:$0xff] }
 0x170   : > { %v3216_v23 = vpop.eup %3215  ;;  %v1820_v20 = vsel %vm1819_vm2, %v1817_v14, %v1814_v56  ;;  %v1010_v61 = vadd.f32 %v5791_v36, %v1009_v47  ;;  %v1018_v63 = vor.u32 1.1754944e-38, %v1017_v57  ;;  %vm1013_vm8 = vmor %vm1011_vm3, %vm1012_vm7  ;;  %v1825_v44 = vadd.f32 1.0, %v1824_v59 }
 0x171   : > { %v1956_v32 = vadd.f32 %v1820_v20, %v1444_v24  ;;  %v1652_v1 = vmul.f32 0.6931472, %v3216_v23  ;;  %v1659_v35 = vadd.f32 1.0, %v5797_v58  ;;  %vm1016_vm9 = vcmp.eq.f32.partialorder %v1015_v52, 8.507059e+37 }
 0x172   : > { %v1014_v62 = vsel %vm1013_vm8, %v5791_v36, %v1010_v61  ;;  %v1827_v5 = vand.u32 2147483647, %v4548_v22  ;;  %v1662_v14 = vmul.f32 -0.5, %v5797_v58  ;;  %v1329_v36 = vsel %vm4622_vm5, %v5779_v18, %v4587_v13  ;;  %v5800_v61 = vld [vmem:[#allocation32_spill] sm:$0xff] }
 0x173   : > { %v1988_v4 = vsel %vm1476_vm0, %v4430_v8, %v1956_v32  ;;  %v1658_v24 = vsel %vm4613_vm15, %v1655_v40, %v1652_v1  ;;  %v1019_v33 = vsel %vm1016_vm9, %v1018_v63, %v1014_v62  ;;  %3219 = vlog2.f32 %v1659_v35  ;;  %v5801_v1 = vld [vmem:[#allocation7_spill] sm:$0xff] }
 0x174   : > { %v4646_v57 = vor.u32 1.1754944e-38, %v1332_v21  ;;  %2070 = vrot.lane.b32.xlu1 %v1988_v4, %s3353_s25  ;;  %v1938_v39 = vadd.f32 %v1658_v24, %v1426_v19  ;;  %v4649_v56 = vmul.f32 %v2043_v60, %v1019_v33  ;;  %vm1458_vm6 = vcmp.ne.f32.partialorder %v5792_v48, %v5792_v48  ;;  %v5804_v24 = vld [vmem:[#allocation19_spill] sm:$0xff]  ;;  %v5805_v33 = vld [vmem:[#allocation25_spill] sm:$0xff] }
 0x175   : > { %v3218_v47 = vpop.eup %3217  ;;  %v1826_v52 = vmul.f32 %v4548_v22, %v1825_v44  ;;  %v1665_v59 = vand.u32 2147483647, %v5797_v58  ;;  %v1803_v53 = vadd.f32 1.0, %v4543_v30  ;;  %v1663_v21 = vadd.f32 1.0, %v1662_v14 }
 0x176   : > { %v1970_v23 = vsel %vm1458_vm6, %v5792_v48, %v1938_v39  ;;  %v1823_v20 = vmul.f32 0.6931472, %v3218_v47  ;;  %v1806_v40 = vmul.f32 -0.5, %v4543_v30  ;;  %vm4660_vm4 = vcmp.eq.f32.partialorder %v1330_v10, 8.507059e+37 }
 0x177   : > { %2034 = vrot.lane.b32.xlu0 %v1970_v23, %s3353_s25  ;;  %v1445_v22 = vmax.f32 %v4461_v54, 0.0  ;;  %vm1828_vm1 = vcmp.lt.f32.partialorder %v1827_v5, 0.0004427343  ;;  %3221 = vlog2.f32 %v1803_v53  ;;  %v1067_v63 = vmul.f32 %v3904_v27, %v5800_v61 }
 0x178   : > { %vm1477_vm14 = vcmp.ne.f32.partialorder %v4461_v54, %v4461_v54  ;;  %v1829_v32 = vsel %vm1828_vm1, %v1826_v52, %v1823_v20  ;;  %v1427_v60 = vmax.f32 %v5801_v1, 0.0  ;;  %vm1459_vm10 = vcmp.ne.f32.partialorder %v5801_v1, %v5801_v1 }
 0x179   : > { %v3220_v25 = vpop.eup %3219  ;;  %v1957_v10 = vadd.f32 %v1829_v32, %v1445_v22  ;;  %vm4673_vm11 = vcmp.lt.f32.partialorder %v1665_v59, 0.0004427343  ;;  %v1809_v35 = vand.u32 2147483647, %v4543_v30  ;;  %v1068_v62 = vsub.f32 1.0, %v1067_v63  ;;  %v2085_v59 = vpop.permute.xlu2 %2084  ;;  %v5813_v63 = vld [vmem:[#allocation22_spill] sm:$0xff] }
 0x17a   : > { %v1661_v5 = vmul.f32 0.6931472, %v3220_v25  ;;  %v1664_v14 = vmul.f32 %v5797_v58, %v1663_v21  ;;  %v1807_v4 = vadd.f32 1.0, %v1806_v40  ;;  %v1307_v39 = vmul.f32 %v5805_v33, %v5804_v24 }
 0x17b   : > { %v1989_v47 = vsel %vm1477_vm14, %v4461_v54, %v1957_v10  ;;  %v1069_v52 = vmul.f32 %v3904_v27, %v1068_v62  ;;  %vm1311_vm12 = vweird.f32 %v5804_v24  ;;  %vm1312_vm13 = vweird.f32 %v5805_v33 }
 0x17c   : > { %2072 = vrot.lane.b32.xlu2 %v1989_v47, %s3353_s25  ;;  %v1667_v53 = vsel %vm4673_vm11, %v1664_v14, %v1661_v5  ;;  %v1308_v23 = vsub.f32 1.0, %v1307_v39  ;;  %v1315_v58 = vand.u32 2147483647, %v5804_v24  ;;  %v1317_v20 = vand.u32 2147483648, %v5804_v24  ;;  %vm4708_vm2 = vmor %vm1311_vm12, %vm1312_vm13 }
 0x17d   : > { %v3222_v21 = vpop.eup %3221  ;;  %v1939_v40 = vadd.f32 %v1667_v53, %v1427_v60  ;;  %v1443_v22 = vmax.f32 %v4404_v3, 0.0  ;;  %vm4691_vm0 = vcmp.lt.f32.partialorder %v1809_v35, 0.0004427343  ;;  %vm1072_vm7 = vweird.f32 %v3904_v27 }
 0x17e   : > { %v1805_v32 = vmul.f32 0.6931472, %v3222_v21  ;;  %v1808_v25 = vmul.f32 %v4543_v30, %v1807_v4  ;;  %v1077_v10 = vand.u32 2147483648, %v5800_v61  ;;  %v1309_v44 = vmul.f32 %v5805_v33, %v1308_v23 }
 0x17f   : > { %v1971_v60 = vsel %vm1459_vm10, %v5801_v1, %v1939_v40  ;;  %v1070_v62 = vadd.f32 %v3904_v27, %v1069_v52  ;;  %v1318_v30 = vor.u32 1.1754944e-38, %v1317_v20  ;;  %v1794_v5 = vadd.f32 1.0, %v4523_v55  ;;  %v2083_v52 = vpop.permute.xlu1 %2082 }
 0x180   : > { %2036 = vrot.lane.b32.xlu1 %v1971_v60, %s3353_s25  ;;  %v1811_v14 = vsel %vm4691_vm0, %v1808_v25, %v1805_v32  ;;  %v1310_v4 = vadd.f32 %v5805_v33, %v1309_v44  ;;  %vm1316_vm15 = vcmp.eq.f32.partialorder %v1315_v58, 8.507059e+37  ;;  %v1797_v39 = vmul.f32 -0.5, %v4523_v55  ;;  %v5814_v32 = vld [vmem:[#allocation28_spill] sm:$0xff] }
 0x181   : > { %v1955_v47 = vadd.f32 %v1811_v14, %v1443_v22  ;;  %vm1071_vm3 = vweird.f32 %v5800_v61  ;;  %v1075_v24 = vand.u32 2147483647, %v5800_v61  ;;  %3223 = vlog2.f32 %v1794_v5  ;;  %v5812_v61 = vld [vmem:[#allocation33_spill] sm:$0xff]  ;;  %v2051_v58 = vpop.permute.xlu2 %2050 }
 0x182   : > { %v1334_v53 = vsel %vm4660_vm4, %v4646_v57, %v1329_v36  ;;  %vm1475_vm8 = vcmp.ne.f32.partialorder %v4404_v3, %v4404_v3  ;;  %vm4732_vm9 = vmor %vm1071_vm3, %vm1072_vm7  ;;  %v1314_v49 = vsel %vm4708_vm2, %v5805_v33, %v1310_v4  ;;  %v1367_v18 = vmul.f32 %v3936_v42, %v5812_v61  ;;  %v5816_v5 = vld [vmem:[#allocation29_spill] sm:$0xff] }
 0x183   : > { %v4741_v13 = vmul.f32 %v2085_v59, %v1334_v53  ;;  %v1987_v36 = vsel %vm1475_vm8, %v4404_v3, %v1955_v47  ;;  %v1074_v57 = vsel %vm4732_vm9, %v3904_v27, %v1070_v62  ;;  %v1319_v19 = vsel %vm1316_vm15, %v1318_v30, %v1314_v49  ;;  %v5815_v30 = vld [vmem:[#allocation24_spill] sm:$0xff]  ;;  %v2047_v47 = vpop.permute.xlu0 %2046 }
 0x184   : > { %2068 = vrot.lane.b32.xlu0 %v1987_v36, %s3353_s25  ;;  %v1078_v20 = vor.u32 1.1754944e-38, %v1077_v10  ;;  %v4748_v21 = vmul.f32 %v2083_v52, %v1319_v19  ;;  %v1798_v40 = vadd.f32 1.0, %v1797_v39  ;;  %v1800_v33 = vand.u32 2147483647, %v4523_v55  ;;  %v5818_v36 = vld [vmem:[#allocation30_spill] sm:$0xff] }
 0x185   : > { %v4752_v22 = vmul.f32 -1.442695, %v4320_v45  ;;  %vm1076_vm5 = vcmp.eq.f32.partialorder %v1075_v24, 8.507059e+37  ;;  %v1368_v59 = vsub.f32 1.0, %v1367_v18  ;;  %v1037_v25 = vmul.f32 %v5814_v32, %v5813_v63  ;;  %v5817_v18 = vld [vmem:[#allocation27_spill] sm:$0xff] }
 0x186   : > { %v4757_v27 = vadd.f32 1.0, %v4437_v7  ;;  %v1079_v44 = vsel %vm1076_vm5, %v1078_v20, %v1074_v57  ;;  %v2174_v10 = vpack.c.bf16 %v4741_v13, %v4748_v21  ;;  %v1442_v60 = vmax.f32 %v4372_v37, 0.0 }
 0x187   : > { %v3224_v62 = vpop.eup %3223  ;;  %v4762_v35 = vmul.f32 %v2051_v58, %v1079_v44  ;;  %vm1474_vm6 = vcmp.ne.f32.partialorder %v4372_v37, %v4372_v37  ;;  %v1038_v45 = vsub.f32 1.0, %v1037_v25  ;;  %v1337_v14 = vmul.f32 %v5816_v5, %v5815_v30 }
 0x188   : > { %v1796_v4 = vmul.f32 0.6931472, %v3224_v62  ;;  %v1799_v7 = vmul.f32 %v4523_v55, %v1798_v40  ;;  %vm1801_vm4 = vcmp.lt.f32.partialorder %v1800_v33, 0.0004427343  ;;  %v1375_v39 = vand.u32 2147483647, %v5812_v61 }
 0x189   : > { %v1369_v24 = vmul.f32 %v3936_v42, %v1368_v59  ;;  %v1377_v52 = vand.u32 2147483648, %v5812_v61  ;;  %v1039_v53 = vmul.f32 %v5814_v32, %v1038_v45  ;;  %v1045_v23 = vand.u32 2147483647, %v5813_v63 }
 0x18a   : > { %v1802_v49 = vsel %vm1801_vm4, %v1799_v7, %v1796_v4  ;;  %vm1371_vm1 = vweird.f32 %v5812_v61  ;;  %vm1372_vm14 = vweird.f32 %v3936_v42  ;;  %v1052_v55 = vmul.f32 %v5818_v36, %v5817_v18 }
 0x18b   : > { %v1954_v57 = vadd.f32 %v1802_v49, %v1442_v60  ;;  %v1040_v19 = vadd.f32 %v5814_v32, %v1039_v53  ;;  %vm1042_vm10 = vweird.f32 %v5814_v32  ;;  %v1338_v58 = vsub.f32 1.0, %v1337_v14  ;;  %vm4815_vm15 = vmor %vm1371_vm1, %vm1372_vm14 }
 0x18c   : > { %vm4780_vm11 = vcmp.eq.f32.partialorder %v1375_v39, 8.507059e+37  ;;  %vm1041_vm12 = vweird.f32 %v5813_v63  ;;  %v1047_v40 = vand.u32 2147483648, %v5813_v63  ;;  %v1053_v33 = vsub.f32 1.0, %v1052_v55  ;;  %v2049_v39 = vpop.permute.xlu1 %2048 }
 0x18d   : > { %v1986_v59 = vsel %vm1474_vm6, %v4372_v37, %v1954_v57  ;;  %v1370_v25 = vadd.f32 %v3936_v42, %v1369_v24  ;;  %v1378_v44 = vor.u32 1.1754944e-38, %v1377_v52  ;;  %vm4791_vm13 = vcmp.eq.f32.partialorder %v1045_v23, 8.507059e+37  ;;  %vm4796_vm0 = vmor %vm1041_vm12, %vm1042_vm10 }
 0x18e   : > { %2066 = vrot.lane.b32.xlu2 %v1986_v59, %s3353_s25  ;;  %vm1341_vm7 = vweird.f32 %v5815_v30  ;;  %v1054_v63 = vmul.f32 %v5818_v36, %v1053_v33  ;;  %vm1057_vm2 = vweird.f32 %v5818_v36  ;;  %v1060_v45 = vand.u32 2147483647, %v5817_v18  ;;  %v5828_v33 = vld [vmem:[#allocation34_spill] sm:$0xff] }
 0x18f   : > { %v1044_v14 = vsel %vm4796_vm0, %v5814_v32, %v1040_v19  ;;  %v1339_v4 = vmul.f32 %v5816_v5, %v1338_v58  ;;  %v1062_v7 = vand.u32 2147483648, %v5817_v18  ;;  %v1112_v24 = vmul.f32 %v4397_v46, %v4352_v2  ;;  %v2087_v19 = vpop.permute.xlu0 %2086 }
 0x190   : > { %v1048_v53 = vor.u32 1.1754944e-38, %v1047_v40  ;;  %vm1342_vm3 = vweird.f32 %v5816_v5  ;;  %v1055_v32 = vadd.f32 %v5818_v36, %v1054_v63  ;;  %vm1056_vm8 = vweird.f32 %v5817_v18  ;;  %v5827_v40 = vld [vmem:[#allocation31_spill] sm:$0xff]  ;;  %v368_v18 = vld [vmem:[%s5625_s3 + $0x20] sm:$0xf] }
 0x191   : > { %v1345_v23 = vand.u32 2147483647, %v5815_v30  ;;  %v1347_v49 = vand.u32 2147483648, %v5815_v30  ;;  %vm1058_vm9 = vmor %vm1056_vm8, %vm1057_vm2  ;;  %v1063_v55 = vor.u32 1.1754944e-38, %v1062_v7  ;;  %v1113_v57 = vsub.f32 1.0, %v1112_v24 }
 0x192   : > { %v1049_v61 = vsel %vm4791_vm13, %v1048_v53, %v1044_v14  ;;  %v1059_v58 = vsel %vm1058_vm9, %v5818_v36, %v1055_v32  ;;  %vm1061_vm5 = vcmp.eq.f32.partialorder %v1060_v45, 8.507059e+37  ;;  %v1352_v59 = vmul.f32 %v5828_v33, %v5827_v40  ;;  %vm4842_vm6 = vmor %vm1341_vm7, %vm1342_vm3 }
 0x193   : > { %v1374_v62 = vsel %vm4815_vm15, %v3936_v42, %v1370_v25  ;;  %v4835_v63 = vmul.f32 %v2047_v47, %v1049_v61  ;;  %v1340_v60 = vadd.f32 %v5816_v5, %v1339_v4  ;;  %v1064_v14 = vsel %vm1061_vm5, %v1063_v55, %v1059_v58  ;;  %v2091_v61 = vpop.permute.xlu2 %2090 }
 0x194   : > { %v4846_v45 = vmul.f32 %v2049_v39, %v1064_v14  ;;  %v1353_v7 = vsub.f32 1.0, %v1352_v59  ;;  %vm1356_vm4 = vweird.f32 %v5827_v40  ;;  %vm1357_vm1 = vweird.f32 %v5828_v33 }
 0x195   : > { %v1114_v42 = vmul.f32 %v4397_v46, %v1113_v57  ;;  %v1360_v47 = vand.u32 2147483647, %v5827_v40  ;;  %v1362_v25 = vand.u32 2147483648, %v5827_v40  ;;  %v470_v4 = vunpack.c.l.b16 %v368_v18  ;;  %vm4861_vm10 = vmor %vm1356_vm4, %vm1357_vm1 }
 0x196   : > { %v1379_v30 = vsel %vm4780_vm11, %v1378_v44, %v1374_v62  ;;  %v1348_v24 = vor.u32 1.1754944e-38, %v1347_v49  ;;  %v2165_v39 = vpack.c.bf16 %v4846_v45, %v4835_v63  ;;  %v1354_v52 = vmul.f32 %v5828_v33, %v1353_v7 }
 0x197   : > { %v1344_v53 = vsel %vm4842_vm6, %v5816_v5, %v1340_v60  ;;  %vm1346_vm14 = vcmp.eq.f32.partialorder %v1345_v23, 8.507059e+37  ;;  %v1363_v55 = vor.u32 1.1754944e-38, %v1362_v25  ;;  %v475_v57 = vpack.c.b16 %v470_v4, %v470_v4  ;;  %v2089_v23 = vpop.permute.xlu1 %2088  ;;  %v2878_v60 = vld [vmem:[%s5625_s3 + $0x18] sm:$0xff] }
 0x198   : > { %v1120_v20 = vand.u32 2147483647, %v4352_v2  ;;  %v1122_v44 = vand.u32 2147483648, %v4352_v2  ;;  %v1355_v49 = vadd.f32 %v5828_v33, %v1354_v52  ;;  %vm4868_vm11 = vcmp.eq.f32.partialorder %v1360_v47, 8.507059e+37  ;;  %v5840_v52 = vld [vmem:[#allocation35_spill] sm:$0xff] }
 0x199   : > { %v1115_v5 = vadd.f32 %v4397_v46, %v1114_v42  ;;  %vm1117_vm12 = vweird.f32 %v4397_v46  ;;  %vm5835_vm13 = vcmask 1043456   ;;  %v1412_v59 = vmul.f32 %v4406_v29, %v4355_v11 }
 0x19a   : > { %v531_v40 = vsel %vm5835_vm13, %v475_v57, 0  ;;  %3225 = vpow2.f32 %v4752_v22  ;;  %v1349_v18 = vsel %vm1346_vm14, %v1348_v24, %v1344_v53  ;;  %v1359_v62 = vsel %vm4861_vm10, %v5828_v33, %v1355_v49  ;;  %v2053_v36 = vpop.permute.xlu0 %2052 }
 0x19b   : > { %536 = vmatpush.bf16.msra.mxu0 %v531_v40  ;;  %v1082_v14 = vmul.f32 %v3970_v12, %v3876_v16  ;;  %2884 = vmatpush.bf16.msra.mxu2 %v531_v40  ;;  %v4886_v7 = vmul.f32 %v2091_v61, %v1379_v30  ;;  %v4888_v42 = vmul.f32 %v2087_v19, %v1349_v18  ;;  %vm1116_vm0 = vweird.f32 %v4352_v2 }
 0x19c   : > { %v1364_v22 = vsel %vm4868_vm11, %v1363_v55, %v1359_v62  ;;  %vm4895_vm7 = vmor %vm1116_vm0, %vm1117_vm12  ;;  %vm4899_vm2 = vcmp.eq.f32.partialorder %v1120_v20, 8.507059e+37  ;;  %v1123_v25 = vor.u32 1.1754944e-38, %v1122_v44  ;;  %v1413_v30 = vsub.f32 1.0, %v1412_v59 }
 0x19d   : > { %v4903_v4 = vmul.f32 %v2089_v23, %v1364_v22  ;;  %v1083_v19 = vsub.f32 1.0, %v1082_v14  ;;  %v1119_v2 = vsel %vm4895_vm7, %v4397_v46, %v1115_v5  ;;  %v1092_v24 = vand.u32 2147483648, %v3876_v16  ;;  %v2877_v46 = vld [vmem:[%s5625_s3 + $0x10] sm:$0xff]  ;;  %v5841_v5 = vld [vmem:[#allocation36_spill] sm:$0xff] }
 0x19e   : > { %v1382_v53 = vmul.f32 %v4027_v15, %v5840_v52  ;;  %vm1087_vm15 = vweird.f32 %v3970_v12  ;;  %v1090_v57 = vand.u32 2147483647, %v3876_v16  ;;  %vm1386_vm3 = vweird.f32 %v5840_v52 }
 0x19f   : > { %v2175_v32 = vpack.c.bf16 %v4903_v4, %v4888_v42  ;;  %537 = vmatpush.bf16.msra.mxu0 %v2878_v60  ;;  %v1084_v55 = vmul.f32 %v3970_v12, %v1083_v19  ;;  %2885 = vmatpush.bf16.msra.mxu2 %v2878_v60  ;;  %vm1387_vm8 = vweird.f32 %v4027_v15  ;;  %v1390_v20 = vand.u32 2147483647, %v5840_v52  ;;  %v2057_v60 = vpop.permute.xlu2 %2056 }
 0x1a0   : > { %v1383_v61 = vsub.f32 1.0, %v1382_v53  ;;  %v4922_v44 = vpop.eup %3225  ;;  %vm1086_vm9 = vweird.f32 %v3876_v16  ;;  %v1392_v58 = vand.u32 2147483648, %v5840_v52  ;;  %v1097_v23 = vmul.f32 %v4055_v28, %v5841_v5  ;;  %v2876_v16 = vld [vmem:[%s5625_s3 + $0x8] sm:$0xff]  ;;  %vm4943_vm4 = vmor %vm1386_vm3, %vm1387_vm8 }
 0x1a1   : > { %v1085_v49 = vadd.f32 %v3970_v12, %v1084_v55  ;;  %v1124_v40 = vsel %vm4899_vm2, %v1123_v25, %v1119_v2  ;;  %v1414_v59 = vmul.f32 %v4406_v29, %v1413_v30  ;;  %vm1088_vm5 = vmor %vm1086_vm9, %vm1087_vm15  ;;  %v1093_v18 = vor.u32 1.1754944e-38, %v1092_v24 }
 0x1a2   : > { %v1384_v62 = vmul.f32 %v4027_v15, %v1383_v61  ;;  %vm1091_vm6 = vcmp.eq.f32.partialorder %v1090_v57, 8.507059e+37  ;;  %v1393_v33 = vor.u32 1.1754944e-38, %v1392_v58  ;;  %v1098_v47 = vsub.f32 1.0, %v1097_v23  ;;  %v2093_v30 = vpop.permute.xlu0 %2092 }
 0x1a3   : > { %v1089_v14 = vsel %vm1088_vm5, %v3970_v12, %v1085_v49  ;;  %538 = vmatpush.bf16.msra.mxu0 %v2877_v46  ;;  %2886 = vmatpush.bf16.msra.mxu2 %v2877_v46  ;;  %vm1391_vm1 = vcmp.eq.f32.partialorder %v1390_v20, 8.507059e+37  ;;  %v1107_v19 = vand.u32 2147483648, %v5841_v5  ;;  %vm1102_vm14 = vweird.f32 %v4055_v28  ;;  %v2875_v20 = vld [vmem:[%s5625_s3] sm:$0xff] }
 0x1a4   : > { %v1094_v25 = vsel %vm1091_vm6, %v1093_v18, %v1089_v14  ;;  %v1385_v12 = vadd.f32 %v4027_v15, %v1384_v62  ;;  %v1099_v24 = vmul.f32 %v4055_v28, %v1098_v47  ;;  %v1105_v52 = vand.u32 2147483647, %v5841_v5  ;;  %v2055_v57 = vpop.permute.xlu1 %2054 }
 0x1a5   : > { %v4949_v2 = vmul.f32 %v2053_v36, %v1094_v25  ;;  %v4954_v53 = vmul.f32 %v2057_v60, %v1124_v40  ;;  %vm1416_vm10 = vweird.f32 %v4355_v11  ;;  %vm1417_vm11 = vweird.f32 %v4406_v29 }
 0x1a6   : > { %v1389_v55 = vsel %vm4943_vm4, %v4027_v15, %v1385_v12  ;;  %v1100_v61 = vadd.f32 %v4055_v28, %v1099_v24  ;;  %vm1101_vm12 = vweird.f32 %v5841_v5  ;;  %v1420_v49 = vand.u32 2147483647, %v4355_v11  ;;  %vm4991_vm15 = vmor %vm1416_vm10, %vm1417_vm11  ;;  %v3273_v24 = vld [vmem:[%s3472_s18 + $0x58] sm:$0xff] }
 0x1a7   : > { %v2166_v36 = vpack.c.bf16 %v4949_v2, %v4762_v35  ;;  %539 = vmatpush.bf16.msra.mxu0 %v2876_v16  ;;  %v1394_v46 = vsel %vm1391_vm1, %v1393_v33, %v1389_v55  ;;  %2887 = vmatpush.bf16.msra.mxu2 %v2876_v16  ;;  %vm1103_vm13 = vmor %vm1101_vm12, %vm1102_vm14  ;;  %v1108_v15 = vor.u32 1.1754944e-38, %v1107_v19  ;;  %v1397_v23 = vmul.f32 %v4368_v0, %v4263_v31  ;;  %v3279_v35 = vld [vmem:[%s3472_s18 + $0x70] sm:$0xff] }
 0x1a8   : > { %v4969_v58 = vmul.f32 %v2093_v30, %v1394_v46  ;;  %v1415_v40 = vadd.f32 %v4406_v29, %v1414_v59  ;;  %v1422_v5 = vand.u32 2147483648, %v4355_v11  ;;  %v1104_v18 = vsel %vm1103_vm13, %v4055_v28, %v1100_v61  ;;  %v3272_v11 = vld [vmem:[%s3472_s18] sm:$0xff] }
 0x1a9   : > { %vm1106_vm0 = vcmp.eq.f32.partialorder %v1105_v52, 8.507059e+37  ;;  %vm1401_vm7 = vweird.f32 %v4263_v31  ;;  %vm1402_vm2 = vweird.f32 %v4368_v0  ;;  %v1398_v16 = vsub.f32 1.0, %v1397_v23 }
 0x1aa   : > { %v2176_v62 = vpack.c.bf16 %v4969_v58, %v4886_v7  ;;  %v1109_v60 = vsel %vm1106_vm0, %v1108_v15, %v1104_v18  ;;  %v1405_v59 = vand.u32 2147483647, %v4263_v31  ;;  %v1407_v22 = vand.u32 2147483648, %v4263_v31  ;;  %vm5009_vm8 = vmor %vm1401_vm7, %vm1402_vm2  ;;  %v2097_v31 = vpop.permute.xlu2 %2096  ;;  %v3275_v58 = vld [vmem:[%s3472_s18 + $0x60] sm:$0xff] }
 0x1ab   : > { %v4982_v14 = vmul.f32 %v2055_v57, %v1109_v60  ;;  %540 = vmatpush.bf16.msra.mxu0 %v2875_v20  ;;  %2888 = vmatpush.bf16.msra.mxu2 %v2875_v20  ;;  %v2791_v28 = vmul.f32 -1.442695, %v5780_v51  ;;  %v1127_v47 = vmul.f32 %v4413_v50, %v4380_v43  ;;  %v2792_v25 = vmul.f32 -1.442695, %v5788_v17  ;;  %v5850_v20 = vld [vmem:[#allocation11_spill] sm:$0xff] }
 0x1ac   : > { %3227 = vpow2.f32 %v4500_v26  ;;  %v1399_v51 = vmul.f32 %v4368_v0, %v1398_v16  ;;  %v1423_v19 = vor.u32 1.1754944e-38, %v1422_v5  ;;  %vm5846_vm3 = vcmask 588800  }
 0x1ad   : > { %v2167_v12 = vpack.c.bf16 %v4954_v53, %v4982_v14  ;;  %3229 = vrcp.f32 %v4757_v27  ;;  %v1408_v26 = vor.u32 1.1754944e-38, %v1407_v22  ;;  %v1128_v17 = vsub.f32 1.0, %v1127_v47  ;;  %vm5849_vm9 = vmmov %vm5846_vm3  ;;  %v2095_v46 = vpop.permute.xlu1 %2094 }
 0x1ae   : > { %2741 = vmatmul.msk.bf16.vlgmr.msra.gmra.mxu0 %vm5846_vm3, %v3272_v11  ;;  %2752 = vmatmul.msk.bf16.vlgmr.msra.gmra.mxu2 %vm5849_vm9, %v3273_v24  ;;  %v1419_v52 = vsel %vm4991_vm15, %v4406_v29, %v1415_v40  ;;  %vm1421_vm5 = vcmp.eq.f32.partialorder %v1420_v49, 8.507059e+37  ;;  %v1400_v55 = vadd.f32 %v4368_v0, %v1399_v51  ;;  %vm1406_vm6 = vcmp.eq.f32.partialorder %v1405_v59, 8.507059e+37  ;;  %vm5854_vm7 = vmmov %vm5846_vm3 }
 0x1af   : > { %v5020_v57 = vadd.f32 1.0, %v4922_v44  ;;  %v1129_v61 = vmul.f32 %v4413_v50, %v1128_v17  ;;  %v5024_v15 = vadd.f32 1.0, %v5850_v20  ;;  %3231 = vpow2.f32 %v2791_v28  ;;  %v5851_v44 = vld [vmem:[#allocation13_spill] sm:$0xff]  ;;  %vm5855_vm2 = vmmov %vm5846_vm3 }
 0x1b0   : > { %v1404_v23 = vsel %vm5009_vm8, %v4368_v0, %v1400_v55  ;;  %v1424_v29 = vsel %vm1421_vm5, %v1423_v19, %v1419_v52  ;;  %v1142_v40 = vmul.f32 %v4426_v38, %v4388_v9  ;;  %v5032_v18 = vadd.f32 1.0, %v5851_v44 }
 0x1b1   : > { %v1409_v49 = vsel %vm1406_vm6, %v1408_v26, %v1404_v23  ;;  %3233 = vpow2.f32 %v2792_v25  ;;  %v2161_v60 = vmul.f32 %v2097_v31, %v1424_v29  ;;  %v1130_v22 = vadd.f32 %v4413_v50, %v1129_v61 }
 0x1b2   : > { %v3228_v5 = vpop.eup %3227  ;;  %v2160_v16 = vmul.f32 %v2095_v46, %v1409_v49  ;;  %3235 = vrcp.f32 %v5020_v57  ;;  %vm1132_vm4 = vweird.f32 %v4413_v50  ;;  %v1143_v0 = vsub.f32 1.0, %v1142_v40 }
 0x1b3   : > { %v5034_v59 = vpop.eup %3229  ;;  %vm1131_vm1 = vweird.f32 %v4380_v43  ;;  %v1137_v33 = vand.u32 2147483648, %v4380_v43  ;;  %v1152_v47 = vand.u32 2147483648, %v4388_v9  ;;  %v1135_v25 = vand.u32 2147483647, %v4380_v43 }
 0x1b4   : > { %v2177_v28 = vpack.c.bf16 %v2161_v60, %v2160_v16  ;;  %v1144_v51 = vmul.f32 %v4426_v38, %v1143_v0  ;;  %vm1147_vm14 = vweird.f32 %v4426_v38  ;;  %v1150_v19 = vand.u32 2147483647, %v4388_v9  ;;  %vm5050_vm10 = vmor %vm1131_vm1, %vm1132_vm4  ;;  %v3274_v16 = vld [vmem:[%s3472_s18 + $0x8] sm:$0xff] }
 0x1b5   : > { %v5046_v11 = vadd.f32 1.0, %v3228_v5  ;;  %v1157_v30 = vmul.f32 %v5034_v59, %v4757_v27  ;;  %v3232_v17 = vpop.eup %3231  ;;  %v2807_v24 = vmul.f32 -1.442695, %v4430_v8  ;;  %v1134_v43 = vsel %vm5050_vm10, %v4413_v50, %v1130_v22 }
 0x1b6   : > { %2481 = vmatpush.bf16.msra.mxu3 %v2177_v28  ;;  %v1145_v52 = vadd.f32 %v4426_v38, %v1144_v51  ;;  %vm1146_vm11 = vweird.f32 %v4388_v9  ;;  %3237 = vrcp.f32 %v5024_v15  ;;  %v2808_v31 = vmul.f32 -1.442695, %v4461_v54 }
 0x1b7   : > { %v3234_v55 = vpop.eup %3233  ;;  %v1138_v46 = vor.u32 1.1754944e-38, %v1137_v33  ;;  %v2059_v61 = vpop.permute.xlu0 %2058  ;;  %vm1148_vm12 = vmor %vm1146_vm11, %vm1147_vm14  ;;  %v1153_v20 = vor.u32 1.1754944e-38, %v1152_v47  ;;  %3239 = vrcp.f32 %v5032_v18  ;;  %vm1136_vm13 = vcmp.eq.f32.partialorder %v1135_v25, 8.507059e+37 }
 0x1b8   : > { %v5064_v8 = vpop.eup %3235  ;;  %v1149_v50 = vsel %vm1148_vm12, %v4426_v38, %v1145_v52  ;;  %vm1151_vm0 = vcmp.eq.f32.partialorder %v1150_v19, 8.507059e+37  ;;  %3241 = vrcp.f32 %v5046_v11  ;;  %v1158_v9 = vsub.f32 1.0, %v1157_v30 }
 0x1b9   : > { %v1139_v54 = vsel %vm1136_vm13, %v1138_v46, %v1134_v43  ;;  %v1154_v23 = vsel %vm1151_vm0, %v1153_v20, %v1149_v50  ;;  %v5072_v49 = vadd.f32 1.0, %v3232_v17  ;;  %3243 = vpow2.f32 %v2807_v24  ;;  %v2063_v20 = vpop.permute.xlu2 %2062  ;;  %vm5860_vm13 = vmmov %vm5855_vm2 }
 0x1ba   : > { %2482 = vmatpush.bf16.msra.mxu3 %v2176_v62  ;;  %v5074_v40 = vmul.f32 %v2059_v61, %v1139_v54  ;;  %v2789_v38 = vmul.f32 -1.442695, %v5792_v48  ;;  %3245 = vpow2.f32 %v2808_v31  ;;  %v1172_v44 = vmul.f32 %v5064_v8, %v5020_v57  ;;  %vm5861_vm0 = vmmov %vm5855_vm2 }
 0x1bb   : > { %v2061_v29 = vpop.permute.xlu1 %2060  ;;  %v5081_v60 = vadd.f32 1.0, %v3234_v55  ;;  %v1159_v22 = vmul.f32 %v5034_v59, %v1158_v9  ;;  %3247 = vrcp.f32 %v5072_v49  ;;  %v2790_v25 = vmul.f32 -1.442695, %v5801_v1 }
 0x1bc   : > { %v5076_v5 = vmul.f32 %v2061_v29, %v1154_v23  ;;  %v5089_v62 = vpop.eup %3237  ;;  %v1173_v48 = vsub.f32 1.0, %v1172_v44  ;;  %3249 = vpow2.f32 %v2789_v38  ;;  %v2805_v51 = vmul.f32 -1.442695, %v4372_v37 }
 0x1bd   : > { %v5095_v0 = vpop.eup %3239  ;;  %3251 = vrcp.f32 %v5081_v60  ;;  %v2806_v42 = vmul.f32 -1.442695, %v4404_v3  ;;  %vm1162_vm15 = vweird.f32 %v5034_v59  ;;  %v1247_v1 = vmul.f32 %v5089_v62, %v5024_v15 }
 0x1be   : > { %2742 = vmatmul.msk.bf16.gmra.mxu0 %vm5854_vm7, %v3274_v16  ;;  %v2168_v7 = vpack.c.bf16 %v5076_v5, %v5074_v40  ;;  %2753 = vmatmul.msk.bf16.gmra.mxu2 %vm5855_vm2, %v3275_v58  ;;  %v5098_v28 = vpop.eup %3241  ;;  %v1174_v33 = vmul.f32 %v5064_v8, %v1173_v48  ;;  %v1262_v19 = vmul.f32 %v5095_v0, %v5032_v18  ;;  %v1167_v30 = vand.u32 2147483648, %v4757_v27 }
 0x1bf   : > { %2483 = vmatpush.bf16.msra.mxu3 %v2175_v32  ;;  %v3244_v47 = vpop.eup %3243  ;;  %v1160_v32 = vadd.f32 %v5034_v59, %v1159_v22  ;;  %v1022_v37 = vmul.f32 %v5098_v28, %v5046_v11  ;;  %vm1177_vm3 = vweird.f32 %v5064_v8  ;;  %vm1161_vm8 = vweird.f32 %v4757_v27 }
 0x1c0   : > { %v3246_v4 = vpop.eup %3245  ;;  %v1175_v3 = vadd.f32 %v5064_v8, %v1174_v33  ;;  %v5119_v26 = vadd.f32 1.0, %v3244_v47  ;;  %v1165_v13 = vand.u32 2147483647, %v4757_v27  ;;  %v1182_v21 = vand.u32 2147483648, %v5020_v57  ;;  %vm5130_vm9 = vmor %vm1161_vm8, %vm1162_vm15 }
 0x1c1   : > { %3253 = vpow2.f32 %v2790_v25  ;;  %v5126_v17 = vadd.f32 1.0, %v3246_v4  ;;  %vm1176_vm5 = vweird.f32 %v5020_v57  ;;  %v1180_v43 = vand.u32 2147483647, %v5020_v57 }
 0x1c2   : > { %3255 = vpow2.f32 %v2805_v51  ;;  %v1164_v27 = vsel %vm5130_vm9, %v5034_v59, %v1160_v32  ;;  %v1263_v55 = vsub.f32 1.0, %v1262_v19  ;;  %vm5144_vm6 = vmor %vm1176_vm5, %vm1177_vm3  ;;  %v1248_v46 = vsub.f32 1.0, %v1247_v1  ;;  %v3276_v51 = vld [vmem:[%s3472_s18 + $0x10] sm:$0xff]  ;;  %v3277_v19 = vld [vmem:[%s3472_s18 + $0x68] sm:$0xff] }
 0x1c3   : > { %2484 = vmatpush.bf16.msra.mxu3 %v2174_v10  ;;  %v5124_v10 = vpop.eup %3247  ;;  %3257 = vpow2.f32 %v2806_v42  ;;  %v1168_v57 = vor.u32 1.1754944e-38, %v1167_v30  ;;  %v1023_v50 = vsub.f32 1.0, %v1022_v37  ;;  %v1179_v59 = vsel %vm5144_vm6, %v5064_v8, %v1175_v3 }
 0x1c4   : > { %v3250_v52 = vpop.eup %3249  ;;  %3259 = vrcp.f32 %v5119_v26  ;;  %vm1166_vm4 = vcmp.eq.f32.partialorder %v1165_v13, 8.507059e+37  ;;  %v977_v41 = vmul.f32 %v5124_v10, %v5072_v49  ;;  %v1183_v34 = vor.u32 1.1754944e-38, %v1182_v21 }
 0x1c5   : > { %v5148_v61 = vpop.eup %3251  ;;  %3261 = vrcp.f32 %v5126_v17  ;;  %v1169_v9 = vsel %vm1166_vm4, %v1168_v57, %v1164_v27  ;;  %vm1181_vm1 = vcmp.eq.f32.partialorder %v1180_v43, 8.507059e+37  ;;  %v1264_v23 = vmul.f32 %v5095_v0, %v1263_v55 }
 0x1c6   : > { %v2144_v54 = vmul.f32 %v2063_v20, %v1169_v9  ;;  %v1184_v29 = vsel %vm1181_vm1, %v1183_v34, %v1179_v59  ;;  %v1249_v8 = vmul.f32 %v5089_v62, %v1248_v46  ;;  %v1024_v16 = vmul.f32 %v5098_v28, %v1023_v50 }
 0x1c7   : > { %2485 = vmatpush.bf16.msra.mxu3 %v2173_v6  ;;  %v5156_v6 = vadd.f32 1.0, %v3250_v52  ;;  %v3254_v44 = vpop.eup %3253  ;;  %vm1266_vm14 = vweird.f32 %v5032_v18  ;;  %vm1267_vm10 = vweird.f32 %v5095_v0  ;;  %v978_v48 = vsub.f32 1.0, %v977_v41 }
 0x1c8   : > { %v3256_v22 = vpop.eup %3255  ;;  %v1270_v33 = vand.u32 2147483647, %v5032_v18  ;;  %vm1251_vm11 = vweird.f32 %v5024_v15  ;;  %vm1252_vm12 = vweird.f32 %v5089_v62  ;;  %v1272_v25 = vand.u32 2147483648, %v5032_v18  ;;  %vm5182_vm7 = vmor %vm1266_vm14, %vm1267_vm10  ;;  %v2077_v9 = vpop.permute.xlu1 %2076 }
 0x1c9   : > { %v3258_v47 = vpop.eup %3257  ;;  %v1257_v4 = vand.u32 2147483648, %v5024_v15  ;;  %v992_v32 = vmul.f32 %v5148_v61, %v5081_v60  ;;  %v1265_v30 = vadd.f32 %v5095_v0, %v1264_v23  ;;  %v1250_v3 = vadd.f32 %v5089_v62, %v1249_v8  ;;  %vm5198_vm15 = vmor %vm1251_vm11, %vm1252_vm12 }
 0x1ca   : > { %v2065_v38 = vpop.permute.xlu0 %2064  ;;  %v5175_v1 = vpop.eup %3259  ;;  %v1255_v13 = vand.u32 2147483647, %v5024_v15  ;;  %3263 = vrcp.f32 %v5156_v6  ;;  %v5191_v24 = vadd.f32 1.0, %v3254_v44  ;;  %vm1026_vm2 = vweird.f32 %v5046_v11 }
 0x1cb   : > { %v2145_v58 = vmul.f32 %v2065_v38, %v1184_v29  ;;  %v5188_v21 = vpop.eup %3261  ;;  %v1025_v43 = vadd.f32 %v5098_v28, %v1024_v16  ;;  %vm1027_vm3 = vweird.f32 %v5098_v28  ;;  %v1032_v52 = vand.u32 2147483648, %v5046_v11  ;;  %v2045_v15 = vpop.permute.xlu2 %2044 }
 0x1cc   : > { %v979_v27 = vmul.f32 %v5124_v10, %v978_v48  ;;  %vm5206_vm8 = vcmp.eq.f32.partialorder %v1270_v33, 8.507059e+37  ;;  %v1273_v31 = vor.u32 1.1754944e-38, %v1272_v25  ;;  %v1258_v46 = vor.u32 1.1754944e-38, %v1257_v4  ;;  %vm5221_vm5 = vmor %vm1026_vm2, %vm1027_vm3 }
 0x1cd   : > { %v2169_v42 = vpack.c.bf16 %v2145_v58, %v2144_v54  ;;  %v993_v57 = vsub.f32 1.0, %v992_v32  ;;  %v1269_v20 = vsel %vm5182_vm7, %v5095_v0, %v1265_v30  ;;  %v1254_v50 = vsel %vm5198_vm15, %v5089_v62, %v1250_v3  ;;  %vm5874_vm7 = vmmov %vm5861_vm0 }
 0x1ce   : > { %2743 = vmatmul.msk.bf16.gmra.mxu0 %vm5860_vm13, %v3276_v51  ;;  %2754 = vmatmul.msk.bf16.gmra.mxu2 %vm5861_vm0, %v3277_v19  ;;  %vm1256_vm9 = vcmp.eq.f32.partialorder %v1255_v13, 8.507059e+37  ;;  %v1232_v59 = vmul.f32 %v5188_v21, %v5126_v17  ;;  %3265 = vrcp.f32 %v5191_v24  ;;  %v1030_v34 = vand.u32 2147483647, %v5046_v11  ;;  %v3278_v13 = vld [vmem:[%s3472_s18 + $0x18] sm:$0xff] }
 0x1cf   : > { %2452 = vmatpush.bf16.msra.mxu2 %v2169_v42  ;;  %v1217_v62 = vmul.f32 %v5175_v1, %v5119_v26  ;;  %v5231_v0 = vadd.f32 1.0, %v3256_v22  ;;  %v5233_v54 = vadd.f32 1.0, %v3258_v47  ;;  %v1029_v23 = vsel %vm5221_vm5, %v5098_v28, %v1025_v43 }
 0x1d0   : > { %v1033_v29 = vor.u32 1.1754944e-38, %v1032_v52  ;;  %v5238_v38 = vpop.eup %3263  ;;  %vm982_vm6 = vweird.f32 %v5124_v10  ;;  %v1274_v11 = vsel %vm5206_vm8, %v1273_v31, %v1269_v20  ;;  %v1259_v40 = vsel %vm1256_vm9, %v1258_v46, %v1254_v50  ;;  %v5389_v50 = vld [vmem:[%s5626_s4] ss:$0 sm:$0xff] }
 0x1d1   : > { %v980_v8 = vadd.f32 %v5124_v10, %v979_v27  ;;  %v2151_v44 = vmul.f32 %v2077_v9, %v1274_v11  ;;  %v1233_v58 = vsub.f32 1.0, %v1232_v59  ;;  %vm1031_vm4 = vcmp.eq.f32.partialorder %v1030_v34, 8.507059e+37 }
 0x1d2   : > { %v987_v28 = vand.u32 2147483648, %v5072_v49  ;;  %v1218_v22 = vsub.f32 1.0, %v1217_v62  ;;  %v1034_v48 = vsel %vm1031_vm4, %v1033_v29, %v1029_v23  ;;  %vm981_vm1 = vweird.f32 %v5072_v49 }
 0x1d3   : > { %2453 = vmatpush.bf16.msra.mxu2 %v2168_v7  ;;  %v994_v7 = vmul.f32 %v5148_v61, %v993_v57  ;;  %v985_v33 = vand.u32 2147483647, %v5072_v49  ;;  %3267 = vrcp.f32 %v5231_v0  ;;  %v2135_v51 = vmul.f32 %v2045_v15, %v1034_v48  ;;  %vm5256_vm14 = vmor %vm981_vm1, %vm982_vm6  ;;  %v2039_v30 = vpop.permute.xlu2 %2038 }
 0x1d4   : > { %v5251_v25 = vpop.eup %3265  ;;  %vm997_vm10 = vweird.f32 %v5148_v61  ;;  %3269 = vrcp.f32 %v5233_v54  ;;  %v984_v14 = vsel %vm5256_vm14, %v5124_v10, %v980_v8  ;;  %v1002_v49 = vand.u32 2147483648, %v5081_v60 }
 0x1d5   : > { %v2075_v5 = vpop.permute.xlu0 %2074  ;;  %v995_v53 = vadd.f32 %v5148_v61, %v994_v7  ;;  %v988_v4 = vor.u32 1.1754944e-38, %v987_v28  ;;  %vm996_vm11 = vweird.f32 %v5081_v60  ;;  %v1000_v32 = vand.u32 2147483647, %v5081_v60 }
 0x1d6   : > { %v2150_v16 = vmul.f32 %v2075_v5, %v1259_v40  ;;  %v1219_v19 = vmul.f32 %v5175_v1, %v1218_v22  ;;  %vm986_vm12 = vcmp.eq.f32.partialorder %v985_v33, 8.507059e+37  ;;  %vm5274_vm13 = vmor %vm996_vm11, %vm997_vm10  ;;  %v2164_v37 = vpack.c.bf16 %v2135_v51, %v4649_v56 }
 0x1d7   : > { %2454 = vmatpush.bf16.msra.mxu2 %v2167_v12  ;;  %v1234_v12 = vmul.f32 %v5188_v21, %v1233_v58  ;;  %v989_v3 = vsel %vm986_vm12, %v988_v4, %v984_v14  ;;  %v999_v60 = vsel %vm5274_vm13, %v5148_v61, %v995_v53  ;;  %vm1237_vm2 = vweird.f32 %v5188_v21  ;;  %vm5881_vm13 = vmmov %vm5861_vm0  ;;  %v3281_v4 = vld [vmem:[%s3472_s18 + $0x78] sm:$0xff] }
 0x1d8   : > { %v2172_v47 = vpack.c.bf16 %v2151_v44, %v2150_v16  ;;  %v947_v18 = vmul.f32 %v5238_v38, %v5156_v6  ;;  %vm1001_vm15 = vcmp.eq.f32.partialorder %v1000_v32, 8.507059e+37  ;;  %v1220_v61 = vadd.f32 %v5175_v1, %v1219_v19 }
 0x1d9   : > { %v1235_v2 = vadd.f32 %v5188_v21, %v1234_v12  ;;  %v5290_v56 = vpop.eup %3267  ;;  %vm1222_vm3 = vweird.f32 %v5175_v1  ;;  %v962_v52 = vmul.f32 %v5251_v25, %v5191_v24  ;;  %vm1236_vm8 = vweird.f32 %v5126_v17  ;;  %v3280_v12 = vld [vmem:[%s3472_s18 + $0x20] sm:$0xff] }
 0x1da   : > { %2486 = vmatpush.bf16.msra.mxu3 %v2172_v47  ;;  %v5299_v27 = vpop.eup %3269  ;;  %v1242_v55 = vand.u32 2147483648, %v5126_v17  ;;  %v1227_v46 = vand.u32 2147483648, %v5119_v26  ;;  %vm5306_vm9 = vmor %vm1236_vm8, %vm1237_vm2  ;;  %v1240_v45 = vand.u32 2147483647, %v5126_v17  ;;  %vm1221_vm5 = vweird.f32 %v5119_v26 }
 0x1db   : > { %2455 = vmatpush.bf16.msra.mxu2 %v2166_v36  ;;  %v1003_v36 = vor.u32 1.1754944e-38, %v1002_v49  ;;  %v1225_v57 = vand.u32 2147483647, %v5119_v26  ;;  %v2132_v15 = vmul.f32 %v2039_v30, %v989_v3  ;;  %v1187_v20 = vmul.f32 %v5290_v56, %v5231_v0  ;;  %vm5315_vm6 = vmor %vm1221_vm5, %vm1222_vm3  ;;  %v2073_v62 = vpop.permute.xlu2 %2072 }
 0x1dc   : > { %v948_v59 = vsub.f32 1.0, %v947_v18  ;;  %v1239_v41 = vsel %vm5306_vm9, %v5188_v21, %v1235_v2  ;;  %v1224_v17 = vsel %vm5315_vm6, %v5175_v1, %v1220_v61  ;;  %v963_v34 = vsub.f32 1.0, %v962_v52 }
 0x1dd   : > { %v1004_v31 = vsel %vm1001_vm15, %v1003_v36, %v999_v60  ;;  %v1202_v26 = vmul.f32 %v5299_v27, %v5233_v54  ;;  %v1243_v9 = vor.u32 1.1754944e-38, %v1242_v55  ;;  %v1228_v23 = vor.u32 1.1754944e-38, %v1227_v46 }
 0x1de   : > { %2744 = vmatmul.msk.bf16.gmra.mxu0 %vm5861_vm0, %v3278_v13  ;;  %2755 = vmatmul.msk.bf16.gmra.mxu2 %vm5874_vm7, %v3279_v35  ;;  %vm1241_vm4 = vcmp.eq.f32.partialorder %v1240_v45, 8.507059e+37  ;;  %vm1226_vm1 = vcmp.eq.f32.partialorder %v1225_v57, 8.507059e+37  ;;  %v1188_v40 = vsub.f32 1.0, %v1187_v20  ;;  %v949_v21 = vmul.f32 %v5238_v38, %v948_v59  ;;  %v3284_v20 = vld [vmem:[%s3472_s18 + $0x38] sm:$0xff] }
 0x1df   : > { %v2041_v43 = vpop.permute.xlu0 %2040  ;;  %2456 = vmatpush.bf16.msra.mxu2 %v2165_v39  ;;  %v1244_v11 = vsel %vm1241_vm4, %v1243_v9, %v1239_v41  ;;  %v1229_v5 = vsel %vm1226_vm1, %v1228_v23, %v1224_v17  ;;  %v964_v1 = vmul.f32 %v5251_v25, %v963_v34  ;;  %v1203_v16 = vsub.f32 1.0, %v1202_v26  ;;  %v3285_v34 = vld [vmem:[%s3472_s18 + $0x40] sm:$0xff] }
 0x1e0   : > { %v2133_v39 = vmul.f32 %v2041_v43, %v1004_v31  ;;  %v2149_v8 = vmul.f32 %v2073_v62, %v1244_v11  ;;  %v1189_v28 = vmul.f32 %v5290_v56, %v1188_v40  ;;  %vm952_vm14 = vweird.f32 %v5238_v38 }
 0x1e1   : > { %v950_v22 = vadd.f32 %v5238_v38, %v949_v21  ;;  %v965_v48 = vadd.f32 %v5251_v25, %v964_v1  ;;  %vm967_vm10 = vweird.f32 %v5251_v25  ;;  %v1204_v33 = vmul.f32 %v5299_v27, %v1203_v16  ;;  %v3286_v1 = vld [vmem:[%s3472_s18 + $0x48] sm:$0xff] }
 0x1e2   : > { %v2163_v29 = vpack.c.bf16 %v2133_v39, %v2132_v15  ;;  %vm951_vm11 = vweird.f32 %v5156_v6  ;;  %v957_v51 = vand.u32 2147483648, %v5156_v6  ;;  %v972_v42 = vand.u32 2147483648, %v5191_v24  ;;  %v3282_v15 = vld [vmem:[%s3472_s18 + $0x28] sm:$0xff] }
 0x1e3   : > { %2457 = vmatpush.bf16.msra.mxu2 %v2164_v37  ;;  %vm5338_vm12 = vmor %vm951_vm11, %vm952_vm14  ;;  %v955_v14 = vand.u32 2147483647, %v5156_v6  ;;  %vm966_vm0 = vweird.f32 %v5191_v24  ;;  %v970_v49 = vand.u32 2147483647, %v5191_v24  ;;  %v1190_v32 = vadd.f32 %v5290_v56, %v1189_v28 }
 0x1e4   : > { %vm1191_vm2 = vweird.f32 %v5231_v0  ;;  %vm1192_vm15 = vweird.f32 %v5290_v56  ;;  %v1195_v19 = vand.u32 2147483647, %v5231_v0  ;;  %vm5355_vm3 = vmor %vm966_vm0, %vm967_vm10  ;;  %v954_v24 = vsel %vm5338_vm12, %v5238_v38, %v950_v22 }
 0x1e5   : > { %v969_v30 = vsel %vm5355_vm3, %v5251_v25, %v965_v48  ;;  %v1205_v10 = vadd.f32 %v5299_v27, %v1204_v33  ;;  %vm1207_vm8 = vweird.f32 %v5299_v27  ;;  %v1197_v37 = vand.u32 2147483648, %v5231_v0  ;;  %vm5369_vm9 = vmor %vm1191_vm2, %vm1192_vm15 }
 0x1e6   : > { %v2071_v7 = vpop.permute.xlu1 %2070  ;;  %v958_v3 = vor.u32 1.1754944e-38, %v957_v51  ;;  %v973_v13 = vor.u32 1.1754944e-38, %v972_v42  ;;  %v1212_v60 = vand.u32 2147483648, %v5233_v54  ;;  %vm956_vm5 = vcmp.eq.f32.partialorder %v955_v14, 8.507059e+37  ;;  %vm5886_vm11 = vmmov %vm5874_vm7 }
 0x1e7   : > { %v2148_v44 = vmul.f32 %v2071_v7, %v1229_v5  ;;  %2458 = vmatpush.bf16.msra.mxu2 %v2163_v29  ;;  %vm971_vm6 = vcmp.eq.f32.partialorder %v970_v49, 8.507059e+37  ;;  %vm1206_vm4 = vweird.f32 %v5233_v54  ;;  %v1210_v38 = vand.u32 2147483647, %v5233_v54  ;;  %vm5887_vm12 = vmmov %vm5874_vm7  ;;  %v3287_v49 = vld [vmem:[%s3472_s18 + $0x50] sm:$0xff] }
 0x1e8   : > { %v959_v25 = vsel %vm956_vm5, %v958_v3, %v954_v24  ;;  %v974_v36 = vsel %vm971_vm6, %v973_v13, %v969_v30  ;;  %vm1208_vm1 = vmor %vm1206_vm4, %vm1207_vm8  ;;  %v1194_v0 = vsel %vm5369_vm9, %v5290_v56, %v1190_v32  ;;  %v1198_v52 = vor.u32 1.1754944e-38, %v1197_v37  ;;  %v2067_v55 = vpop.permute.xlu2 %2066 }
 0x1e9   : > { %v2171_v58 = vpack.c.bf16 %v2149_v8, %v2148_v44  ;;  %v2035_v47 = vpop.permute.xlu0 %2034  ;;  %v1209_v61 = vsel %vm1208_vm1, %v5299_v27, %v1205_v10  ;;  %v1213_v31 = vor.u32 1.1754944e-38, %v1212_v60  ;;  %vm1196_vm14 = vcmp.eq.f32.partialorder %v1195_v19, 8.507059e+37  ;;  %v3283_v27 = vld [vmem:[%s3472_s18 + $0x30] sm:$0xff]  ;;  %vm5889_vm0 = vmmov %vm5874_vm7 }
 0x1ea   : > { %v2130_v18 = vmul.f32 %v2035_v47, %v959_v25  ;;  %vm1211_vm10 = vcmp.eq.f32.partialorder %v1210_v38, 8.507059e+37  ;;  %v1199_v54 = vsel %vm1196_vm14, %v1198_v52, %v1194_v0  ;;  %vm5891_vm2 = vmmov %vm5889_vm0 }
 0x1eb   : > { %2487 = vmatpush.bf16.msra.mxu3 %v2171_v58  ;;  %v1214_v63 = vsel %vm1211_vm10, %v1213_v31, %v1209_v61  ;;  %v2146_v39 = vmul.f32 %v2067_v55, %v1199_v54 }
 0x1ee   : > { %2745 = vmatmul.msk.bf16.gmra.mxu0 %vm5881_vm13, %v3280_v12  ;;  %2756 = vmatmul.msk.bf16.gmra.mxu2 %vm5874_vm7, %v3281_v4  ;;  %vm5888_vm13 = vmmov %vm5874_vm7 }
 0x1ef   : > { %vm5890_vm7 = vmmov %vm5889_vm0 }
 0x1f2   : > { %v2037_v2 = vpop.permute.xlu1 %2036 }
 0x1f3   : > { %v2131_v43 = vmul.f32 %v2037_v2, %v974_v36 }
 0x1f5   : > { %v2162_v46 = vpack.c.bf16 %v2131_v43, %v2130_v18 }
 0x1f6   : > { %v2069_v45 = vpop.permute.xlu0 %2068 }
 0x1f7   : > { %v2147_v57 = vmul.f32 %v2069_v45, %v1214_v63  ;;  %2459 = vmatpush.bf16.msra.mxu2 %v2162_v46 }
 0x1f9   : > { %v2170_v56 = vpack.c.bf16 %v2147_v57, %v2146_v39 }
 0x1fb   : > { %2488 = vmatpush.bf16.msra.mxu3 %v2170_v56 }
 0x1fe   : > { %2746 = vmatmul.msk.bf16.gmra.mxu0 %vm5886_vm11, %v3282_v15  ;;  %2906 = vmatmul.lmr.bf16.vlgmr.msra.gmra.8.mxu2 }
 0x1ff   : > { %2926 = vmatmul.lmr.bf16.vlgmr.msra.gmra.8.mxu3 }
 0x206   : > { %2907 = vmatmul.lmr.bf16.gmra.8.mxu2 }
 0x207   : > { %2927 = vmatmul.lmr.bf16.gmra.8.mxu3 }
 0x20e   : > { %2747 = vmatmul.msk.bf16.gmra.mxu0 %vm5887_vm12, %v3283_v27  ;;  %2908 = vmatmul.lmr.bf16.gmra.8.mxu2 }
 0x20f   : > { %2928 = vmatmul.lmr.bf16.gmra.8.mxu3 }
 0x216   : > { %2909 = vmatmul.lmr.bf16.gmra.8.mxu2 }
 0x217   : > { %2929 = vmatmul.lmr.bf16.gmra.8.mxu3 }
 0x21e   : > { %2748 = vmatmul.msk.bf16.gmra.mxu0 %vm5888_vm13, %v3284_v20  ;;  %2910 = vmatmul.lmr.bf16.gmra.8.mxu2 }
 0x21f   : > { %2930 = vmatmul.lmr.bf16.gmra.8.mxu3 }
 0x226   : > { %2911 = vmatmul.lmr.bf16.gmra.8.mxu2 }
 0x227   : > { %2931 = vmatmul.lmr.bf16.gmra.8.mxu3 }
 0x22b   : > { %v542_v59 = vpop.f32.mrf.mxu0 }
 0x22c   : > { %v543_v41 = vadd.f32 %v5389_v50, %v542_v59 }
 0x22e   : > { %v622_v17 = vmax.f32 %v543_v41, 0.0  ;;  %2749 = vmatmul.msk.bf16.gmra.mxu0 %vm5889_vm0, %v3285_v34  ;;  %2912 = vmatmul.lmr.bf16.gmra.8.mxu2 }
 0x22f   : > { %2932 = vmatmul.lmr.bf16.gmra.8.mxu3 }
 0x230   : > { %654 = vst [vmem:[%s5396_s17] sm:$0xff] %v622_v17 }
 0x231   : > { %v597_v26 = vpop.f32.mrf.mxu2 }
 0x232   : > { %v598_v9 = vadd.f32 %v5389_v50, %v597_v26 }
 0x233   : > { %v544_v62 = vpop.f32.mrf.mxu0 }
 0x234   : > { %v545_v23 = vadd.f32 %v5389_v50, %v544_v62  ;;  %v644_v29 = vmax.f32 %v598_v9, 0.0 }
 0x236   : > { %v623_v11 = vmax.f32 %v545_v23, 0.0  ;;  %676 = vst [vmem:[%s5396_s17 + $0xb0] sm:$0xff] %v644_v29  ;;  %2913 = vmatmul.lmr.bf16.gmra.8.mxu2 }
 0x237   : > { %2933 = vmatmul.lmr.bf16.gmra.8.mxu3 }
 0x238   : > { %655 = vst [vmem:[%s5396_s17 + $0x8] sm:$0xff] %v623_v11 }
 0x239   : > { %v599_v40 = vpop.f32.mrf.mxu2 }
 0x23a   : > { %v600_v5 = vadd.f32 %v5389_v50, %v599_v40 }
 0x23b   : > { %v547_v7 = vpop.f32.mrf.mxu0 }
 0x23c   : > { %v548_v21 = vadd.f32 %v5389_v50, %v547_v7  ;;  %v645_v8 = vmax.f32 %v600_v5, 0.0 }
 0x23e   : > { %v624_v44 = vmax.f32 %v548_v21, 0.0  ;;  %2750 = vmatmul.msk.bf16.gmra.mxu0 %vm5890_vm7, %v3286_v1  ;;  %677 = vst [vmem:[%s5396_s17 + $0xb8] sm:$0xff] %v645_v8 }
 0x240   : > { %656 = vst [vmem:[%s5396_s17 + $0x10] sm:$0xff] %v624_v44 }
 0x241   : > { %v602_v16 = vpop.f32.mrf.mxu2 }
 0x242   : > { %v603_v58 = vadd.f32 %v5389_v50, %v602_v16 }
 0x243   : > { %v549_v28 = vpop.f32.mrf.mxu0 }
 0x244   : > { %v550_v22 = vadd.f32 %v5389_v50, %v549_v28  ;;  %v646_v48 = vmax.f32 %v603_v58, 0.0 }
 0x246   : > { %v625_v33 = vmax.f32 %v550_v22, 0.0  ;;  %678 = vst [vmem:[%s5396_s17 + $0xc0] sm:$0xff] %v646_v48 }
 0x248   : > { %657 = vst [vmem:[%s5396_s17 + $0x18] sm:$0xff] %v625_v33 }
 0x249   : > { %v604_v47 = vpop.f32.mrf.mxu2 }
 0x24a   : > { %v605_v51 = vadd.f32 %v5389_v50, %v604_v47 }
 0x24b   : > { %v552_v42 = vpop.f32.mrf.mxu0 }
 0x24c   : > { %v553_v53 = vadd.f32 %v5389_v50, %v552_v42  ;;  %v647_v14 = vmax.f32 %v605_v51, 0.0 }
 0x24e   : > { %v626_v12 = vmax.f32 %v553_v53, 0.0  ;;  %2751 = vmatmul.msk.bf16.gmra.mxu0 %vm5891_vm2, %v3287_v49  ;;  %679 = vst [vmem:[%s5396_s17 + $0xc8] sm:$0xff] %v647_v14 }
 0x250   : > { %658 = vst [vmem:[%s5396_s17 + $0x20] sm:$0xff] %v626_v12 }
 0x251   : > { %v607_v4 = vpop.f32.mrf.mxu2 }
 0x252   : > { %v608_v32 = vadd.f32 %v5389_v50, %v607_v4 }
 0x253   : > { %v554_v19 = vpop.f32.mrf.mxu0 }
 0x254   : > { %v555_v6 = vadd.f32 %v5389_v50, %v554_v19  ;;  %v648_v24 = vmax.f32 %v608_v32, 0.0 }
 0x256   : > { %v627_v30 = vmax.f32 %v555_v6, 0.0  ;;  %680 = vst [vmem:[%s5396_s17 + $0xd0] sm:$0xff] %v648_v24 }
 0x258   : > { %659 = vst [vmem:[%s5396_s17 + $0x28] sm:$0xff] %v627_v30 }
 0x259   : > { %v609_v10 = vpop.f32.mrf.mxu2 }
 0x25a   : > { %v610_v37 = vadd.f32 %v5389_v50, %v609_v10 }
 0x25b   : > { %v557_v3 = vpop.f32.mrf.mxu0 }
 0x25c   : > { %v558_v13 = vadd.f32 %v5389_v50, %v557_v3  ;;  %v649_v60 = vmax.f32 %v610_v37, 0.0 }
 0x25e   : > { %v628_v35 = vmax.f32 %v558_v13, 0.0  ;;  %681 = vst [vmem:[%s5396_s17 + $0xd8] sm:$0xff] %v649_v60 }
 0x260   : > { %660 = vst [vmem:[%s5396_s17 + $0x30] sm:$0xff] %v628_v35 }
 0x261   : > { %v612_v38 = vpop.f32.mrf.mxu2 }
 0x262   : > { %v613_v25 = vadd.f32 %v5389_v50, %v612_v38 }
 0x263   : > { %v559_v2 = vpop.f32.mrf.mxu0 }
 0x264   : > { %v560_v36 = vadd.f32 %v5389_v50, %v559_v2  ;;  %v650_v0 = vmax.f32 %v613_v25, 0.0 }
 0x266   : > { %v629_v18 = vmax.f32 %v560_v36, 0.0  ;;  %682 = vst [vmem:[%s5396_s17 + $0xe0] sm:$0xff] %v650_v0 }
 0x268   : > { %661 = vst [vmem:[%s5396_s17 + $0x38] sm:$0xff] %v629_v18 }
 0x269   : > { %v614_v43 = vpop.f32.mrf.mxu2 }
 0x26a   : > { %v615_v61 = vadd.f32 %v5389_v50, %v614_v43 }
 0x26b   : > { %v562_v52 = vpop.f32.mrf.mxu0 }
 0x26c   : > { %v563_v55 = vadd.f32 %v5389_v50, %v562_v52  ;;  %v651_v31 = vmax.f32 %v615_v61, 0.0 }
 0x26e   : > { %v630_v46 = vmax.f32 %v563_v55, 0.0  ;;  %683 = vst [vmem:[%s5396_s17 + $0xe8] sm:$0xff] %v651_v31 }
 0x270   : > { %662 = vst [vmem:[%s5396_s17 + $0x40] sm:$0xff] %v630_v46 }
 0x271   : > { %v617_v54 = vpop.f32.mrf.mxu2 }
 0x272   : > { %v618_v63 = vadd.f32 %v5389_v50, %v617_v54 }
 0x273   : > { %v564_v45 = vpop.f32.mrf.mxu0 }
 0x274   : > { %v565_v39 = vadd.f32 %v5389_v50, %v564_v45  ;;  %v652_v57 = vmax.f32 %v618_v63, 0.0 }
 0x276   : > { %v631_v56 = vmax.f32 %v565_v39, 0.0  ;;  %684 = vst [vmem:[%s5396_s17 + $0xf0] sm:$0xff] %v652_v57 }
 0x278   : > { %663 = vst [vmem:[%s5396_s17 + $0x48] sm:$0xff] %v631_v56 }
 0x279   : > { %v619_v15 = vpop.f32.mrf.mxu2 }
 0x27a   : > { %v620_v27 = vadd.f32 %v5389_v50, %v619_v15 }
 0x27b   : > { %v567_v20 = vpop.f32.mrf.mxu0 }
 0x27c   : > { %v568_v59 = vadd.f32 %v5389_v50, %v567_v20  ;;  %v653_v41 = vmax.f32 %v620_v27, 0.0 }
 0x27e   : > { %v632_v17 = vmax.f32 %v568_v59, 0.0  ;;  %685 = vst [vmem:[%s5396_s17 + $0xf8] sm:$0xff] %v653_v41 }
 0x280   : > { %664 = vst [vmem:[%s5396_s17 + $0x50] sm:$0xff] %v632_v17 }
 0x281   : > { %v2461_v62 = vpop.f32.mrf.mxu2 }
 0x282   : > { %v2490_v23 = vpop.f32.mrf.mxu3 }
 0x283   : > { %v569_v34 = vpop.f32.mrf.mxu0  ;;  %v5445_v29 = vadd.f32 %v2490_v23, %v2461_v62 }
 0x284   : > { %v570_v26 = vadd.f32 %v5389_v50, %v569_v34 }
 0x286   : > { %v633_v9 = vmax.f32 %v570_v26, 0.0 }
 0x288   : > { %665 = vst [vmem:[%s5396_s17 + $0x58] sm:$0xff] %v633_v9 }
 0x289   : > { %v2463_v7 = vpop.f32.mrf.mxu2 }
 0x28a   : > { %v2492_v21 = vpop.f32.mrf.mxu3 }
 0x28b   : > { %v572_v11 = vpop.f32.mrf.mxu0  ;;  %v5449_v8 = vadd.f32 %v2492_v21, %v2463_v7 }
 0x28c   : > { %v573_v40 = vadd.f32 %v5389_v50, %v572_v11 }
 0x28e   : > { %v634_v5 = vmax.f32 %v573_v40, 0.0 }
 0x290   : > { %666 = vst [vmem:[%s5396_s17 + $0x60] sm:$0xff] %v634_v5 }
 0x291   : > { %v2466_v58 = vpop.f32.mrf.mxu2 }
 0x292   : > { %v2495_v28 = vpop.f32.mrf.mxu3 }
 0x293   : > { %v574_v44 = vpop.f32.mrf.mxu0  ;;  %v5453_v22 = vadd.f32 %v2495_v28, %v2466_v58 }
 0x294   : > { %v575_v1 = vadd.f32 %v5389_v50, %v574_v44 }
 0x296   : > { %v635_v16 = vmax.f32 %v575_v1, 0.0 }
 0x298   : > { %667 = vst [vmem:[%s5396_s17 + $0x68] sm:$0xff] %v635_v16 }
 0x299   : > { %v2468_v51 = vpop.f32.mrf.mxu2 }
 0x29a   : > { %v2497_v42 = vpop.f32.mrf.mxu3 }
 0x29b   : > { %v577_v48 = vpop.f32.mrf.mxu0  ;;  %v5457_v53 = vadd.f32 %v2497_v42, %v2468_v51 }
 0x29c   : > { %v578_v33 = vadd.f32 %v5389_v50, %v577_v48 }
 0x29e   : > { %v636_v47 = vmax.f32 %v578_v33, 0.0 }
 0x2a0   : > { %668 = vst [vmem:[%s5396_s17 + $0x70] sm:$0xff] %v636_v47 }
 0x2a1   : > { %v2471_v4 = vpop.f32.mrf.mxu2 }
 0x2a2   : > { %v2500_v32 = vpop.f32.mrf.mxu3 }
 0x2a3   : > { %v579_v14 = vpop.f32.mrf.mxu0  ;;  %v5461_v19 = vadd.f32 %v2500_v32, %v2471_v4 }
 0x2a4   : > { %v580_v12 = vadd.f32 %v5389_v50, %v579_v14 }
 0x2a6   : > { %v637_v49 = vmax.f32 %v580_v12, 0.0 }
 0x2a8   : > { %669 = vst [vmem:[%s5396_s17 + $0x78] sm:$0xff] %v637_v49 }
 0x2a9   : > { %v2473_v10 = vpop.f32.mrf.mxu2 }
 0x2aa   : > { %v2502_v37 = vpop.f32.mrf.mxu3 }
 0x2ab   : > { %v582_v6 = vpop.f32.mrf.mxu0  ;;  %v5465_v3 = vadd.f32 %v2502_v37, %v2473_v10 }
 0x2ac   : > { %v583_v24 = vadd.f32 %v5389_v50, %v582_v6 }
 0x2ae   : > { %v638_v30 = vmax.f32 %v583_v24, 0.0 }
 0x2b0   : > { %670 = vst [vmem:[%s5396_s17 + $0x80] sm:$0xff] %v638_v30 }
 0x2b1   : > { %v2476_v38 = vpop.f32.mrf.mxu2 }
 0x2b2   : > { %v2505_v25 = vpop.f32.mrf.mxu3 }
 0x2b3   : > { %v584_v13 = vpop.f32.mrf.mxu0  ;;  %v2506_v2 = vadd.f32 %v2505_v25, %v2476_v38 }
 0x2b4   : > { %v585_v60 = vadd.f32 %v5389_v50, %v584_v13 }
 0x2b6   : > { %v639_v35 = vmax.f32 %v585_v60, 0.0 }
 0x2b8   : > { %671 = vst [vmem:[%s5396_s17 + $0x88] sm:$0xff] %v639_v35 }
 0x2b9   : > { %v2478_v43 = vpop.f32.mrf.mxu2 }
 0x2ba   : > { %v2507_v61 = vpop.f32.mrf.mxu3 }
 0x2bb   : > { %v587_v36 = vpop.f32.mrf.mxu0  ;;  %v2508_v52 = vadd.f32 %v2507_v61, %v2478_v43 }
 0x2bc   : > { %v588_v0 = vadd.f32 %v5389_v50, %v587_v36 }
 0x2be   : > { %v640_v18 = vmax.f32 %v588_v0, 0.0 }
 0x2c0   : > { %672 = vst [vmem:[%s5396_s17 + $0x90] sm:$0xff] %v640_v18 }
 0x2c3   : > { %v589_v55 = vpop.f32.mrf.mxu0 }
 0x2c4   : > { %v590_v31 = vadd.f32 %v5389_v50, %v589_v55 }
 0x2c6   : > { %v641_v46 = vmax.f32 %v590_v31, 0.0 }
 0x2c8   : > { %673 = vst [vmem:[%s5396_s17 + $0x98] sm:$0xff] %v641_v46 }
 0x2cb   : > { %v592_v54 = vpop.f32.mrf.mxu0 }
 0x2cc   : > { %v593_v63 = vadd.f32 %v5389_v50, %v592_v54 }
 0x2ce   : > { %v642_v45 = vmax.f32 %v593_v63, 0.0 }
 0x2d0   : > { %674 = vst [vmem:[%s5396_s17 + $0xa0] sm:$0xff] %v642_v45 }
 0x2d3   : > { %v594_v39 = vpop.f32.mrf.mxu0 }
 0x2d4   : > { %v595_v57 = vadd.f32 %v5389_v50, %v594_v39  ;;  %2513 = sbr.rel (%p2853_p11) target bundleno = 738 (0x2e2), region = 52 }
 0x2d6   : > { %v643_v56 = vmax.f32 %v595_v57, 0.0 }
 0x2d8   : > { %675 = vst [vmem:[%s5396_s17 + $0xa8] sm:$0xff] %v643_v56 }
 0x2d9   : > { %v2514_v15 = vld [vmem:[%s5622_s0] sm:$0xff]  ;;  %vm2522_vm15 = vcmask 261120   ;;  %v2515_v27 = vld [vmem:[%s5622_s0 + $0x8] sm:$0xff]  ;;  %v2516_v20 = vld [vmem:[%s5622_s0 + $0x10] sm:$0xff] }
 0x2da   : > { %2523 = vst.msk [vmem:[%s5629_s7] sm:$0xff] %vm2522_vm15, %v2514_v15  ;;  %v2517_v50 = vld [vmem:[%s5622_s0 + $0x18] sm:$0xff]  ;;  %v2518_v59 = vld [vmem:[%s5622_s0 + $0x20] sm:$0xff]  ;;  %v2519_v41 = vld [vmem:[%s5622_s0 + $0x28] sm:$0xff] }
 0x2db   : > { %2524 = vst.msk [vmem:[%s5629_s7 + $0x8] sm:$0xff] %vm2522_vm15, %v2515_v27  ;;  %v2520_v17 = vld [vmem:[%s5622_s0 + $0x30] sm:$0xff]  ;;  %v2521_v34 = vld [vmem:[%s5622_s0 + $0x38] sm:$0xff] }
 0x2dc   : > { %2525 = vst.msk [vmem:[%s5629_s7 + $0x10] sm:$0xff] %vm2522_vm15, %v2516_v20 }
 0x2dd   : > { %2526 = vst.msk [vmem:[%s5629_s7 + $0x18] sm:$0xff] %vm2522_vm15, %v2517_v50 }
 0x2de   : > { %2527 = vst.msk [vmem:[%s5629_s7 + $0x20] sm:$0xff] %vm2522_vm15, %v2518_v59 }
 0x2df   : > { %2528 = vst.msk [vmem:[%s5629_s7 + $0x28] sm:$0xff] %vm2522_vm15, %v2519_v41 }
 0x2e0   : > { %2529 = vst.msk [vmem:[%s5629_s7 + $0x30] sm:$0xff] %vm2522_vm15, %v2520_v17 }
 0x2e1   : > { %2530 = vst.msk [vmem:[%s5629_s7 + $0x38] sm:$0xff] %vm2522_vm15, %v2521_v34 }
 0x2e2 PF: > { %v2531_v26 = vld [vmem:[%s5629_s7] sm:$0xff]  ;;  %vm2547_vm3 = vcmask 261120   ;;  %v2532_v9 = vld [vmem:[%s5629_s7 + $0x8] sm:$0xff]  ;;  %s2883_s21 = sshll.u32 %s3425_s9, 8  ;;  %s2572_s25 = sshll.u32 %s5396_s17, 4  ;;  %s2573_s25 = int_to_ptr.vmem [resolvable:$true] %s2572_s25 }
 0x2e3   : > { %v2533_v62 = vld [vmem:[%s5629_s7 + $0x10] sm:$0xff]  ;;  %v2539_v23 = vadd.f32 %v2531_v26, %v5445_v29  ;;  %v2540_v11 = vadd.f32 %v2532_v9, %v5449_v8  ;;  %s2571_s13 = scalar_lea.hbm %s5630_s8, %s2883_s21  ;;  %s5892_s12 = sand.u32 1, %s3342_s28  }
 0x2e4   : > { %v2541_v40 = vadd.f32 %v2533_v62, %v5453_v22  ;;  %v2534_v5 = vld [vmem:[%s5629_s7 + $0x18] sm:$0xff]  ;;  %s2574_s10 = sshll.u32 %s2571_s13, 4  ;;  %s2557_s9 = scalar_lea.sflag [#allocation3], %s5892_s12  ;;  %s2575_s10 = int_to_ptr.hbm [resolvable:$true] %s2574_s10 }
 0x2e5   : > { %v2535_v7 = vld [vmem:[%s5629_s7 + $0x20] sm:$0xff]  ;;  %v2542_v29 = vadd.f32 %v2534_v5, %v5457_v53  ;;  %2548 = vst.msk [vmem:[%s5629_s7] sm:$0xff] %vm2547_vm3, %v2539_v23  ;;  %s3302_s18 = sshra.s32 %s2575_s10, 4  ;;  %s3308_s17 = scalar_lea.hbm %s5630_s8, 512  ;;  %s3303_s18 = int_to_ptr.hbm [resolvable:$true] %s3302_s18 }
 0x2e6   : > { %v2536_v21 = vld [vmem:[%s5629_s7 + $0x28] sm:$0xff]  ;;  %v2543_v44 = vadd.f32 %v2535_v7, %v5461_v19  ;;  %2549 = vst.msk [vmem:[%s5629_s7 + $0x8] sm:$0xff] %vm2547_vm3, %v2540_v11  ;;  %s3304_s26 = scalar_lea.hbm %s3303_s18, 256  ;;  %p3309_p1 = scmp.lt.s32.totalorder %s3303_s18, %s5630_s8 }
 0x2e7   : > { %v2537_v8 = vld [vmem:[%s5629_s7 + $0x30] sm:$0xff]  ;;  %v2544_v16 = vadd.f32 %v2536_v21, %v5465_v3  ;;  %2550 = vst.msk [vmem:[%s5629_s7 + $0x10] sm:$0xff] %vm2547_vm3, %v2541_v40  ;;  %p3305_p12 = scmp.ne.s32.totalorder %s3303_s18, %s3304_s26  ;;  %p3310_p2 = scmp.lt.s32.totalorder %s3308_s17, %s3304_s26 }
 0x2e8   : > { %v2538_v1 = vld [vmem:[%s5629_s7 + $0x38] sm:$0xff]  ;;  %v2545_v58 = vadd.f32 %v2537_v8, %v2506_v2  ;;  %2551 = vst.msk [vmem:[%s5629_s7 + $0x18] sm:$0xff] %vm2547_vm3, %v2542_v29 }
 0x2e9   : > { %v2546_v28 = vadd.f32 %v2538_v1, %v2508_v52  ;;  %2552 = vst.msk [vmem:[%s5629_s7 + $0x20] sm:$0xff] %vm2547_vm3, %v2543_v44  ;;  %p3306_p13 = pnand %p3305_p12, %p3442_p5  ;;  %p3311_p3 = por %p3310_p2, %p3309_p1 }
 0x2ea   : > { %2553 = vst.msk [vmem:[%s5629_s7 + $0x28] sm:$0xff] %vm2547_vm3, %v2544_v16 }
 0x2eb   : > { %2554 = vst.msk [vmem:[%s5629_s7 + $0x30] sm:$0xff] %vm2547_vm3, %v2545_v58  ;;  %p3307_p0 = pneg %p3306_p13 }
 0x2ec   : > { %2555 = vst.msk [vmem:[%s5629_s7 + $0x38] sm:$0xff] %vm2547_vm3, %v2546_v28 }
 0x2ed   : > { %p3312_p4 = pnand %p3311_p3, %p3307_p0 }
 0x2ef   : > { %3315 = shalt.err (!%p3312_p4)
}
 0x2f0   : > { %s3355_s19 = smov 128   ;;  %s3356_s21 = smov 8  }
 0x2f1   : > { %2966 = dma.vmem_to_hbm [thread:$0]  (%p3442_p5), %s2573_s25, 4096, %s2575_s10, %s2557_s9, %s3355_s19, %s3355_s19, %s3356_s21  }
 0x2f2 PF: > { %p2972_p7 = scmp.ge.s32.totalorder %s3350_s30, 2  ;;  %s2592_s24 = sand.u32 1, %s3338_s27  }
 0x2f3   : > { %s2593_s12 = scalar_lea.sflag [#allocation3], %s2592_s24 }
 0x2f4   : > { %p2969_p8 = pnand %p2972_p7, %p3446_p6 }
 0x2f6   : > { %p2970_p9 = pneg %p2969_p8 }
 0x2f8   : > { %3333 = dma.done.wait (%p2970_p9), %s2593_s12, 4096  }
 0x2f9   : > { %3335 = vsyncadd (%p2970_p9), %s2593_s12, 4294963200  ;;  %p19_p10 = scmp.ge.s32.totalorder %s3429_s11, 4   ;;  %s5893_s27 = smov %s3342_s28 }
 0x2fa   : > { %s5894_s28 = smov %s3346_s29  ;;  %s5895_s29 = smov %s3440_s14 }
 0x2fb   : > { %s5896_s30 = smov %s3429_s11  ;;  %21 = sbr.rel (!%p19_p10) target bundleno = 3 (0x3), region = 98 }
 0x300   :  { %2599 = vsyncpa [#allocation3], 1 }
 0x301   :  { %2601 = vsyncpa [#allocation3 + $0x1], 1 }

</bundles_post_ra>
